<compile_context>
chip_gen: v5e
topology: v5e:2x2
jax: 0.10.0
libtpu: 0.0.40
codegen_flags: <defaults>
</compile_context>

<pallas_src>
import jax
import jax.numpy as jnp
from jax.experimental import pallas as pl
from jax.experimental.pallas import tpu as pltpu

# Model hyper-parameters (consistent with the module's __init__).
BATCH = 512              # demo batch; tiled over the grid in blocks of BLOCK_B
INPUT_SIZE = 16          # D (must be even)
HIDDEN_SIZE = 32         # H
N_LAYERS = 5             # Linear layers per coupling MLP
N_COUPLINGS = 4
N_HIDDEN = N_LAYERS - 2  # hidden (H -> H) Linear layers

BLOCK_B = 128            # batch rows per grid step (MXU-friendly on v5e/v6e/v7x)
LL_LANES = 128           # lane-dense width for the log-likelihood output slab


def _logistic_log_prob(y):
    # -(softplus(y) + softplus(-y)) computed stably: -(|y| + 2*log1p(exp(-|y|)))
    a = jnp.abs(y)
    return -(a + 2.0 * jnp.log1p(jnp.exp(-a)))


def nice_kernel(x1_ref, x2_ref, w_in_ref, b_in_ref, w_hid_ref, b_hid_ref,
                w_out_ref, b_out_ref, es1_ref, es2_ref,
                y1_ref, y2_ref, ll_ref):
    # Halves stay as separate (TB, D/2) values for the whole coupling stack.
    x1 = x1_ref[...]                       # (TB, D/2)
    x2 = x2_ref[...]                       # (TB, D/2)

    # ---- additive coupling stack (statically unrolled) ----
    for i in range(N_COUPLINGS):
        src = x1 if i % 2 == 0 else x2     # even parity shifts x2, odd shifts x1

        # MLP m(src): Linear(D/2->H)+ReLU, (N_HIDDEN x) Linear(H->H)+ReLU, Linear(H->D/2)
        h = jnp.dot(src, w_in_ref[i], preferred_element_type=jnp.float32) + b_in_ref[i]
        h = jnp.maximum(h, 0.0)
        for l in range(N_HIDDEN):
            h = jnp.dot(h, w_hid_ref[i, l], preferred_element_type=jnp.float32) + b_hid_ref[i, l]
            h = jnp.maximum(h, 0.0)
        shift = jnp.dot(h, w_out_ref[i], preferred_element_type=jnp.float32) + b_out_ref[i]

        if i % 2 == 0:
            x2 = x2 + shift
        else:
            x1 = x1 + shift

    # ---- scaling layer (exp(log_scale) precomputed in the wrapper) ----
    y1 = x1 * es1_ref[...]                 # (TB, D/2) * (1, D/2)
    y2 = x2 * es2_ref[...]

    # ---- logistic prior log-prob, reduced over features (det added outside) ----
    ll = (jnp.sum(_logistic_log_prob(y1), axis=1, keepdims=True)
          + jnp.sum(_logistic_log_prob(y2), axis=1, keepdims=True))   # (TB, 1)

    y1_ref[...] = y1.astype(y1_ref.dtype)
    y2_ref[...] = y2.astype(y2_ref.dtype)
    # Lane-dense unmasked store; the wrapper reads column 0.
    ll_ref[...] = jnp.broadcast_to(ll, ll_ref.shape).astype(ll_ref.dtype)


def make_params(key):
    ks = jax.random.split(key, 7)
    d_half = INPUT_SIZE // 2
    scale = 0.1
    params = dict(
        w_in=scale * jax.random.normal(ks[0], (N_COUPLINGS, d_half, HIDDEN_SIZE), jnp.float32),
        b_in=scale * jax.random.normal(ks[1], (N_COUPLINGS, 1, HIDDEN_SIZE), jnp.float32),
        w_hid=scale * jax.random.normal(ks[2], (N_COUPLINGS, N_HIDDEN, HIDDEN_SIZE, HIDDEN_SIZE), jnp.float32),
        b_hid=scale * jax.random.normal(ks[3], (N_COUPLINGS, N_HIDDEN, 1, HIDDEN_SIZE), jnp.float32),
        w_out=scale * jax.random.normal(ks[4], (N_COUPLINGS, HIDDEN_SIZE, d_half), jnp.float32),
        b_out=scale * jax.random.normal(ks[5], (N_COUPLINGS, 1, d_half), jnp.float32),
        log_scale=scale * jax.random.normal(ks[6], (1, INPUT_SIZE), jnp.float32),
    )
    return params


def nice_forward(x, params, block_b=BLOCK_B):
    B, D = x.shape
    d = D // 2
    if B % block_b != 0:
        block_b = B                        # small-batch fallback: one block
    grid = (B // block_b,)

    # Split halves once in the wrapper; hoist loop-invariant scaling constants.
    x1 = x[:, :d]
    x2 = x[:, d:]
    log_scale = params["log_scale"]
    exp_scale = jnp.exp(log_scale)
    es1 = exp_scale[:, :d]
    es2 = exp_scale[:, d:]
    det = jnp.sum(log_scale)               # scalar log-det, added outside the kernel

    def row_spec():
        return pl.BlockSpec((block_b, d), lambda b: (b, 0))

    def full_spec(a):
        # Whole-array block, same block index every grid step (no re-DMA).
        return pl.BlockSpec(a.shape, lambda b, _nd=a.ndim: (0,) * _nd)

    y1, y2, ll_slab = pl.pallas_call(
        nice_kernel,
        grid=grid,
        out_shape=(
            jax.ShapeDtypeStruct((B, d), jnp.float32),
            jax.ShapeDtypeStruct((B, d), jnp.float32),
            jax.ShapeDtypeStruct((B, LL_LANES), jnp.float32),
        ),
        in_specs=[
            row_spec(), row_spec(),
            full_spec(params["w_in"]), full_spec(params["b_in"]),
            full_spec(params["w_hid"]), full_spec(params["b_hid"]),
            full_spec(params["w_out"]), full_spec(params["b_out"]),
            full_spec(es1), full_spec(es2),
        ],
        out_specs=(
            row_spec(), row_spec(),
            pl.BlockSpec((block_b, LL_LANES), lambda b: (b, 0)),
        ),
        compiler_params=pltpu.CompilerParams(
            dimension_semantics=("parallel",)),   # shards batch tiles across v7x's 2 TCs
    )(x1, x2, params["w_in"], params["b_in"], params["w_hid"], params["b_hid"],
      params["w_out"], params["b_out"], es1, es2)

    y = jnp.concatenate([y1, y2], axis=-1)        # (B, D) -- single concat, outside kernel
    ll = ll_slab[:, 0] + det                      # (B,)
    return y, ll


def nice_forward_ref(x, params):
    """Pure-JAX reference with identical semantics (for verification)."""
    d = INPUT_SIZE // 2
    for i in range(N_COUPLINGS):
        x1, x2 = x[:, :d], x[:, d:]
        src, tgt = (x1, x2) if i % 2 == 0 else (x2, x1)
        h = jnp.maximum(src @ params["w_in"][i] + params["b_in"][i], 0.0)
        for l in range(N_HIDDEN):
            h = jnp.maximum(h @ params["w_hid"][i, l] + params["b_hid"][i, l], 0.0)
        shift = h @ params["w_out"][i] + params["b_out"][i]
        tgt = tgt + shift
        x = jnp.concatenate([src, tgt], -1) if i % 2 == 0 else jnp.concatenate([tgt, src], -1)
    log_scale = params["log_scale"]
    y = x * jnp.exp(log_scale)
    det = jnp.sum(log_scale)
    ll = jnp.sum(_logistic_log_prob(y), axis=1) + det
    return y, ll


if __name__ == "__main__":
    key = jax.random.PRNGKey(0)
    kx, kp = jax.random.split(key)
    x = jax.random.normal(kx, (BATCH, INPUT_SIZE), jnp.float32)
    params = make_params(kp)

    y, ll = jax.jit(nice_forward)(x, params)
    jax.block_until_ready((y, ll))

    y_ref, ll_ref = nice_forward_ref(x, params)
    assert y.shape == (BATCH, INPUT_SIZE) and ll.shape == (BATCH,)
    assert jnp.allclose(y, y_ref, atol=1e-4, rtol=1e-4)
    assert jnp.allclose(ll, ll_ref, atol=1e-4, rtol=1e-4)

    print("KERNEL_OK")
</pallas_src>

<mosaic_0001>
module attributes {stable_mosaic.version = 11 : i64} {
  func.func @nice_kernel(%arg0: i32, %arg1: memref<128x8xf32, #tpu.memory_space<vmem>>, %arg2: memref<128x8xf32, #tpu.memory_space<vmem>>, %arg3: memref<4x8x32xf32, #tpu.memory_space<vmem>>, %arg4: memref<4x1x32xf32, #tpu.memory_space<vmem>>, %arg5: memref<4x3x32x32xf32, #tpu.memory_space<vmem>>, %arg6: memref<4x3x1x32xf32, #tpu.memory_space<vmem>>, %arg7: memref<4x32x8xf32, #tpu.memory_space<vmem>>, %arg8: memref<4x1x8xf32, #tpu.memory_space<vmem>>, %arg9: memref<1x8xf32, #tpu.memory_space<vmem>>, %arg10: memref<1x8xf32, #tpu.memory_space<vmem>>, %arg11: memref<128x8xf32, #tpu.memory_space<vmem>>, %arg12: memref<128x8xf32, #tpu.memory_space<vmem>>, %arg13: memref<128x128xf32, #tpu.memory_space<vmem>>) attributes {dimension_semantics = [#tpu.dimension_semantics<parallel>], iteration_bounds = array<i64: 4>, scalar_prefetch = 0 : i64, scratch_operands = 0 : i64, tpu.core_type = #tpu.core_type<tc>, window_params = [{transform_indices = @transform_0, window_bounds = array<i64: 128, 8>}, {transform_indices = @transform_1, window_bounds = array<i64: 128, 8>}, {pipeline_mode = #tpu.pipeline_mode<synchronous>, transform_indices = @transform_2, window_bounds = array<i64: 4, 8, 32>}, {pipeline_mode = #tpu.pipeline_mode<synchronous>, transform_indices = @transform_3, window_bounds = array<i64: 4, 1, 32>}, {pipeline_mode = #tpu.pipeline_mode<synchronous>, transform_indices = @transform_4, window_bounds = array<i64: 4, 3, 32, 32>}, {pipeline_mode = #tpu.pipeline_mode<synchronous>, transform_indices = @transform_5, window_bounds = array<i64: 4, 3, 1, 32>}, {pipeline_mode = #tpu.pipeline_mode<synchronous>, transform_indices = @transform_6, window_bounds = array<i64: 4, 32, 8>}, {pipeline_mode = #tpu.pipeline_mode<synchronous>, transform_indices = @transform_7, window_bounds = array<i64: 4, 1, 8>}, {pipeline_mode = #tpu.pipeline_mode<synchronous>, transform_indices = @transform_8, window_bounds = array<i64: 1, 8>}, {pipeline_mode = #tpu.pipeline_mode<synchronous>, transform_indices = @transform_9, window_bounds = array<i64: 1, 8>}, {transform_indices = @transform_10, window_bounds = array<i64: 128, 8>}, {transform_indices = @transform_11, window_bounds = array<i64: 128, 8>}, {transform_indices = @transform_12, window_bounds = array<i64: 128, 128>}]} {
    %c0 = arith.constant 0 : index
    %c0_0 = arith.constant 0 : index
    %0 = vector.load %arg1[%c0, %c0_0] : memref<128x8xf32, #tpu.memory_space<vmem>>, vector<128x8xf32>
    %c0_1 = arith.constant 0 : index
    %c0_2 = arith.constant 0 : index
    %1 = vector.load %arg2[%c0_1, %c0_2] : memref<128x8xf32, #tpu.memory_space<vmem>>, vector<128x8xf32>
    %c0_3 = arith.constant 0 : index
    %c0_4 = arith.constant 0 : index
    %c0_5 = arith.constant 0 : index
    %2 = vector.load %arg3[%c0_3, %c0_4, %c0_5] : memref<4x8x32xf32, #tpu.memory_space<vmem>>, vector<1x8x32xf32>
    %3 = vector.shape_cast %2 : vector<1x8x32xf32> to vector<8x32xf32>
    %cst = arith.constant dense<0.000000e+00> : vector<128x32xf32>
    %4 = tpu.matmul %0, %3, %cst {dimension_numbers = #tpu.dot_dimension_numbers<[1], [0], [0], [1], [0, 0, 1, 1], [], []>} : vector<128x8xf32>, vector<8x32xf32>, vector<128x32xf32> -> vector<128x32xf32>
    %c0_6 = arith.constant 0 : index
    %c0_7 = arith.constant 0 : index
    %c0_8 = arith.constant 0 : index
    %5 = vector.load %arg4[%c0_6, %c0_7, %c0_8] : memref<4x1x32xf32, #tpu.memory_space<vmem>>, vector<1x1x32xf32>
    %6 = vector.shape_cast %5 : vector<1x1x32xf32> to vector<1x32xf32>
    %7 = vector.broadcast %6 : vector<1x32xf32> to vector<128x32xf32>
    %8 = arith.addf %4, %7 : vector<128x32xf32>
    %cst_9 = arith.constant 0.000000e+00 : f32
    %9 = vector.broadcast %cst_9 : f32 to vector<128x32xf32>
    %10 = arith.maximumf %8, %9 : vector<128x32xf32>
    %c0_10 = arith.constant 0 : index
    %c0_11 = arith.constant 0 : index
    %c0_12 = arith.constant 0 : index
    %c0_13 = arith.constant 0 : index
    %11 = vector.load %arg5[%c0_10, %c0_11, %c0_12, %c0_13] : memref<4x3x32x32xf32, #tpu.memory_space<vmem>>, vector<1x1x32x32xf32>
    %12 = vector.shape_cast %11 : vector<1x1x32x32xf32> to vector<32x32xf32>
    %cst_14 = arith.constant dense<0.000000e+00> : vector<128x32xf32>
    %13 = tpu.matmul %10, %12, %cst_14 {dimension_numbers = #tpu.dot_dimension_numbers<[1], [0], [0], [1], [0, 0, 1, 1], [], []>} : vector<128x32xf32>, vector<32x32xf32>, vector<128x32xf32> -> vector<128x32xf32>
    %c0_15 = arith.constant 0 : index
    %c0_16 = arith.constant 0 : index
    %c0_17 = arith.constant 0 : index
    %c0_18 = arith.constant 0 : index
    %14 = vector.load %arg6[%c0_15, %c0_16, %c0_17, %c0_18] : memref<4x3x1x32xf32, #tpu.memory_space<vmem>>, vector<1x1x1x32xf32>
    %15 = vector.shape_cast %14 : vector<1x1x1x32xf32> to vector<1x32xf32>
    %16 = vector.broadcast %15 : vector<1x32xf32> to vector<128x32xf32>
    %17 = arith.addf %13, %16 : vector<128x32xf32>
    %cst_19 = arith.constant 0.000000e+00 : f32
    %18 = vector.broadcast %cst_19 : f32 to vector<128x32xf32>
    %19 = arith.maximumf %17, %18 : vector<128x32xf32>
    %c0_20 = arith.constant 0 : index
    %c1 = arith.constant 1 : index
    %c0_21 = arith.constant 0 : index
    %c0_22 = arith.constant 0 : index
    %20 = vector.load %arg5[%c0_20, %c1, %c0_21, %c0_22] : memref<4x3x32x32xf32, #tpu.memory_space<vmem>>, vector<1x1x32x32xf32>
    %21 = vector.shape_cast %20 : vector<1x1x32x32xf32> to vector<32x32xf32>
    %cst_23 = arith.constant dense<0.000000e+00> : vector<128x32xf32>
    %22 = tpu.matmul %19, %21, %cst_23 {dimension_numbers = #tpu.dot_dimension_numbers<[1], [0], [0], [1], [0, 0, 1, 1], [], []>} : vector<128x32xf32>, vector<32x32xf32>, vector<128x32xf32> -> vector<128x32xf32>
    %c0_24 = arith.constant 0 : index
    %c1_25 = arith.constant 1 : index
    %c0_26 = arith.constant 0 : index
    %c0_27 = arith.constant 0 : index
    %23 = vector.load %arg6[%c0_24, %c1_25, %c0_26, %c0_27] : memref<4x3x1x32xf32, #tpu.memory_space<vmem>>, vector<1x1x1x32xf32>
    %24 = vector.shape_cast %23 : vector<1x1x1x32xf32> to vector<1x32xf32>
    %25 = vector.broadcast %24 : vector<1x32xf32> to vector<128x32xf32>
    %26 = arith.addf %22, %25 : vector<128x32xf32>
    %cst_28 = arith.constant 0.000000e+00 : f32
    %27 = vector.broadcast %cst_28 : f32 to vector<128x32xf32>
    %28 = arith.maximumf %26, %27 : vector<128x32xf32>
    %c0_29 = arith.constant 0 : index
    %c2 = arith.constant 2 : index
    %c0_30 = arith.constant 0 : index
    %c0_31 = arith.constant 0 : index
    %29 = vector.load %arg5[%c0_29, %c2, %c0_30, %c0_31] : memref<4x3x32x32xf32, #tpu.memory_space<vmem>>, vector<1x1x32x32xf32>
    %30 = vector.shape_cast %29 : vector<1x1x32x32xf32> to vector<32x32xf32>
    %cst_32 = arith.constant dense<0.000000e+00> : vector<128x32xf32>
    %31 = tpu.matmul %28, %30, %cst_32 {dimension_numbers = #tpu.dot_dimension_numbers<[1], [0], [0], [1], [0, 0, 1, 1], [], []>} : vector<128x32xf32>, vector<32x32xf32>, vector<128x32xf32> -> vector<128x32xf32>
    %c0_33 = arith.constant 0 : index
    %c2_34 = arith.constant 2 : index
    %c0_35 = arith.constant 0 : index
    %c0_36 = arith.constant 0 : index
    %32 = vector.load %arg6[%c0_33, %c2_34, %c0_35, %c0_36] : memref<4x3x1x32xf32, #tpu.memory_space<vmem>>, vector<1x1x1x32xf32>
    %33 = vector.shape_cast %32 : vector<1x1x1x32xf32> to vector<1x32xf32>
    %34 = vector.broadcast %33 : vector<1x32xf32> to vector<128x32xf32>
    %35 = arith.addf %31, %34 : vector<128x32xf32>
    %cst_37 = arith.constant 0.000000e+00 : f32
    %36 = vector.broadcast %cst_37 : f32 to vector<128x32xf32>
    %37 = arith.maximumf %35, %36 : vector<128x32xf32>
    %c0_38 = arith.constant 0 : index
    %c0_39 = arith.constant 0 : index
    %c0_40 = arith.constant 0 : index
    %38 = vector.load %arg7[%c0_38, %c0_39, %c0_40] : memref<4x32x8xf32, #tpu.memory_space<vmem>>, vector<1x32x8xf32>
    %39 = vector.shape_cast %38 : vector<1x32x8xf32> to vector<32x8xf32>
    %cst_41 = arith.constant dense<0.000000e+00> : vector<128x8xf32>
    %40 = tpu.matmul %37, %39, %cst_41 {dimension_numbers = #tpu.dot_dimension_numbers<[1], [0], [0], [1], [0, 0, 1, 1], [], []>} : vector<128x32xf32>, vector<32x8xf32>, vector<128x8xf32> -> vector<128x8xf32>
    %c0_42 = arith.constant 0 : index
    %c0_43 = arith.constant 0 : index
    %c0_44 = arith.constant 0 : index
    %41 = vector.load %arg8[%c0_42, %c0_43, %c0_44] : memref<4x1x8xf32, #tpu.memory_space<vmem>>, vector<1x1x8xf32>
    %42 = vector.shape_cast %41 : vector<1x1x8xf32> to vector<1x8xf32>
    %43 = vector.broadcast %42 : vector<1x8xf32> to vector<128x8xf32>
    %44 = arith.addf %40, %43 : vector<128x8xf32>
    %45 = arith.addf %1, %44 : vector<128x8xf32>
    %c1_45 = arith.constant 1 : index
    %c0_46 = arith.constant 0 : index
    %c0_47 = arith.constant 0 : index
    %46 = vector.load %arg3[%c1_45, %c0_46, %c0_47] : memref<4x8x32xf32, #tpu.memory_space<vmem>>, vector<1x8x32xf32>
    %47 = vector.shape_cast %46 : vector<1x8x32xf32> to vector<8x32xf32>
    %cst_48 = arith.constant dense<0.000000e+00> : vector<128x32xf32>
    %48 = tpu.matmul %45, %47, %cst_48 {dimension_numbers = #tpu.dot_dimension_numbers<[1], [0], [0], [1], [0, 0, 1, 1], [], []>} : vector<128x8xf32>, vector<8x32xf32>, vector<128x32xf32> -> vector<128x32xf32>
    %c1_49 = arith.constant 1 : index
    %c0_50 = arith.constant 0 : index
    %c0_51 = arith.constant 0 : index
    %49 = vector.load %arg4[%c1_49, %c0_50, %c0_51] : memref<4x1x32xf32, #tpu.memory_space<vmem>>, vector<1x1x32xf32>
    %50 = vector.shape_cast %49 : vector<1x1x32xf32> to vector<1x32xf32>
    %51 = vector.broadcast %50 : vector<1x32xf32> to vector<128x32xf32>
    %52 = arith.addf %48, %51 : vector<128x32xf32>
    %cst_52 = arith.constant 0.000000e+00 : f32
    %53 = vector.broadcast %cst_52 : f32 to vector<128x32xf32>
    %54 = arith.maximumf %52, %53 : vector<128x32xf32>
    %c1_53 = arith.constant 1 : index
    %c0_54 = arith.constant 0 : index
    %c0_55 = arith.constant 0 : index
    %c0_56 = arith.constant 0 : index
    %55 = vector.load %arg5[%c1_53, %c0_54, %c0_55, %c0_56] : memref<4x3x32x32xf32, #tpu.memory_space<vmem>>, vector<1x1x32x32xf32>
    %56 = vector.shape_cast %55 : vector<1x1x32x32xf32> to vector<32x32xf32>
    %cst_57 = arith.constant dense<0.000000e+00> : vector<128x32xf32>
    %57 = tpu.matmul %54, %56, %cst_57 {dimension_numbers = #tpu.dot_dimension_numbers<[1], [0], [0], [1], [0, 0, 1, 1], [], []>} : vector<128x32xf32>, vector<32x32xf32>, vector<128x32xf32> -> vector<128x32xf32>
    %c1_58 = arith.constant 1 : index
    %c0_59 = arith.constant 0 : index
    %c0_60 = arith.constant 0 : index
    %c0_61 = arith.constant 0 : index
    %58 = vector.load %arg6[%c1_58, %c0_59, %c0_60, %c0_61] : memref<4x3x1x32xf32, #tpu.memory_space<vmem>>, vector<1x1x1x32xf32>
    %59 = vector.shape_cast %58 : vector<1x1x1x32xf32> to vector<1x32xf32>
    %60 = vector.broadcast %59 : vector<1x32xf32> to vector<128x32xf32>
    %61 = arith.addf %57, %60 : vector<128x32xf32>
    %cst_62 = arith.constant 0.000000e+00 : f32
    %62 = vector.broadcast %cst_62 : f32 to vector<128x32xf32>
    %63 = arith.maximumf %61, %62 : vector<128x32xf32>
    %c1_63 = arith.constant 1 : index
    %c1_64 = arith.constant 1 : index
    %c0_65 = arith.constant 0 : index
    %c0_66 = arith.constant 0 : index
    %64 = vector.load %arg5[%c1_63, %c1_64, %c0_65, %c0_66] : memref<4x3x32x32xf32, #tpu.memory_space<vmem>>, vector<1x1x32x32xf32>
    %65 = vector.shape_cast %64 : vector<1x1x32x32xf32> to vector<32x32xf32>
    %cst_67 = arith.constant dense<0.000000e+00> : vector<128x32xf32>
    %66 = tpu.matmul %63, %65, %cst_67 {dimension_numbers = #tpu.dot_dimension_numbers<[1], [0], [0], [1], [0, 0, 1, 1], [], []>} : vector<128x32xf32>, vector<32x32xf32>, vector<128x32xf32> -> vector<128x32xf32>
    %c1_68 = arith.constant 1 : index
    %c1_69 = arith.constant 1 : index
    %c0_70 = arith.constant 0 : index
    %c0_71 = arith.constant 0 : index
    %67 = vector.load %arg6[%c1_68, %c1_69, %c0_70, %c0_71] : memref<4x3x1x32xf32, #tpu.memory_space<vmem>>, vector<1x1x1x32xf32>
    %68 = vector.shape_cast %67 : vector<1x1x1x32xf32> to vector<1x32xf32>
    %69 = vector.broadcast %68 : vector<1x32xf32> to vector<128x32xf32>
    %70 = arith.addf %66, %69 : vector<128x32xf32>
    %cst_72 = arith.constant 0.000000e+00 : f32
    %71 = vector.broadcast %cst_72 : f32 to vector<128x32xf32>
    %72 = arith.maximumf %70, %71 : vector<128x32xf32>
    %c1_73 = arith.constant 1 : index
    %c2_74 = arith.constant 2 : index
    %c0_75 = arith.constant 0 : index
    %c0_76 = arith.constant 0 : index
    %73 = vector.load %arg5[%c1_73, %c2_74, %c0_75, %c0_76] : memref<4x3x32x32xf32, #tpu.memory_space<vmem>>, vector<1x1x32x32xf32>
    %74 = vector.shape_cast %73 : vector<1x1x32x32xf32> to vector<32x32xf32>
    %cst_77 = arith.constant dense<0.000000e+00> : vector<128x32xf32>
    %75 = tpu.matmul %72, %74, %cst_77 {dimension_numbers = #tpu.dot_dimension_numbers<[1], [0], [0], [1], [0, 0, 1, 1], [], []>} : vector<128x32xf32>, vector<32x32xf32>, vector<128x32xf32> -> vector<128x32xf32>
    %c1_78 = arith.constant 1 : index
    %c2_79 = arith.constant 2 : index
    %c0_80 = arith.constant 0 : index
    %c0_81 = arith.constant 0 : index
    %76 = vector.load %arg6[%c1_78, %c2_79, %c0_80, %c0_81] : memref<4x3x1x32xf32, #tpu.memory_space<vmem>>, vector<1x1x1x32xf32>
    %77 = vector.shape_cast %76 : vector<1x1x1x32xf32> to vector<1x32xf32>
    %78 = vector.broadcast %77 : vector<1x32xf32> to vector<128x32xf32>
    %79 = arith.addf %75, %78 : vector<128x32xf32>
    %cst_82 = arith.constant 0.000000e+00 : f32
    %80 = vector.broadcast %cst_82 : f32 to vector<128x32xf32>
    %81 = arith.maximumf %79, %80 : vector<128x32xf32>
    %c1_83 = arith.constant 1 : index
    %c0_84 = arith.constant 0 : index
    %c0_85 = arith.constant 0 : index
    %82 = vector.load %arg7[%c1_83, %c0_84, %c0_85] : memref<4x32x8xf32, #tpu.memory_space<vmem>>, vector<1x32x8xf32>
    %83 = vector.shape_cast %82 : vector<1x32x8xf32> to vector<32x8xf32>
    %cst_86 = arith.constant dense<0.000000e+00> : vector<128x8xf32>
    %84 = tpu.matmul %81, %83, %cst_86 {dimension_numbers = #tpu.dot_dimension_numbers<[1], [0], [0], [1], [0, 0, 1, 1], [], []>} : vector<128x32xf32>, vector<32x8xf32>, vector<128x8xf32> -> vector<128x8xf32>
    %c1_87 = arith.constant 1 : index
    %c0_88 = arith.constant 0 : index
    %c0_89 = arith.constant 0 : index
    %85 = vector.load %arg8[%c1_87, %c0_88, %c0_89] : memref<4x1x8xf32, #tpu.memory_space<vmem>>, vector<1x1x8xf32>
    %86 = vector.shape_cast %85 : vector<1x1x8xf32> to vector<1x8xf32>
    %87 = vector.broadcast %86 : vector<1x8xf32> to vector<128x8xf32>
    %88 = arith.addf %84, %87 : vector<128x8xf32>
    %89 = arith.addf %0, %88 : vector<128x8xf32>
    %c2_90 = arith.constant 2 : index
    %c0_91 = arith.constant 0 : index
    %c0_92 = arith.constant 0 : index
    %90 = vector.load %arg3[%c2_90, %c0_91, %c0_92] : memref<4x8x32xf32, #tpu.memory_space<vmem>>, vector<1x8x32xf32>
    %91 = vector.shape_cast %90 : vector<1x8x32xf32> to vector<8x32xf32>
    %cst_93 = arith.constant dense<0.000000e+00> : vector<128x32xf32>
    %92 = tpu.matmul %89, %91, %cst_93 {dimension_numbers = #tpu.dot_dimension_numbers<[1], [0], [0], [1], [0, 0, 1, 1], [], []>} : vector<128x8xf32>, vector<8x32xf32>, vector<128x32xf32> -> vector<128x32xf32>
    %c2_94 = arith.constant 2 : index
    %c0_95 = arith.constant 0 : index
    %c0_96 = arith.constant 0 : index
    %93 = vector.load %arg4[%c2_94, %c0_95, %c0_96] : memref<4x1x32xf32, #tpu.memory_space<vmem>>, vector<1x1x32xf32>
    %94 = vector.shape_cast %93 : vector<1x1x32xf32> to vector<1x32xf32>
    %95 = vector.broadcast %94 : vector<1x32xf32> to vector<128x32xf32>
    %96 = arith.addf %92, %95 : vector<128x32xf32>
    %cst_97 = arith.constant 0.000000e+00 : f32
    %97 = vector.broadcast %cst_97 : f32 to vector<128x32xf32>
    %98 = arith.maximumf %96, %97 : vector<128x32xf32>
    %c2_98 = arith.constant 2 : index
    %c0_99 = arith.constant 0 : index
    %c0_100 = arith.constant 0 : index
    %c0_101 = arith.constant 0 : index
    %99 = vector.load %arg5[%c2_98, %c0_99, %c0_100, %c0_101] : memref<4x3x32x32xf32, #tpu.memory_space<vmem>>, vector<1x1x32x32xf32>
    %100 = vector.shape_cast %99 : vector<1x1x32x32xf32> to vector<32x32xf32>
    %cst_102 = arith.constant dense<0.000000e+00> : vector<128x32xf32>
    %101 = tpu.matmul %98, %100, %cst_102 {dimension_numbers = #tpu.dot_dimension_numbers<[1], [0], [0], [1], [0, 0, 1, 1], [], []>} : vector<128x32xf32>, vector<32x32xf32>, vector<128x32xf32> -> vector<128x32xf32>
    %c2_103 = arith.constant 2 : index
    %c0_104 = arith.constant 0 : index
    %c0_105 = arith.constant 0 : index
    %c0_106 = arith.constant 0 : index
    %102 = vector.load %arg6[%c2_103, %c0_104, %c0_105, %c0_106] : memref<4x3x1x32xf32, #tpu.memory_space<vmem>>, vector<1x1x1x32xf32>
    %103 = vector.shape_cast %102 : vector<1x1x1x32xf32> to vector<1x32xf32>
    %104 = vector.broadcast %103 : vector<1x32xf32> to vector<128x32xf32>
    %105 = arith.addf %101, %104 : vector<128x32xf32>
    %cst_107 = arith.constant 0.000000e+00 : f32
    %106 = vector.broadcast %cst_107 : f32 to vector<128x32xf32>
    %107 = arith.maximumf %105, %106 : vector<128x32xf32>
    %c2_108 = arith.constant 2 : index
    %c1_109 = arith.constant 1 : index
    %c0_110 = arith.constant 0 : index
    %c0_111 = arith.constant 0 : index
    %108 = vector.load %arg5[%c2_108, %c1_109, %c0_110, %c0_111] : memref<4x3x32x32xf32, #tpu.memory_space<vmem>>, vector<1x1x32x32xf32>
    %109 = vector.shape_cast %108 : vector<1x1x32x32xf32> to vector<32x32xf32>
    %cst_112 = arith.constant dense<0.000000e+00> : vector<128x32xf32>
    %110 = tpu.matmul %107, %109, %cst_112 {dimension_numbers = #tpu.dot_dimension_numbers<[1], [0], [0], [1], [0, 0, 1, 1], [], []>} : vector<128x32xf32>, vector<32x32xf32>, vector<128x32xf32> -> vector<128x32xf32>
    %c2_113 = arith.constant 2 : index
    %c1_114 = arith.constant 1 : index
    %c0_115 = arith.constant 0 : index
    %c0_116 = arith.constant 0 : index
    %111 = vector.load %arg6[%c2_113, %c1_114, %c0_115, %c0_116] : memref<4x3x1x32xf32, #tpu.memory_space<vmem>>, vector<1x1x1x32xf32>
    %112 = vector.shape_cast %111 : vector<1x1x1x32xf32> to vector<1x32xf32>
    %113 = vector.broadcast %112 : vector<1x32xf32> to vector<128x32xf32>
    %114 = arith.addf %110, %113 : vector<128x32xf32>
    %cst_117 = arith.constant 0.000000e+00 : f32
    %115 = vector.broadcast %cst_117 : f32 to vector<128x32xf32>
    %116 = arith.maximumf %114, %115 : vector<128x32xf32>
    %c2_118 = arith.constant 2 : index
    %c2_119 = arith.constant 2 : index
    %c0_120 = arith.constant 0 : index
    %c0_121 = arith.constant 0 : index
    %117 = vector.load %arg5[%c2_118, %c2_119, %c0_120, %c0_121] : memref<4x3x32x32xf32, #tpu.memory_space<vmem>>, vector<1x1x32x32xf32>
    %118 = vector.shape_cast %117 : vector<1x1x32x32xf32> to vector<32x32xf32>
    %cst_122 = arith.constant dense<0.000000e+00> : vector<128x32xf32>
    %119 = tpu.matmul %116, %118, %cst_122 {dimension_numbers = #tpu.dot_dimension_numbers<[1], [0], [0], [1], [0, 0, 1, 1], [], []>} : vector<128x32xf32>, vector<32x32xf32>, vector<128x32xf32> -> vector<128x32xf32>
    %c2_123 = arith.constant 2 : index
    %c2_124 = arith.constant 2 : index
    %c0_125 = arith.constant 0 : index
    %c0_126 = arith.constant 0 : index
    %120 = vector.load %arg6[%c2_123, %c2_124, %c0_125, %c0_126] : memref<4x3x1x32xf32, #tpu.memory_space<vmem>>, vector<1x1x1x32xf32>
    %121 = vector.shape_cast %120 : vector<1x1x1x32xf32> to vector<1x32xf32>
    %122 = vector.broadcast %121 : vector<1x32xf32> to vector<128x32xf32>
    %123 = arith.addf %119, %122 : vector<128x32xf32>
    %cst_127 = arith.constant 0.000000e+00 : f32
    %124 = vector.broadcast %cst_127 : f32 to vector<128x32xf32>
    %125 = arith.maximumf %123, %124 : vector<128x32xf32>
    %c2_128 = arith.constant 2 : index
    %c0_129 = arith.constant 0 : index
    %c0_130 = arith.constant 0 : index
    %126 = vector.load %arg7[%c2_128, %c0_129, %c0_130] : memref<4x32x8xf32, #tpu.memory_space<vmem>>, vector<1x32x8xf32>
    %127 = vector.shape_cast %126 : vector<1x32x8xf32> to vector<32x8xf32>
    %cst_131 = arith.constant dense<0.000000e+00> : vector<128x8xf32>
    %128 = tpu.matmul %125, %127, %cst_131 {dimension_numbers = #tpu.dot_dimension_numbers<[1], [0], [0], [1], [0, 0, 1, 1], [], []>} : vector<128x32xf32>, vector<32x8xf32>, vector<128x8xf32> -> vector<128x8xf32>
    %c2_132 = arith.constant 2 : index
    %c0_133 = arith.constant 0 : index
    %c0_134 = arith.constant 0 : index
    %129 = vector.load %arg8[%c2_132, %c0_133, %c0_134] : memref<4x1x8xf32, #tpu.memory_space<vmem>>, vector<1x1x8xf32>
    %130 = vector.shape_cast %129 : vector<1x1x8xf32> to vector<1x8xf32>
    %131 = vector.broadcast %130 : vector<1x8xf32> to vector<128x8xf32>
    %132 = arith.addf %128, %131 : vector<128x8xf32>
    %133 = arith.addf %45, %132 : vector<128x8xf32>
    %c3 = arith.constant 3 : index
    %c0_135 = arith.constant 0 : index
    %c0_136 = arith.constant 0 : index
    %134 = vector.load %arg3[%c3, %c0_135, %c0_136] : memref<4x8x32xf32, #tpu.memory_space<vmem>>, vector<1x8x32xf32>
    %135 = vector.shape_cast %134 : vector<1x8x32xf32> to vector<8x32xf32>
    %cst_137 = arith.constant dense<0.000000e+00> : vector<128x32xf32>
    %136 = tpu.matmul %133, %135, %cst_137 {dimension_numbers = #tpu.dot_dimension_numbers<[1], [0], [0], [1], [0, 0, 1, 1], [], []>} : vector<128x8xf32>, vector<8x32xf32>, vector<128x32xf32> -> vector<128x32xf32>
    %c3_138 = arith.constant 3 : index
    %c0_139 = arith.constant 0 : index
    %c0_140 = arith.constant 0 : index
    %137 = vector.load %arg4[%c3_138, %c0_139, %c0_140] : memref<4x1x32xf32, #tpu.memory_space<vmem>>, vector<1x1x32xf32>
    %138 = vector.shape_cast %137 : vector<1x1x32xf32> to vector<1x32xf32>
    %139 = vector.broadcast %138 : vector<1x32xf32> to vector<128x32xf32>
    %140 = arith.addf %136, %139 : vector<128x32xf32>
    %cst_141 = arith.constant 0.000000e+00 : f32
    %141 = vector.broadcast %cst_141 : f32 to vector<128x32xf32>
    %142 = arith.maximumf %140, %141 : vector<128x32xf32>
    %c3_142 = arith.constant 3 : index
    %c0_143 = arith.constant 0 : index
    %c0_144 = arith.constant 0 : index
    %c0_145 = arith.constant 0 : index
    %143 = vector.load %arg5[%c3_142, %c0_143, %c0_144, %c0_145] : memref<4x3x32x32xf32, #tpu.memory_space<vmem>>, vector<1x1x32x32xf32>
    %144 = vector.shape_cast %143 : vector<1x1x32x32xf32> to vector<32x32xf32>
    %cst_146 = arith.constant dense<0.000000e+00> : vector<128x32xf32>
    %145 = tpu.matmul %142, %144, %cst_146 {dimension_numbers = #tpu.dot_dimension_numbers<[1], [0], [0], [1], [0, 0, 1, 1], [], []>} : vector<128x32xf32>, vector<32x32xf32>, vector<128x32xf32> -> vector<128x32xf32>
    %c3_147 = arith.constant 3 : index
    %c0_148 = arith.constant 0 : index
    %c0_149 = arith.constant 0 : index
    %c0_150 = arith.constant 0 : index
    %146 = vector.load %arg6[%c3_147, %c0_148, %c0_149, %c0_150] : memref<4x3x1x32xf32, #tpu.memory_space<vmem>>, vector<1x1x1x32xf32>
    %147 = vector.shape_cast %146 : vector<1x1x1x32xf32> to vector<1x32xf32>
    %148 = vector.broadcast %147 : vector<1x32xf32> to vector<128x32xf32>
    %149 = arith.addf %145, %148 : vector<128x32xf32>
    %cst_151 = arith.constant 0.000000e+00 : f32
    %150 = vector.broadcast %cst_151 : f32 to vector<128x32xf32>
    %151 = arith.maximumf %149, %150 : vector<128x32xf32>
    %c3_152 = arith.constant 3 : index
    %c1_153 = arith.constant 1 : index
    %c0_154 = arith.constant 0 : index
    %c0_155 = arith.constant 0 : index
    %152 = vector.load %arg5[%c3_152, %c1_153, %c0_154, %c0_155] : memref<4x3x32x32xf32, #tpu.memory_space<vmem>>, vector<1x1x32x32xf32>
    %153 = vector.shape_cast %152 : vector<1x1x32x32xf32> to vector<32x32xf32>
    %cst_156 = arith.constant dense<0.000000e+00> : vector<128x32xf32>
    %154 = tpu.matmul %151, %153, %cst_156 {dimension_numbers = #tpu.dot_dimension_numbers<[1], [0], [0], [1], [0, 0, 1, 1], [], []>} : vector<128x32xf32>, vector<32x32xf32>, vector<128x32xf32> -> vector<128x32xf32>
    %c3_157 = arith.constant 3 : index
    %c1_158 = arith.constant 1 : index
    %c0_159 = arith.constant 0 : index
    %c0_160 = arith.constant 0 : index
    %155 = vector.load %arg6[%c3_157, %c1_158, %c0_159, %c0_160] : memref<4x3x1x32xf32, #tpu.memory_space<vmem>>, vector<1x1x1x32xf32>
    %156 = vector.shape_cast %155 : vector<1x1x1x32xf32> to vector<1x32xf32>
    %157 = vector.broadcast %156 : vector<1x32xf32> to vector<128x32xf32>
    %158 = arith.addf %154, %157 : vector<128x32xf32>
    %cst_161 = arith.constant 0.000000e+00 : f32
    %159 = vector.broadcast %cst_161 : f32 to vector<128x32xf32>
    %160 = arith.maximumf %158, %159 : vector<128x32xf32>
    %c3_162 = arith.constant 3 : index
    %c2_163 = arith.constant 2 : index
    %c0_164 = arith.constant 0 : index
    %c0_165 = arith.constant 0 : index
    %161 = vector.load %arg5[%c3_162, %c2_163, %c0_164, %c0_165] : memref<4x3x32x32xf32, #tpu.memory_space<vmem>>, vector<1x1x32x32xf32>
    %162 = vector.shape_cast %161 : vector<1x1x32x32xf32> to vector<32x32xf32>
    %cst_166 = arith.constant dense<0.000000e+00> : vector<128x32xf32>
    %163 = tpu.matmul %160, %162, %cst_166 {dimension_numbers = #tpu.dot_dimension_numbers<[1], [0], [0], [1], [0, 0, 1, 1], [], []>} : vector<128x32xf32>, vector<32x32xf32>, vector<128x32xf32> -> vector<128x32xf32>
    %c3_167 = arith.constant 3 : index
    %c2_168 = arith.constant 2 : index
    %c0_169 = arith.constant 0 : index
    %c0_170 = arith.constant 0 : index
    %164 = vector.load %arg6[%c3_167, %c2_168, %c0_169, %c0_170] : memref<4x3x1x32xf32, #tpu.memory_space<vmem>>, vector<1x1x1x32xf32>
    %165 = vector.shape_cast %164 : vector<1x1x1x32xf32> to vector<1x32xf32>
    %166 = vector.broadcast %165 : vector<1x32xf32> to vector<128x32xf32>
    %167 = arith.addf %163, %166 : vector<128x32xf32>
    %cst_171 = arith.constant 0.000000e+00 : f32
    %168 = vector.broadcast %cst_171 : f32 to vector<128x32xf32>
    %169 = arith.maximumf %167, %168 : vector<128x32xf32>
    %c3_172 = arith.constant 3 : index
    %c0_173 = arith.constant 0 : index
    %c0_174 = arith.constant 0 : index
    %170 = vector.load %arg7[%c3_172, %c0_173, %c0_174] : memref<4x32x8xf32, #tpu.memory_space<vmem>>, vector<1x32x8xf32>
    %171 = vector.shape_cast %170 : vector<1x32x8xf32> to vector<32x8xf32>
    %cst_175 = arith.constant dense<0.000000e+00> : vector<128x8xf32>
    %172 = tpu.matmul %169, %171, %cst_175 {dimension_numbers = #tpu.dot_dimension_numbers<[1], [0], [0], [1], [0, 0, 1, 1], [], []>} : vector<128x32xf32>, vector<32x8xf32>, vector<128x8xf32> -> vector<128x8xf32>
    %c3_176 = arith.constant 3 : index
    %c0_177 = arith.constant 0 : index
    %c0_178 = arith.constant 0 : index
    %173 = vector.load %arg8[%c3_176, %c0_177, %c0_178] : memref<4x1x8xf32, #tpu.memory_space<vmem>>, vector<1x1x8xf32>
    %174 = vector.shape_cast %173 : vector<1x1x8xf32> to vector<1x8xf32>
    %175 = vector.broadcast %174 : vector<1x8xf32> to vector<128x8xf32>
    %176 = arith.addf %172, %175 : vector<128x8xf32>
    %177 = arith.addf %89, %176 : vector<128x8xf32>
    %c0_179 = arith.constant 0 : index
    %c0_180 = arith.constant 0 : index
    %178 = vector.load %arg9[%c0_179, %c0_180] : memref<1x8xf32, #tpu.memory_space<vmem>>, vector<1x8xf32>
    %179 = vector.broadcast %178 : vector<1x8xf32> to vector<128x8xf32>
    %180 = arith.mulf %177, %179 : vector<128x8xf32>
    %c0_181 = arith.constant 0 : index
    %c0_182 = arith.constant 0 : index
    %181 = vector.load %arg10[%c0_181, %c0_182] : memref<1x8xf32, #tpu.memory_space<vmem>>, vector<1x8xf32>
    %182 = vector.broadcast %181 : vector<1x8xf32> to vector<128x8xf32>
    %183 = arith.mulf %133, %182 : vector<128x8xf32>
    %184 = math.absf %180 : vector<128x8xf32>
    %cst_183 = arith.constant 0.000000e+00 : f32
    %185 = vector.broadcast %cst_183 : f32 to vector<128x8xf32>
    %186 = arith.subf %185, %184 : vector<128x8xf32>
    %187 = math.exp %186 : vector<128x8xf32>
    %188 = math.log1p %187 : vector<128x8xf32>
    %cst_184 = arith.constant 2.000000e+00 : f32
    %189 = vector.broadcast %cst_184 : f32 to vector<128x8xf32>
    %190 = arith.mulf %189, %188 : vector<128x8xf32>
    %191 = arith.addf %184, %190 : vector<128x8xf32>
    %cst_185 = arith.constant 0.000000e+00 : f32
    %192 = vector.broadcast %cst_185 : f32 to vector<128x8xf32>
    %193 = arith.subf %192, %191 : vector<128x8xf32>
    %cst_186 = arith.constant dense<0.000000e+00> : vector<128xf32>
    %194 = vector.multi_reduction <add>, %193, %cst_186 [1] : vector<128x8xf32> to vector<128xf32>
    %195 = vector.shape_cast %194 : vector<128xf32> to vector<128x1xf32>
    %196 = math.absf %183 : vector<128x8xf32>
    %cst_187 = arith.constant 0.000000e+00 : f32
    %197 = vector.broadcast %cst_187 : f32 to vector<128x8xf32>
    %198 = arith.subf %197, %196 : vector<128x8xf32>
    %199 = math.exp %198 : vector<128x8xf32>
    %200 = math.log1p %199 : vector<128x8xf32>
    %cst_188 = arith.constant 2.000000e+00 : f32
    %201 = vector.broadcast %cst_188 : f32 to vector<128x8xf32>
    %202 = arith.mulf %201, %200 : vector<128x8xf32>
    %203 = arith.addf %196, %202 : vector<128x8xf32>
    %cst_189 = arith.constant 0.000000e+00 : f32
    %204 = vector.broadcast %cst_189 : f32 to vector<128x8xf32>
    %205 = arith.subf %204, %203 : vector<128x8xf32>
    %cst_190 = arith.constant dense<0.000000e+00> : vector<128xf32>
    %206 = vector.multi_reduction <add>, %205, %cst_190 [1] : vector<128x8xf32> to vector<128xf32>
    %207 = vector.shape_cast %206 : vector<128xf32> to vector<128x1xf32>
    %208 = arith.addf %195, %207 : vector<128x1xf32>
    %c0_191 = arith.constant 0 : index
    %c0_192 = arith.constant 0 : index
    %209 = vector.load %arg11[%c0_191, %c0_192] : memref<128x8xf32, #tpu.memory_space<vmem>>, vector<128x8xf32>
    tpu.vector_store %arg11[%c0_191, %c0_192], %180 {strides = array<i32>} : memref<128x8xf32, #tpu.memory_space<vmem>>, vector<128x8xf32>,
    %c0_193 = arith.constant 0 : index
    %c0_194 = arith.constant 0 : index
    %210 = vector.load %arg12[%c0_193, %c0_194] : memref<128x8xf32, #tpu.memory_space<vmem>>, vector<128x8xf32>
    tpu.vector_store %arg12[%c0_193, %c0_194], %183 {strides = array<i32>} : memref<128x8xf32, #tpu.memory_space<vmem>>, vector<128x8xf32>,
    %211 = vector.shape_cast %208 : vector<128x1xf32> to vector<128x1xf32>
    %212 = vector.broadcast %211 : vector<128x1xf32> to vector<128x128xf32>
    %c0_195 = arith.constant 0 : index
    %c0_196 = arith.constant 0 : index
    %213 = vector.load %arg13[%c0_195, %c0_196] : memref<128x128xf32, #tpu.memory_space<vmem>>, vector<128x128xf32>
    tpu.vector_store %arg13[%c0_195, %c0_196], %212 {strides = array<i32>} : memref<128x128xf32, #tpu.memory_space<vmem>>, vector<128x128xf32>,
    return
  }
  func.func @transform_0(%arg0: i32) -> (i32, i32) {
    %c0_i32 = arith.constant 0 : i32
    %c0_i32_0 = arith.constant 0 : i32
    return %arg0, %c0_i32 : i32, i32
  }
  func.func @transform_1(%arg0: i32) -> (i32, i32) {
    %c0_i32 = arith.constant 0 : i32
    %c0_i32_0 = arith.constant 0 : i32
    return %arg0, %c0_i32 : i32, i32
  }
  func.func @transform_2(%arg0: i32) -> (i32, i32, i32) {
    %c0_i32 = arith.constant 0 : i32
    %c0_i32_0 = arith.constant 0 : i32
    %c0_i32_1 = arith.constant 0 : i32
    %c0_i32_2 = arith.constant 0 : i32
    return %c0_i32, %c0_i32_0, %c0_i32_1 : i32, i32, i32
  }
  func.func @transform_3(%arg0: i32) -> (i32, i32, i32) {
    %c0_i32 = arith.constant 0 : i32
    %c0_i32_0 = arith.constant 0 : i32
    %c0_i32_1 = arith.constant 0 : i32
    %c0_i32_2 = arith.constant 0 : i32
    return %c0_i32, %c0_i32_0, %c0_i32_1 : i32, i32, i32
  }
  func.func @transform_4(%arg0: i32) -> (i32, i32, i32, i32) {
    %c0_i32 = arith.constant 0 : i32
    %c0_i32_0 = arith.constant 0 : i32
    %c0_i32_1 = arith.constant 0 : i32
    %c0_i32_2 = arith.constant 0 : i32
    %c0_i32_3 = arith.constant 0 : i32
    return %c0_i32, %c0_i32_0, %c0_i32_1, %c0_i32_2 : i32, i32, i32, i32
  }
  func.func @transform_5(%arg0: i32) -> (i32, i32, i32, i32) {
    %c0_i32 = arith.constant 0 : i32
    %c0_i32_0 = arith.constant 0 : i32
    %c0_i32_1 = arith.constant 0 : i32
    %c0_i32_2 = arith.constant 0 : i32
    %c0_i32_3 = arith.constant 0 : i32
    return %c0_i32, %c0_i32_0, %c0_i32_1, %c0_i32_2 : i32, i32, i32, i32
  }
  func.func @transform_6(%arg0: i32) -> (i32, i32, i32) {
    %c0_i32 = arith.constant 0 : i32
    %c0_i32_0 = arith.constant 0 : i32
    %c0_i32_1 = arith.constant 0 : i32
    %c0_i32_2 = arith.constant 0 : i32
    return %c0_i32, %c0_i32_0, %c0_i32_1 : i32, i32, i32
  }
  func.func @transform_7(%arg0: i32) -> (i32, i32, i32) {
    %c0_i32 = arith.constant 0 : i32
    %c0_i32_0 = arith.constant 0 : i32
    %c0_i32_1 = arith.constant 0 : i32
    %c0_i32_2 = arith.constant 0 : i32
    return %c0_i32, %c0_i32_0, %c0_i32_1 : i32, i32, i32
  }
  func.func @transform_8(%arg0: i32) -> (i32, i32) {
    %c0_i32 = arith.constant 0 : i32
    %c0_i32_0 = arith.constant 0 : i32
    %c0_i32_1 = arith.constant 0 : i32
    return %c0_i32, %c0_i32_0 : i32, i32
  }
  func.func @transform_9(%arg0: i32) -> (i32, i32) {
    %c0_i32 = arith.constant 0 : i32
    %c0_i32_0 = arith.constant 0 : i32
    %c0_i32_1 = arith.constant 0 : i32
    return %c0_i32, %c0_i32_0 : i32, i32
  }
  func.func @transform_10(%arg0: i32) -> (i32, i32) {
    %c0_i32 = arith.constant 0 : i32
    %c0_i32_0 = arith.constant 0 : i32
    return %arg0, %c0_i32 : i32, i32
  }
  func.func @transform_11(%arg0: i32) -> (i32, i32) {
    %c0_i32 = arith.constant 0 : i32
    %c0_i32_0 = arith.constant 0 : i32
    return %arg0, %c0_i32 : i32, i32
  }
  func.func @transform_12(%arg0: i32) -> (i32, i32) {
    %c0_i32 = arith.constant 0 : i32
    %c0_i32_0 = arith.constant 0 : i32
    return %arg0, %c0_i32 : i32, i32
  }
}

</mosaic_0001>

<bundles_post_ra>
// kernel: nice_forward.1
= control target key start
LH: loop header
LB: loop body
LE: loop exit
PB: predicated region body
PF: predicated region fallthrough
CT: control target
= control target key end

     0   :  { %s4770_s21 = smov 0   ;;  %s6357_s0 = inlined_call_operand.vmem [shape: f32[512,8], index: 0, kind: input, shape index: {}]   ;;  %s6358_s1 = inlined_call_operand.vmem [shape: f32[512,8], index: 1, kind: input, shape index: {}]   ;;  %s6359_s2 = inlined_call_operand.vmem [shape: f32[4,8,32], index: 2, kind: input, shape index: {}]   ;;  %s6360_s3 = inlined_call_operand.vmem [shape: f32[4,1,32], index: 3, kind: input, shape index: {}]   ;;  %s6361_s4 = inlined_call_operand.vmem [shape: f32[4,3,32,32], index: 4, kind: input, shape index: {}]   ;;  %s6362_s5 = inlined_call_operand.vmem [shape: f32[4,3,1,32], index: 5, kind: input, shape index: {}]   ;;  %s6363_s6 = inlined_call_operand.vmem [shape: f32[4,32,8], index: 6, kind: input, shape index: {}]   ;;  %s6364_s7 = inlined_call_operand.vmem [shape: f32[4,1,8], index: 7, kind: input, shape index: {}]   ;;  %s6365_s8 = inlined_call_operand.vmem [shape: f32[1,8], index: 8, kind: input, shape index: {}]   ;;  %s6366_s9 = inlined_call_operand.vmem [shape: f32[1,8], index: 9, kind: input, shape index: {}]   ;;  %s6367_s10 = inlined_call_operand.vmem [shape: f32[512,8], index: 10, kind: output, shape index: {0}]   ;;  %s6368_s11 = inlined_call_operand.vmem [shape: f32[512,8], index: 11, kind: output, shape index: {1}]   ;;  %s6369_s12 = inlined_call_operand.vmem [shape: f32[512,128], index: 12, kind: output, shape index: {2}]  }
   0x1 LB: > { %s4110_s22 = sadd.s32 4294967295, %s4703_s21   ;;  %p4114_p0 = scmp.ge.s32.totalorder %s4703_s21, 1  ;;  %s4703_s21 = sphi %s4770_s21, %s23_s21  }
   0x2   : > { %p379_p1 = scmp.lt.s32.totalorder %s4703_s21, 5 }
   0x4   : > { %p380_p2 = pnand %p4114_p0, %p379_p1 }
   0x5   : > { %s4115_s25 = sshll.u32 (!%p380_p2), %s4110_s22, 4 }
   0x6   : > { %383 = sbr.rel (%p380_p2) target bundleno = 2956 (0xb8c), region = 60  ;;  %p437_p3 = scmp.lt.s32.totalorder (!%p380_p2), %s4115_s25, 63 }
   0xb   : > { %v498_v0 = vld [vmem:[%s6359_s2] sm:$0xff]  ;;  %s6375_s25 = smov (!%p437_p3, %s4115_s25), 63  ;;  %vm503_vm0 = vcmask 64512   ;;  %v636_v13 = vld [vmem:[%s6361_s4 + $0x18] sm:$0xff]  ;;  %v635_v14 = vld [vmem:[%s6361_s4 + $0x10] sm:$0xff]  ;;  %vm641_vm1 = vcmask 261120  }
   0xc   : > { %567 = vmatpush.msra.mxu0 %v498_v0  ;;  %s4781_s26 = sshll.u32 %s6375_s25, 3  ;;  %702 = vmatpush.msra.mxu1 %v636_v13  ;;  %v634_v16 = vld [vmem:[%s6361_s4 + $0x8] sm:$0xff]  ;;  %v633_v17 = vld [vmem:[%s6361_s4] sm:$0xff]  ;;  %v4160_v58 = vld [vmem:[%s6361_s4 + $0x38] sm:$0xff] }
   0xd   : > { %s4787_s29 = scalar_lea.vmem %s6357_s0, %s4781_s26  ;;  %v4836_v21 = vld [vmem:[%s6360_s3] ss:$0 sm:$0xff]  ;;  %841 = vmatpush.msra.mxu2 %v4160_v58  ;;  %v4159_v61 = vld [vmem:[%s6361_s4 + $0x30] sm:$0xff]  ;;  %v4158_v63 = vld [vmem:[%s6361_s4 + $0x28] sm:$0xff]  ;;  %s5027_s13 = scalar_lea.vmem %s6358_s1, %s4781_s26 }
   0xe   : > { %v466_v1 = vld [vmem:[%s4787_s29] sm:$0xff]  ;;  %v467_v2 = vld [vmem:[%s4787_s29 + $0x8] sm:$0xff]  ;;  %v468_v3 = vld [vmem:[%s4787_s29 + $0x10] sm:$0xff]  ;;  %703 = vmatpush.msra.mxu1 %v635_v14  ;;  %s5645_s15 = scalar_lea.vmem %s6368_s11, %s4781_s26  ;;  %s6050_s30 = scalar_lea.vmem %s6367_s10, %s4781_s26 }
   0xf   : > { %4125 = vmatmul.msk.f32.vlgmr.msra.gmra.mxu0 %vm503_vm0, %v466_v1  ;;  %v469_v4 = vld [vmem:[%s4787_s29 + $0x18] sm:$0xff]  ;;  %v470_v5 = vld [vmem:[%s4787_s29 + $0x20] sm:$0xff]  ;;  %v471_v6 = vld [vmem:[%s4787_s29 + $0x28] sm:$0xff]  ;;  %842 = vmatpush.msra.mxu2 %v4159_v61 }
  0x10   : > { %v472_v7 = vld [vmem:[%s4787_s29 + $0x30] sm:$0xff]  ;;  %v473_v8 = vld [vmem:[%s4787_s29 + $0x38] sm:$0xff]  ;;  %v474_v9 = vld [vmem:[%s4787_s29 + $0x40] sm:$0xff]  ;;  %704 = vmatpush.msra.mxu1 %v634_v16 }
  0x11   : > { %v475_v10 = vld [vmem:[%s4787_s29 + $0x48] sm:$0xff]  ;;  %v476_v11 = vld [vmem:[%s4787_s29 + $0x50] sm:$0xff]  ;;  %v477_v12 = vld [vmem:[%s4787_s29 + $0x58] sm:$0xff]  ;;  %843 = vmatpush.msra.mxu2 %v4158_v63 }
  0x12   : > { %v478_v15 = vld [vmem:[%s4787_s29 + $0x60] sm:$0xff]  ;;  %705 = vmatpush.msra.mxu1 %v633_v17  ;;  %v479_v18 = vld [vmem:[%s4787_s29 + $0x68] sm:$0xff]  ;;  %v480_v19 = vld [vmem:[%s4787_s29 + $0x70] sm:$0xff] }
  0x13   : > { %v481_v20 = vld [vmem:[%s4787_s29 + $0x78] sm:$0xff]  ;;  %v4157_v0 = vld [vmem:[%s6361_s4 + $0x20] sm:$0xff] }
  0x14   : > { %844 = vmatpush.msra.mxu2 %v4157_v0  ;;  %v4937_v0 = vld [vmem:[%s6362_s5 + $0x1] ss:$0 sm:$0xff] }
  0x17   : > { %4126 = vmatmul.msk.f32.gmra.mxu0 %vm503_vm0, %v467_v2 }
  0x1f   : > { %4127 = vmatmul.msk.f32.gmra.mxu0 %vm503_vm0, %v468_v3 }
  0x27   : > { %4128 = vmatmul.msk.f32.gmra.mxu0 %vm503_vm0, %v469_v4 }
  0x2f   : > { %4129 = vmatmul.msk.f32.gmra.mxu0 %vm503_vm0, %v470_v5 }
  0x37   : > { %4130 = vmatmul.msk.f32.gmra.mxu0 %vm503_vm0, %v471_v6 }
  0x3f   : > { %4131 = vmatmul.msk.f32.gmra.mxu0 %vm503_vm0, %v472_v7 }
  0x47   : > { %4132 = vmatmul.msk.f32.gmra.mxu0 %vm503_vm0, %v473_v8 }
  0x4f   : > { %4133 = vmatmul.msk.f32.gmra.mxu0 %vm503_vm0, %v474_v9 }
  0x57   : > { %4134 = vmatmul.msk.f32.gmra.mxu0 %vm503_vm0, %v475_v10  ;;  %v4885_v10 = vld [vmem:[%s6362_s5] ss:$0 sm:$0xff] }
  0x5f   : > { %4135 = vmatmul.msk.f32.gmra.mxu0 %vm503_vm0, %v476_v11 }
  0x67   : > { %4136 = vmatmul.msk.f32.gmra.mxu0 %vm503_vm0, %v477_v12 }
  0x6f   : > { %4137 = vmatmul.msk.f32.gmra.mxu0 %vm503_vm0, %v478_v15 }
  0x77   : > { %4138 = vmatmul.msk.f32.gmra.mxu0 %vm503_vm0, %v479_v18 }
  0x7f   : > { %4139 = vmatmul.msk.f32.gmra.mxu0 %vm503_vm0, %v480_v19 }
  0x87   : > { %4140 = vmatmul.msk.f32.gmra.mxu0 %vm503_vm0, %v481_v20 }
  0x8c   : > { %v569_v22 = vpop.f32.mrf.mxu0 }
  0x8d   : > { %v570_v23 = vadd.f32 %v4836_v21, %v569_v22 }
  0x8f   : > { %v617_v24 = vmax.f32 %v570_v23, 0.0 }
  0x91   : > { %4141 = vmatmul.msk.f32.vlgmr.msra.gmra.mxu1 %vm641_vm1, %v617_v24 }
  0x94   : > { %v572_v25 = vpop.f32.mrf.mxu0 }
  0x95   : > { %v573_v26 = vadd.f32 %v4836_v21, %v572_v25 }
  0x97   : > { %v618_v27 = vmax.f32 %v573_v26, 0.0 }
  0x99   : > { %4142 = vmatmul.msk.f32.gmra.mxu1 %vm641_vm1, %v618_v27 }
  0x9c   : > { %v575_v28 = vpop.f32.mrf.mxu0 }
  0x9d   : > { %v576_v29 = vadd.f32 %v4836_v21, %v575_v28 }
  0x9f   : > { %v619_v30 = vmax.f32 %v576_v29, 0.0 }
  0xa1   : > { %4143 = vmatmul.msk.f32.gmra.mxu1 %vm641_vm1, %v619_v30 }
  0xa4   : > { %v578_v31 = vpop.f32.mrf.mxu0 }
  0xa5   : > { %v579_v32 = vadd.f32 %v4836_v21, %v578_v31 }
  0xa7   : > { %v620_v33 = vmax.f32 %v579_v32, 0.0 }
  0xa9   : > { %4144 = vmatmul.msk.f32.gmra.mxu1 %vm641_vm1, %v620_v33 }
  0xac   : > { %v581_v34 = vpop.f32.mrf.mxu0 }
  0xad   : > { %v582_v35 = vadd.f32 %v4836_v21, %v581_v34 }
  0xaf   : > { %v621_v36 = vmax.f32 %v582_v35, 0.0 }
  0xb1   : > { %4145 = vmatmul.msk.f32.gmra.mxu1 %vm641_vm1, %v621_v36 }
  0xb4   : > { %v584_v37 = vpop.f32.mrf.mxu0 }
  0xb5   : > { %v585_v38 = vadd.f32 %v4836_v21, %v584_v37 }
  0xb7   : > { %v622_v39 = vmax.f32 %v585_v38, 0.0 }
  0xb9   : > { %4146 = vmatmul.msk.f32.gmra.mxu1 %vm641_vm1, %v622_v39 }
  0xbc   : > { %v587_v40 = vpop.f32.mrf.mxu0 }
  0xbd   : > { %v588_v41 = vadd.f32 %v4836_v21, %v587_v40 }
  0xbf   : > { %v623_v42 = vmax.f32 %v588_v41, 0.0 }
  0xc1   : > { %4147 = vmatmul.msk.f32.gmra.mxu1 %vm641_vm1, %v623_v42 }
  0xc4   : > { %v590_v43 = vpop.f32.mrf.mxu0 }
  0xc5   : > { %v591_v44 = vadd.f32 %v4836_v21, %v590_v43 }
  0xc7   : > { %v624_v45 = vmax.f32 %v591_v44, 0.0 }
  0xc9   : > { %4148 = vmatmul.msk.f32.gmra.mxu1 %vm641_vm1, %v624_v45 }
  0xcc   : > { %v593_v46 = vpop.f32.mrf.mxu0 }
  0xcd   : > { %v594_v47 = vadd.f32 %v4836_v21, %v593_v46 }
  0xcf   : > { %v625_v48 = vmax.f32 %v594_v47, 0.0  ;;  %v4181_v47 = vld [vmem:[%s6361_s4 + $0x58] sm:$0xff] }
  0xd0   : > { %980 = vmatpush.msra.mxu3 %v4181_v47 }
  0xd1   : > { %4149 = vmatmul.msk.f32.gmra.mxu1 %vm641_vm1, %v625_v48 }
  0xd4   : > { %v596_v49 = vpop.f32.mrf.mxu0 }
  0xd5   : > { %v597_v50 = vadd.f32 %v4836_v21, %v596_v49 }
  0xd7   : > { %v626_v51 = vmax.f32 %v597_v50, 0.0 }
  0xd9   : > { %4150 = vmatmul.msk.f32.gmra.mxu1 %vm641_vm1, %v626_v51  ;;  %v4180_v51 = vld [vmem:[%s6361_s4 + $0x50] sm:$0xff] }
  0xda   : > { %981 = vmatpush.msra.mxu3 %v4180_v51 }
  0xdc   : > { %v599_v52 = vpop.f32.mrf.mxu0 }
  0xdd   : > { %v600_v53 = vadd.f32 %v4836_v21, %v599_v52 }
  0xdf   : > { %v627_v54 = vmax.f32 %v600_v53, 0.0 }
  0xe1   : > { %4151 = vmatmul.msk.f32.gmra.mxu1 %vm641_vm1, %v627_v54  ;;  %v4179_v54 = vld [vmem:[%s6361_s4 + $0x48] sm:$0xff] }
  0xe2   : > { %982 = vmatpush.msra.mxu3 %v4179_v54 }
  0xe4   : > { %v602_v55 = vpop.f32.mrf.mxu0 }
  0xe5   : > { %v603_v56 = vadd.f32 %v4836_v21, %v602_v55 }
  0xe7   : > { %v628_v57 = vmax.f32 %v603_v56, 0.0  ;;  %v4178_v56 = vld [vmem:[%s6361_s4 + $0x40] sm:$0xff] }
  0xe8   : > { %983 = vmatpush.msra.mxu3 %v4178_v56 }
  0xe9   : > { %4152 = vmatmul.msk.f32.gmra.mxu1 %vm641_vm1, %v628_v57 }
  0xec   : > { %v605_v59 = vpop.f32.mrf.mxu0 }
  0xed   : > { %v606_v60 = vadd.f32 %v4836_v21, %v605_v59 }
  0xef   : > { %v629_v62 = vmax.f32 %v606_v60, 0.0  ;;  %v1052_v60 = vld [vmem:[%s6363_s6 + $0x18] sm:$0xff] }
  0xf0   : > { %1117 = vmatpush.msrb.mxu0 %v1052_v60 }
  0xf1   : > { %4153 = vmatmul.msk.f32.gmra.mxu1 %vm641_vm1, %v629_v62 }
  0xf4   : > { %v608_v1 = vpop.f32.mrf.mxu0 }
  0xf5   : > { %v609_v2 = vadd.f32 %v4836_v21, %v608_v1 }
  0xf7   : > { %v630_v3 = vmax.f32 %v609_v2, 0.0 }
  0xf9   : > { %4154 = vmatmul.msk.f32.gmra.mxu1 %vm641_vm1, %v630_v3 }
  0xfc   : > { %v611_v4 = vpop.f32.mrf.mxu0 }
  0xfd   : > { %v612_v5 = vadd.f32 %v4836_v21, %v611_v4 }
  0xff   : > { %v631_v6 = vmax.f32 %v612_v5, 0.0 }
 0x101   : > { %4155 = vmatmul.msk.f32.gmra.mxu1 %vm641_vm1, %v631_v6 }
 0x104   : > { %v614_v7 = vpop.f32.mrf.mxu0 }
 0x105   : > { %v615_v8 = vadd.f32 %v4836_v21, %v614_v7  ;;  %v1051_v7 = vld [vmem:[%s6363_s6 + $0x10] sm:$0xff] }
 0x106   : > { %1118 = vmatpush.msrb.mxu0 %v1051_v7 }
 0x107   : > { %v632_v9 = vmax.f32 %v615_v8, 0.0 }
 0x109   : > { %4156 = vmatmul.msk.f32.gmra.mxu1 %vm641_vm1, %v632_v9 }
 0x10e   : > { %v707_v11 = vpop.f32.mrf.mxu1 }
 0x10f   : > { %v708_v12 = vadd.f32 %v4885_v10, %v707_v11 }
 0x111   : > { %v755_v13 = vmax.f32 %v708_v12, 0.0 }
 0x113   : > { %4162 = vmatmul.msk.f32.vlgmr.msra.gmra.mxu2 %vm641_vm1, %v755_v13 }
 0x116   : > { %v710_v14 = vpop.f32.mrf.mxu1 }
 0x117   : > { %v711_v15 = vadd.f32 %v4885_v10, %v710_v14 }
 0x119   : > { %v756_v16 = vmax.f32 %v711_v15, 0.0 }
 0x11b   : > { %4163 = vmatmul.msk.f32.gmra.mxu2 %vm641_vm1, %v756_v16 }
 0x11e   : > { %v713_v17 = vpop.f32.mrf.mxu1 }
 0x11f   : > { %v714_v18 = vadd.f32 %v4885_v10, %v713_v17 }
 0x121   : > { %v757_v19 = vmax.f32 %v714_v18, 0.0 }
 0x123   : > { %4164 = vmatmul.msk.f32.gmra.mxu2 %vm641_vm1, %v757_v19 }
 0x126   : > { %v716_v20 = vpop.f32.mrf.mxu1 }
 0x127   : > { %v717_v21 = vadd.f32 %v4885_v10, %v716_v20  ;;  %v1050_v20 = vld [vmem:[%s6363_s6 + $0x8] sm:$0xff] }
 0x128   : > { %1119 = vmatpush.msrb.mxu0 %v1050_v20 }
 0x129   : > { %v758_v22 = vmax.f32 %v717_v21, 0.0 }
 0x12b   : > { %4165 = vmatmul.msk.f32.gmra.mxu2 %vm641_vm1, %v758_v22 }
 0x12e   : > { %v719_v23 = vpop.f32.mrf.mxu1 }
 0x12f   : > { %v720_v24 = vadd.f32 %v4885_v10, %v719_v23 }
 0x131   : > { %v759_v25 = vmax.f32 %v720_v24, 0.0 }
 0x133   : > { %4166 = vmatmul.msk.f32.gmra.mxu2 %vm641_vm1, %v759_v25 }
 0x136   : > { %v722_v26 = vpop.f32.mrf.mxu1 }
 0x137   : > { %v723_v27 = vadd.f32 %v4885_v10, %v722_v26 }
 0x139   : > { %v760_v28 = vmax.f32 %v723_v27, 0.0 }
 0x13b   : > { %4167 = vmatmul.msk.f32.gmra.mxu2 %vm641_vm1, %v760_v28 }
 0x13e   : > { %v725_v29 = vpop.f32.mrf.mxu1 }
 0x13f   : > { %v726_v30 = vadd.f32 %v4885_v10, %v725_v29 }
 0x141   : > { %v761_v31 = vmax.f32 %v726_v30, 0.0 }
 0x143   : > { %4168 = vmatmul.msk.f32.gmra.mxu2 %vm641_vm1, %v761_v31 }
 0x146   : > { %v728_v32 = vpop.f32.mrf.mxu1 }
 0x147   : > { %v729_v33 = vadd.f32 %v4885_v10, %v728_v32 }
 0x149   : > { %v762_v34 = vmax.f32 %v729_v33, 0.0  ;;  %v1049_v33 = vld [vmem:[%s6363_s6] sm:$0xff] }
 0x14a   : > { %1120 = vmatpush.msrb.mxu0 %v1049_v33 }
 0x14b   : > { %4169 = vmatmul.msk.f32.gmra.mxu2 %vm641_vm1, %v762_v34 }
 0x14e   : > { %v731_v35 = vpop.f32.mrf.mxu1 }
 0x14f   : > { %v732_v36 = vadd.f32 %v4885_v10, %v731_v35 }
 0x151   : > { %v763_v37 = vmax.f32 %v732_v36, 0.0 }
 0x153   : > { %4170 = vmatmul.msk.f32.gmra.mxu2 %vm641_vm1, %v763_v37 }
 0x156   : > { %v734_v38 = vpop.f32.mrf.mxu1 }
 0x157   : > { %v735_v39 = vadd.f32 %v4885_v10, %v734_v38 }
 0x159   : > { %v764_v40 = vmax.f32 %v735_v39, 0.0 }
 0x15b   : > { %4171 = vmatmul.msk.f32.gmra.mxu2 %vm641_vm1, %v764_v40 }
 0x15e   : > { %v737_v41 = vpop.f32.mrf.mxu1 }
 0x15f   : > { %v738_v42 = vadd.f32 %v4885_v10, %v737_v41 }
 0x161   : > { %v765_v43 = vmax.f32 %v738_v42, 0.0 }
 0x163   : > { %4172 = vmatmul.msk.f32.gmra.mxu2 %vm641_vm1, %v765_v43 }
 0x166   : > { %v740_v44 = vpop.f32.mrf.mxu1 }
 0x167   : > { %v741_v45 = vadd.f32 %v4885_v10, %v740_v44 }
 0x169   : > { %v766_v46 = vmax.f32 %v741_v45, 0.0 }
 0x16b   : > { %4173 = vmatmul.msk.f32.gmra.mxu2 %vm641_vm1, %v766_v46  ;;  %v4215_v46 = vld [vmem:[%s6359_s2 + $0x8] sm:$0xff] }
 0x16c   : > { %1256 = vmatpush.msrb.mxu1 %v4215_v46 }
 0x16e   : > { %v743_v48 = vpop.f32.mrf.mxu1 }
 0x16f   : > { %v744_v49 = vadd.f32 %v4885_v10, %v743_v48 }
 0x171   : > { %v767_v50 = vmax.f32 %v744_v49, 0.0 }
 0x173   : > { %4174 = vmatmul.msk.f32.gmra.mxu2 %vm641_vm1, %v767_v50 }
 0x176   : > { %v746_v52 = vpop.f32.mrf.mxu1 }
 0x177   : > { %v747_v53 = vadd.f32 %v4885_v10, %v746_v52 }
 0x179   : > { %v768_v55 = vmax.f32 %v747_v53, 0.0  ;;  %v4986_v53 = vld [vmem:[%s6362_s5 + $0x2] ss:$0 sm:$0xff] }
 0x17b   : > { %4175 = vmatmul.msk.f32.gmra.mxu2 %vm641_vm1, %v768_v55 }
 0x17e   : > { %v749_v57 = vpop.f32.mrf.mxu1 }
 0x17f   : > { %v750_v58 = vadd.f32 %v4885_v10, %v749_v57 }
 0x181   : > { %v769_v59 = vmax.f32 %v750_v58, 0.0 }
 0x183   : > { %4176 = vmatmul.msk.f32.gmra.mxu2 %vm641_vm1, %v769_v59 }
 0x186   : > { %v752_v61 = vpop.f32.mrf.mxu1 }
 0x187   : > { %v753_v62 = vadd.f32 %v4885_v10, %v752_v61 }
 0x189   : > { %v770_v63 = vmax.f32 %v753_v62, 0.0 }
 0x18b   : > { %4177 = vmatmul.msk.f32.gmra.mxu2 %vm641_vm1, %v770_v63 }
 0x196   : > { %v846_v1 = vpop.f32.mrf.mxu2 }
 0x197   : > { %v847_v2 = vadd.f32 %v4937_v0, %v846_v1 }
 0x199   : > { %v894_v3 = vmax.f32 %v847_v2, 0.0 }
 0x19b   : > { %4183 = vmatmul.msk.f32.vlgmr.msra.gmra.mxu3 %vm641_vm1, %v894_v3 }
 0x19e   : > { %v849_v4 = vpop.f32.mrf.mxu2 }
 0x19f   : > { %v850_v5 = vadd.f32 %v4937_v0, %v849_v4 }
 0x1a1   : > { %v895_v6 = vmax.f32 %v850_v5, 0.0 }
 0x1a3   : > { %4184 = vmatmul.msk.f32.gmra.mxu3 %vm641_vm1, %v895_v6 }
 0x1a6   : > { %v852_v8 = vpop.f32.mrf.mxu2 }
 0x1a7   : > { %v853_v9 = vadd.f32 %v4937_v0, %v852_v8 }
 0x1a9   : > { %v896_v10 = vmax.f32 %v853_v9, 0.0 }
 0x1ab   : > { %4185 = vmatmul.msk.f32.gmra.mxu3 %vm641_vm1, %v896_v10 }
 0x1ae   : > { %v855_v11 = vpop.f32.mrf.mxu2 }
 0x1af   : > { %v856_v12 = vadd.f32 %v4937_v0, %v855_v11 }
 0x1b1   : > { %v897_v13 = vmax.f32 %v856_v12, 0.0 }
 0x1b3   : > { %4186 = vmatmul.msk.f32.gmra.mxu3 %vm641_vm1, %v897_v13 }
 0x1b6   : > { %v858_v14 = vpop.f32.mrf.mxu2 }
 0x1b7   : > { %v859_v15 = vadd.f32 %v4937_v0, %v858_v14 }
 0x1b9   : > { %v898_v16 = vmax.f32 %v859_v15, 0.0 }
 0x1bb   : > { %4187 = vmatmul.msk.f32.gmra.mxu3 %vm641_vm1, %v898_v16 }
 0x1be   : > { %v861_v17 = vpop.f32.mrf.mxu2 }
 0x1bf   : > { %v862_v18 = vadd.f32 %v4937_v0, %v861_v17 }
 0x1c1   : > { %v899_v19 = vmax.f32 %v862_v18, 0.0 }
 0x1c3   : > { %4188 = vmatmul.msk.f32.gmra.mxu3 %vm641_vm1, %v899_v19 }
 0x1c6   : > { %v864_v21 = vpop.f32.mrf.mxu2 }
 0x1c7   : > { %v865_v22 = vadd.f32 %v4937_v0, %v864_v21 }
 0x1c9   : > { %v900_v23 = vmax.f32 %v865_v22, 0.0 }
 0x1cb   : > { %4189 = vmatmul.msk.f32.gmra.mxu3 %vm641_vm1, %v900_v23 }
 0x1ce   : > { %v867_v24 = vpop.f32.mrf.mxu2 }
 0x1cf   : > { %v868_v25 = vadd.f32 %v4937_v0, %v867_v24 }
 0x1d1   : > { %v901_v26 = vmax.f32 %v868_v25, 0.0 }
 0x1d3   : > { %4190 = vmatmul.msk.f32.gmra.mxu3 %vm641_vm1, %v901_v26 }
 0x1d6   : > { %v870_v27 = vpop.f32.mrf.mxu2 }
 0x1d7   : > { %v871_v28 = vadd.f32 %v4937_v0, %v870_v27 }
 0x1d9   : > { %v902_v29 = vmax.f32 %v871_v28, 0.0 }
 0x1db   : > { %4191 = vmatmul.msk.f32.gmra.mxu3 %vm641_vm1, %v902_v29  ;;  %v4236_v29 = vld [vmem:[%s6361_s4 + $0x78] sm:$0xff] }
 0x1dc   : > { %1392 = vmatpush.msrb.mxu2 %v4236_v29 }
 0x1de   : > { %v873_v30 = vpop.f32.mrf.mxu2 }
 0x1df   : > { %v874_v31 = vadd.f32 %v4937_v0, %v873_v30 }
 0x1e1   : > { %v903_v32 = vmax.f32 %v874_v31, 0.0 }
 0x1e3   : > { %4192 = vmatmul.msk.f32.gmra.mxu3 %vm641_vm1, %v903_v32 }
 0x1e6   : > { %v876_v34 = vpop.f32.mrf.mxu2 }
 0x1e7   : > { %v877_v35 = vadd.f32 %v4937_v0, %v876_v34 }
 0x1e9   : > { %v904_v36 = vmax.f32 %v877_v35, 0.0 }
 0x1eb   : > { %4193 = vmatmul.msk.f32.gmra.mxu3 %vm641_vm1, %v904_v36 }
 0x1ee   : > { %v879_v37 = vpop.f32.mrf.mxu2 }
 0x1ef   : > { %v880_v38 = vadd.f32 %v4937_v0, %v879_v37 }
 0x1f1   : > { %v905_v39 = vmax.f32 %v880_v38, 0.0 }
 0x1f3   : > { %4194 = vmatmul.msk.f32.gmra.mxu3 %vm641_vm1, %v905_v39  ;;  %v5032_v39 = vld [vmem:[%s6364_s7] ss:$0 sm:$0xff] }
 0x1f6   : > { %v882_v40 = vpop.f32.mrf.mxu2 }
 0x1f7   : > { %v883_v41 = vadd.f32 %v4937_v0, %v882_v40  ;;  %v482_v40 = vld [vmem:[%s5027_s13] sm:$0xff] }
 0x1f9   : > { %v906_v42 = vmax.f32 %v883_v41, 0.0 }
 0x1fb   : > { %4195 = vmatmul.msk.f32.gmra.mxu3 %vm641_vm1, %v906_v42 }
 0x1fe   : > { %v885_v43 = vpop.f32.mrf.mxu2 }
 0x1ff   : > { %v886_v44 = vadd.f32 %v4937_v0, %v885_v43 }
 0x201   : > { %v907_v45 = vmax.f32 %v886_v44, 0.0  ;;  %v4235_v44 = vld [vmem:[%s6361_s4 + $0x70] sm:$0xff] }
 0x202   : > { %1393 = vmatpush.msrb.mxu2 %v4235_v44 }
 0x203   : > { %4196 = vmatmul.msk.f32.gmra.mxu3 %vm641_vm1, %v907_v45  ;;  %v483_v45 = vld [vmem:[%s5027_s13 + $0x8] sm:$0xff] }
 0x206   : > { %v888_v47 = vpop.f32.mrf.mxu2 }
 0x207   : > { %v889_v48 = vadd.f32 %v4937_v0, %v888_v47 }
 0x209   : > { %v908_v49 = vmax.f32 %v889_v48, 0.0 }
 0x20b   : > { %4197 = vmatmul.msk.f32.gmra.mxu3 %vm641_vm1, %v908_v49  ;;  %v484_v49 = vld [vmem:[%s5027_s13 + $0x10] sm:$0xff] }
 0x20e   : > { %v891_v50 = vpop.f32.mrf.mxu2 }
 0x20f   : > { %v892_v51 = vadd.f32 %v4937_v0, %v891_v50 }
 0x211   : > { %v909_v52 = vmax.f32 %v892_v51, 0.0 }
 0x213   : > { %4198 = vmatmul.msk.f32.gmra.mxu3 %vm641_vm1, %v909_v52 }
 0x21e   : > { %v985_v54 = vpop.f32.mrf.mxu3 }
 0x21f   : > { %v986_v55 = vadd.f32 %v4986_v53, %v985_v54 }
 0x221   : > { %v1033_v56 = vmax.f32 %v986_v55, 0.0 }
 0x223   : > { %4199 = vmatmul.msk.f32.vlgmr.msrb.gmra.mxu0 %vm641_vm1, %v1033_v56 }
 0x226   : > { %v988_v57 = vpop.f32.mrf.mxu3 }
 0x227   : > { %v989_v58 = vadd.f32 %v4986_v53, %v988_v57  ;;  %v486_v57 = vld [vmem:[%s5027_s13 + $0x20] sm:$0xff] }
 0x229   : > { %v1034_v59 = vmax.f32 %v989_v58, 0.0 }
 0x22b   : > { %4200 = vmatmul.msk.f32.gmra.mxu0 %vm641_vm1, %v1034_v59 }
 0x22e   : > { %v991_v60 = vpop.f32.mrf.mxu3 }
 0x22f   : > { %v992_v61 = vadd.f32 %v4986_v53, %v991_v60 }
 0x231   : > { %v1035_v62 = vmax.f32 %v992_v61, 0.0  ;;  %v4234_v61 = vld [vmem:[%s6361_s4 + $0x68] sm:$0xff] }
 0x232   : > { %1394 = vmatpush.msrb.mxu2 %v4234_v61 }
 0x233   : > { %4201 = vmatmul.msk.f32.gmra.mxu0 %vm641_vm1, %v1035_v62  ;;  %v487_v62 = vld [vmem:[%s5027_s13 + $0x28] sm:$0xff] }
 0x236   : > { %v994_v63 = vpop.f32.mrf.mxu3 }
 0x237   : > { %v995_v0 = vadd.f32 %v4986_v53, %v994_v63 }
 0x239   : > { %v1036_v1 = vmax.f32 %v995_v0, 0.0 }
 0x23b   : > { %4202 = vmatmul.msk.f32.gmra.mxu0 %vm641_vm1, %v1036_v1 }
 0x23e   : > { %v997_v2 = vpop.f32.mrf.mxu3 }
 0x23f   : > { %v998_v3 = vadd.f32 %v4986_v53, %v997_v2  ;;  %v488_v2 = vld [vmem:[%s5027_s13 + $0x30] sm:$0xff] }
 0x241   : > { %v1037_v4 = vmax.f32 %v998_v3, 0.0 }
 0x243   : > { %4203 = vmatmul.msk.f32.gmra.mxu0 %vm641_vm1, %v1037_v4 }
 0x246   : > { %v1000_v5 = vpop.f32.mrf.mxu3 }
 0x247   : > { %v1001_v6 = vadd.f32 %v4986_v53, %v1000_v5 }
 0x249   : > { %v1038_v7 = vmax.f32 %v1001_v6, 0.0  ;;  %v489_v6 = vld [vmem:[%s5027_s13 + $0x38] sm:$0xff] }
 0x24b   : > { %4204 = vmatmul.msk.f32.gmra.mxu0 %vm641_vm1, %v1038_v7 }
 0x24e   : > { %v1003_v8 = vpop.f32.mrf.mxu3 }
 0x24f   : > { %v1004_v9 = vadd.f32 %v4986_v53, %v1003_v8 }
 0x251   : > { %v1039_v10 = vmax.f32 %v1004_v9, 0.0 }
 0x253   : > { %4205 = vmatmul.msk.f32.gmra.mxu0 %vm641_vm1, %v1039_v10  ;;  %v490_v10 = vld [vmem:[%s5027_s13 + $0x40] sm:$0xff] }
 0x256   : > { %v1006_v11 = vpop.f32.mrf.mxu3 }
 0x257   : > { %v1007_v12 = vadd.f32 %v4986_v53, %v1006_v11 }
 0x259   : > { %v1040_v13 = vmax.f32 %v1007_v12, 0.0 }
 0x25b   : > { %4206 = vmatmul.msk.f32.gmra.mxu0 %vm641_vm1, %v1040_v13 }
 0x25e   : > { %v1009_v14 = vpop.f32.mrf.mxu3 }
 0x25f   : > { %v1010_v15 = vadd.f32 %v4986_v53, %v1009_v14  ;;  %v4233_v14 = vld [vmem:[%s6361_s4 + $0x60] sm:$0xff] }
 0x260   : > { %1395 = vmatpush.msrb.mxu2 %v4233_v14 }
 0x261   : > { %v1041_v16 = vmax.f32 %v1010_v15, 0.0  ;;  %v491_v15 = vld [vmem:[%s5027_s13 + $0x48] sm:$0xff] }
 0x263   : > { %4207 = vmatmul.msk.f32.gmra.mxu0 %vm641_vm1, %v1041_v16 }
 0x266   : > { %v1012_v17 = vpop.f32.mrf.mxu3 }
 0x267   : > { %v1013_v18 = vadd.f32 %v4986_v53, %v1012_v17 }
 0x269   : > { %v1042_v19 = vmax.f32 %v1013_v18, 0.0 }
 0x26b   : > { %4208 = vmatmul.msk.f32.gmra.mxu0 %vm641_vm1, %v1042_v19  ;;  %v492_v19 = vld [vmem:[%s5027_s13 + $0x50] sm:$0xff] }
 0x26e   : > { %v1015_v20 = vpop.f32.mrf.mxu3 }
 0x26f   : > { %v1016_v21 = vadd.f32 %v4986_v53, %v1015_v20 }
 0x271   : > { %v1043_v22 = vmax.f32 %v1016_v21, 0.0 }
 0x273   : > { %4209 = vmatmul.msk.f32.gmra.mxu0 %vm641_vm1, %v1043_v22 }
 0x276   : > { %v1018_v23 = vpop.f32.mrf.mxu3 }
 0x277   : > { %v1019_v24 = vadd.f32 %v4986_v53, %v1018_v23  ;;  %v493_v23 = vld [vmem:[%s5027_s13 + $0x58] sm:$0xff] }
 0x279   : > { %v1044_v25 = vmax.f32 %v1019_v24, 0.0 }
 0x27b   : > { %4210 = vmatmul.msk.f32.gmra.mxu0 %vm641_vm1, %v1044_v25 }
 0x27e   : > { %v1021_v26 = vpop.f32.mrf.mxu3 }
 0x27f   : > { %v1022_v27 = vadd.f32 %v4986_v53, %v1021_v26 }
 0x281   : > { %v1045_v28 = vmax.f32 %v1022_v27, 0.0  ;;  %v494_v27 = vld [vmem:[%s5027_s13 + $0x60] sm:$0xff] }
 0x283   : > { %4211 = vmatmul.msk.f32.gmra.mxu0 %vm641_vm1, %v1045_v28 }
 0x286   : > { %v1024_v30 = vpop.f32.mrf.mxu3 }
 0x287   : > { %v1025_v31 = vadd.f32 %v4986_v53, %v1024_v30 }
 0x289   : > { %v1046_v32 = vmax.f32 %v1025_v31, 0.0  ;;  %v495_v31 = vld [vmem:[%s5027_s13 + $0x68] sm:$0xff] }
 0x28b   : > { %4212 = vmatmul.msk.f32.gmra.mxu0 %vm641_vm1, %v1046_v32 }
 0x28e   : > { %v1027_v33 = vpop.f32.mrf.mxu3 }
 0x28f   : > { %v1028_v34 = vadd.f32 %v4986_v53, %v1027_v33 }
 0x291   : > { %v1047_v35 = vmax.f32 %v1028_v34, 0.0 }
 0x293   : > { %4213 = vmatmul.msk.f32.gmra.mxu0 %vm641_vm1, %v1047_v35  ;;  %v4257_v35 = vld [vmem:[%s6361_s4 + $0x98] sm:$0xff] }
 0x294   : > { %1531 = vmatpush.msrb.mxu3 %v4257_v35 }
 0x296   : > { %v1030_v36 = vpop.f32.mrf.mxu3 }
 0x297   : > { %v1031_v37 = vadd.f32 %v4986_v53, %v1030_v36  ;;  %v485_v53 = vld [vmem:[%s5027_s13 + $0x18] sm:$0xff]  ;;  %v496_v36 = vld [vmem:[%s5027_s13 + $0x70] sm:$0xff] }
 0x299   : > { %v1048_v38 = vmax.f32 %v1031_v37, 0.0 }
 0x29b   : > { %4214 = vmatmul.msk.f32.gmra.mxu0 %vm641_vm1, %v1048_v38 }
 0x2a0   : > { %v1122_v41 = vpop.f32.mrf.mxu0 }
 0x2a1   : > { %v1123_v42 = vadd.f32 %v5032_v39, %v1122_v41  ;;  %v497_v41 = vld [vmem:[%s5027_s13 + $0x78] sm:$0xff] }
 0x2a3   : > { %v5036_v43 = vadd.f32 %v1123_v42, %v482_v40 }
 0x2a5   : > { %4217 = vmatmul.msk.f32.vlgmr.msrb.gmra.mxu1 %vm503_vm0, %v5036_v43 }
 0x2a8   : > { %v1125_v46 = vpop.f32.mrf.mxu0 }
 0x2a9   : > { %v1126_v47 = vadd.f32 %v5032_v39, %v1125_v46  ;;  %v5145_v46 = vld [vmem:[%s6360_s3 + $0x1] ss:$0 sm:$0xff] }
 0x2ab   : > { %v5045_v48 = vadd.f32 %v1126_v47, %v483_v45 }
 0x2ad   : > { %4218 = vmatmul.msk.f32.gmra.mxu1 %vm503_vm0, %v5045_v48 }
 0x2b0   : > { %v1128_v50 = vpop.f32.mrf.mxu0 }
 0x2b1   : > { %v1129_v51 = vadd.f32 %v5032_v39, %v1128_v50 }
 0x2b3   : > { %v5051_v52 = vadd.f32 %v1129_v51, %v484_v49 }
 0x2b5   : > { %4219 = vmatmul.msk.f32.gmra.mxu1 %vm503_vm0, %v5051_v52 }
 0x2b8   : > { %v1131_v54 = vpop.f32.mrf.mxu0 }
 0x2b9   : > { %v1132_v55 = vadd.f32 %v5032_v39, %v1131_v54  ;;  %v4256_v54 = vld [vmem:[%s6361_s4 + $0x90] sm:$0xff] }
 0x2ba   : > { %1532 = vmatpush.msrb.mxu3 %v4256_v54 }
 0x2bb   : > { %v5057_v56 = vadd.f32 %v1132_v55, %v485_v53 }
 0x2bd   : > { %4220 = vmatmul.msk.f32.gmra.mxu1 %vm503_vm0, %v5057_v56 }
 0x2c0   : > { %v1134_v58 = vpop.f32.mrf.mxu0 }
 0x2c1   : > { %v1135_v59 = vadd.f32 %v5032_v39, %v1134_v58 }
 0x2c3   : > { %v5063_v60 = vadd.f32 %v1135_v59, %v486_v57 }
 0x2c5   : > { %4221 = vmatmul.msk.f32.gmra.mxu1 %vm503_vm0, %v5063_v60 }
 0x2c8   : > { %v1137_v63 = vpop.f32.mrf.mxu0 }
 0x2c9   : > { %v1138_v0 = vadd.f32 %v5032_v39, %v1137_v63 }
 0x2cb   : > { %v5072_v1 = vadd.f32 %v1138_v0, %v487_v62 }
 0x2cd   : > { %4222 = vmatmul.msk.f32.gmra.mxu1 %vm503_vm0, %v5072_v1 }
 0x2d0   : > { %v1140_v3 = vpop.f32.mrf.mxu0 }
 0x2d1   : > { %v1141_v4 = vadd.f32 %v5032_v39, %v1140_v3 }
 0x2d3   : > { %v5078_v5 = vadd.f32 %v1141_v4, %v488_v2 }
 0x2d5   : > { %4223 = vmatmul.msk.f32.gmra.mxu1 %vm503_vm0, %v5078_v5 }
 0x2d8   : > { %v1143_v7 = vpop.f32.mrf.mxu0 }
 0x2d9   : > { %v1144_v8 = vadd.f32 %v5032_v39, %v1143_v7  ;;  %v4255_v7 = vld [vmem:[%s6361_s4 + $0x88] sm:$0xff] }
 0x2da   : > { %1533 = vmatpush.msrb.mxu3 %v4255_v7 }
 0x2db   : > { %v5084_v9 = vadd.f32 %v1144_v8, %v489_v6 }
 0x2dd   : > { %4224 = vmatmul.msk.f32.gmra.mxu1 %vm503_vm0, %v5084_v9 }
 0x2e0   : > { %v1146_v11 = vpop.f32.mrf.mxu0 }
 0x2e1   : > { %v1147_v12 = vadd.f32 %v5032_v39, %v1146_v11 }
 0x2e3   : > { %v5090_v13 = vadd.f32 %v1147_v12, %v490_v10 }
 0x2e5   : > { %4225 = vmatmul.msk.f32.gmra.mxu1 %vm503_vm0, %v5090_v13 }
 0x2e8   : > { %v1149_v16 = vpop.f32.mrf.mxu0 }
 0x2e9   : > { %v1150_v17 = vadd.f32 %v5032_v39, %v1149_v16 }
 0x2eb   : > { %v5099_v18 = vadd.f32 %v1150_v17, %v491_v15 }
 0x2ed   : > { %4226 = vmatmul.msk.f32.gmra.mxu1 %vm503_vm0, %v5099_v18 }
 0x2f0   : > { %v1152_v20 = vpop.f32.mrf.mxu0 }
 0x2f1   : > { %v1153_v21 = vadd.f32 %v5032_v39, %v1152_v20 }
 0x2f3   : > { %v5105_v22 = vadd.f32 %v1153_v21, %v492_v19 }
 0x2f5   : > { %4227 = vmatmul.msk.f32.gmra.mxu1 %vm503_vm0, %v5105_v22 }
 0x2f8   : > { %v1155_v24 = vpop.f32.mrf.mxu0 }
 0x2f9   : > { %v1156_v25 = vadd.f32 %v5032_v39, %v1155_v24  ;;  %v4254_v24 = vld [vmem:[%s6361_s4 + $0x80] sm:$0xff] }
 0x2fa   : > { %1534 = vmatpush.msrb.mxu3 %v4254_v24 }
 0x2fb   : > { %v5111_v26 = vadd.f32 %v1156_v25, %v493_v23 }
 0x2fd   : > { %4228 = vmatmul.msk.f32.gmra.mxu1 %vm503_vm0, %v5111_v26 }
 0x300   : > { %v1158_v28 = vpop.f32.mrf.mxu0 }
 0x301   : > { %v1159_v29 = vadd.f32 %v5032_v39, %v1158_v28 }
 0x303   : > { %v5117_v30 = vadd.f32 %v1159_v29, %v494_v27 }
 0x305   : > { %4229 = vmatmul.msk.f32.gmra.mxu1 %vm503_vm0, %v5117_v30 }
 0x308   : > { %v1161_v32 = vpop.f32.mrf.mxu0 }
 0x309   : > { %v1162_v33 = vadd.f32 %v5032_v39, %v1161_v32 }
 0x30b   : > { %v5123_v34 = vadd.f32 %v1162_v33, %v495_v31 }
 0x30d   : > { %4230 = vmatmul.msk.f32.gmra.mxu1 %vm503_vm0, %v5123_v34 }
 0x310   : > { %v1164_v37 = vpop.f32.mrf.mxu0 }
 0x311   : > { %v1165_v38 = vadd.f32 %v5032_v39, %v1164_v37 }
 0x313   : > { %v5132_v40 = vadd.f32 %v1165_v38, %v496_v36 }
 0x315   : > { %4231 = vmatmul.msk.f32.gmra.mxu1 %vm503_vm0, %v5132_v40 }
 0x318   : > { %v1167_v42 = vpop.f32.mrf.mxu0 }
 0x319   : > { %v1168_v44 = vadd.f32 %v5032_v39, %v1167_v42 }
 0x31b   : > { %v5138_v45 = vadd.f32 %v1168_v44, %v497_v41 }
 0x31d   : > { %4232 = vmatmul.msk.f32.gmra.mxu1 %vm503_vm0, %v5138_v45 }
 0x322   : > { %v1258_v47 = vpop.f32.mrf.mxu1 }
 0x323   : > { %v1259_v49 = vadd.f32 %v5145_v46, %v1258_v47 }
 0x325   : > { %v1306_v50 = vmax.f32 %v1259_v49, 0.0  ;;  %v4278_v49 = vld [vmem:[%s6361_s4 + $0xb8] sm:$0xff] }
 0x326   : > { %1670 = vmatpush.msra.mxu0 %v4278_v49 }
 0x327   : > { %4238 = vmatmul.msk.f32.vlgmr.msrb.gmra.mxu2 %vm641_vm1, %v1306_v50 }
 0x32a   : > { %v1261_v51 = vpop.f32.mrf.mxu1 }
 0x32b   : > { %v1262_v53 = vadd.f32 %v5145_v46, %v1261_v51 }
 0x32d   : > { %v1307_v39 = vmax.f32 %v1262_v53, 0.0 }
 0x32f   : > { %4239 = vmatmul.msk.f32.gmra.mxu2 %vm641_vm1, %v1307_v39  ;;  %v5194_v39 = vld [vmem:[%s6362_s5 + $0x3] ss:$0 sm:$0xff] }
 0x332   : > { %v1264_v55 = vpop.f32.mrf.mxu1 }
 0x333   : > { %v1265_v57 = vadd.f32 %v5145_v46, %v1264_v55 }
 0x335   : > { %v1308_v58 = vmax.f32 %v1265_v57, 0.0 }
 0x337   : > { %4240 = vmatmul.msk.f32.gmra.mxu2 %vm641_vm1, %v1308_v58 }
 0x33a   : > { %v1267_v59 = vpop.f32.mrf.mxu1 }
 0x33b   : > { %v1268_v61 = vadd.f32 %v5145_v46, %v1267_v59 }
 0x33d   : > { %v1309_v62 = vmax.f32 %v1268_v61, 0.0 }
 0x33f   : > { %4241 = vmatmul.msk.f32.gmra.mxu2 %vm641_vm1, %v1309_v62 }
 0x342   : > { %v1270_v63 = vpop.f32.mrf.mxu1 }
 0x343   : > { %v1271_v0 = vadd.f32 %v5145_v46, %v1270_v63 }
 0x345   : > { %v1310_v2 = vmax.f32 %v1271_v0, 0.0 }
 0x347   : > { %4242 = vmatmul.msk.f32.gmra.mxu2 %vm641_vm1, %v1310_v2 }
 0x34a   : > { %v1273_v3 = vpop.f32.mrf.mxu1 }
 0x34b   : > { %v1274_v4 = vadd.f32 %v5145_v46, %v1273_v3 }
 0x34d   : > { %v1311_v6 = vmax.f32 %v1274_v4, 0.0 }
 0x34f   : > { %4243 = vmatmul.msk.f32.gmra.mxu2 %vm641_vm1, %v1311_v6 }
 0x352   : > { %v1276_v8 = vpop.f32.mrf.mxu1 }
 0x353   : > { %v1277_v10 = vadd.f32 %v5145_v46, %v1276_v8 }
 0x355   : > { %v1312_v11 = vmax.f32 %v1277_v10, 0.0 }
 0x357   : > { %4244 = vmatmul.msk.f32.gmra.mxu2 %vm641_vm1, %v1312_v11 }
 0x35a   : > { %v1279_v12 = vpop.f32.mrf.mxu1 }
 0x35b   : > { %v1280_v14 = vadd.f32 %v5145_v46, %v1279_v12 }
 0x35d   : > { %v1313_v15 = vmax.f32 %v1280_v14, 0.0  ;;  %v4276_v14 = vld [vmem:[%s6361_s4 + $0xa8] sm:$0xff] }
 0x35f   : > { %4245 = vmatmul.msk.f32.gmra.mxu2 %vm641_vm1, %v1313_v15 }
 0x362   : > { %v1282_v16 = vpop.f32.mrf.mxu1 }
 0x363   : > { %v1283_v17 = vadd.f32 %v5145_v46, %v1282_v16 }
 0x365   : > { %v1314_v19 = vmax.f32 %v1283_v17, 0.0 }
 0x367   : > { %4246 = vmatmul.msk.f32.gmra.mxu2 %vm641_vm1, %v1314_v19 }
 0x36a   : > { %v1285_v20 = vpop.f32.mrf.mxu1 }
 0x36b   : > { %v1286_v21 = vadd.f32 %v5145_v46, %v1285_v20 }
 0x36d   : > { %v1315_v23 = vmax.f32 %v1286_v21, 0.0 }
 0x36f   : > { %4247 = vmatmul.msk.f32.gmra.mxu2 %vm641_vm1, %v1315_v23 }
 0x372   : > { %v1288_v25 = vpop.f32.mrf.mxu1 }
 0x373   : > { %v1289_v27 = vadd.f32 %v5145_v46, %v1288_v25 }
 0x375   : > { %v1316_v28 = vmax.f32 %v1289_v27, 0.0 }
 0x377   : > { %4248 = vmatmul.msk.f32.gmra.mxu2 %vm641_vm1, %v1316_v28 }
 0x37a   : > { %v1291_v29 = vpop.f32.mrf.mxu1 }
 0x37b   : > { %v1292_v31 = vadd.f32 %v5145_v46, %v1291_v29 }
 0x37d   : > { %v1317_v32 = vmax.f32 %v1292_v31, 0.0  ;;  %v4275_v31 = vld [vmem:[%s6361_s4 + $0xa0] sm:$0xff] }
 0x37f   : > { %4249 = vmatmul.msk.f32.gmra.mxu2 %vm641_vm1, %v1317_v32 }
 0x382   : > { %v1294_v33 = vpop.f32.mrf.mxu1 }
 0x383   : > { %v1295_v35 = vadd.f32 %v5145_v46, %v1294_v33 }
 0x385   : > { %v1318_v36 = vmax.f32 %v1295_v35, 0.0 }
 0x387   : > { %4250 = vmatmul.msk.f32.gmra.mxu2 %vm641_vm1, %v1318_v36 }
 0x38a   : > { %v1297_v37 = vpop.f32.mrf.mxu1 }
 0x38b   : > { %v1298_v38 = vadd.f32 %v5145_v46, %v1297_v37 }
 0x38d   : > { %v1319_v41 = vmax.f32 %v1298_v38, 0.0 }
 0x38f   : > { %4251 = vmatmul.msk.f32.gmra.mxu2 %vm641_vm1, %v1319_v41 }
 0x392   : > { %v1300_v42 = vpop.f32.mrf.mxu1 }
 0x393   : > { %v1301_v44 = vadd.f32 %v5145_v46, %v1300_v42 }
 0x395   : > { %v1320_v47 = vmax.f32 %v1301_v44, 0.0 }
 0x397   : > { %4252 = vmatmul.msk.f32.gmra.mxu2 %vm641_vm1, %v1320_v47 }
 0x39a   : > { %v1303_v50 = vpop.f32.mrf.mxu1 }
 0x39b   : > { %v1304_v51 = vadd.f32 %v5145_v46, %v1303_v50  ;;  %v4277_v46 = vld [vmem:[%s6361_s4 + $0xb0] sm:$0xff] }
 0x39c   : > { %1671 = vmatpush.msra.mxu0 %v4277_v46 }
 0x39d   : > { %v1321_v53 = vmax.f32 %v1304_v51, 0.0  ;;  %v4299_v51 = vld [vmem:[%s6363_s6 + $0x38] sm:$0xff] }
 0x39e   : > { %1672 = vmatpush.msra.mxu0 %v4276_v14  ;;  %1809 = vmatpush.msra.mxu1 %v4299_v51 }
 0x39f   : > { %4253 = vmatmul.msk.f32.gmra.mxu2 %vm641_vm1, %v1321_v53 }
 0x3a0   : > { %1673 = vmatpush.msra.mxu0 %v4275_v31 }
 0x3aa   : > { %v1397_v54 = vpop.f32.mrf.mxu2 }
 0x3ab   : > { %v1398_v55 = vadd.f32 %v5194_v39, %v1397_v54 }
 0x3ad   : > { %v1445_v57 = vmax.f32 %v1398_v55, 0.0 }
 0x3af   : > { %4259 = vmatmul.msk.f32.vlgmr.msrb.gmra.mxu3 %vm641_vm1, %v1445_v57 }
 0x3b2   : > { %v1400_v58 = vpop.f32.mrf.mxu2 }
 0x3b3   : > { %v1401_v59 = vadd.f32 %v5194_v39, %v1400_v58 }
 0x3b5   : > { %v1446_v61 = vmax.f32 %v1401_v59, 0.0 }
 0x3b7   : > { %4260 = vmatmul.msk.f32.gmra.mxu3 %vm641_vm1, %v1446_v61  ;;  %v5243_v61 = vld [vmem:[%s6362_s5 + $0x4] ss:$0 sm:$0xff] }
 0x3ba   : > { %v1403_v62 = vpop.f32.mrf.mxu2 }
 0x3bb   : > { %v1404_v63 = vadd.f32 %v5194_v39, %v1403_v62 }
 0x3bd   : > { %v1447_v0 = vmax.f32 %v1404_v63, 0.0 }
 0x3bf   : > { %4261 = vmatmul.msk.f32.gmra.mxu3 %vm641_vm1, %v1447_v0  ;;  %v4298_v0 = vld [vmem:[%s6363_s6 + $0x30] sm:$0xff] }
 0x3c0   : > { %1810 = vmatpush.msra.mxu1 %v4298_v0 }
 0x3c2   : > { %v1406_v2 = vpop.f32.mrf.mxu2 }
 0x3c3   : > { %v1407_v3 = vadd.f32 %v5194_v39, %v1406_v2 }
 0x3c5   : > { %v1448_v4 = vmax.f32 %v1407_v3, 0.0 }
 0x3c7   : > { %4262 = vmatmul.msk.f32.gmra.mxu3 %vm641_vm1, %v1448_v4 }
 0x3ca   : > { %v1409_v6 = vpop.f32.mrf.mxu2 }
 0x3cb   : > { %v1410_v7 = vadd.f32 %v5194_v39, %v1409_v6 }
 0x3cd   : > { %v1449_v8 = vmax.f32 %v1410_v7, 0.0 }
 0x3cf   : > { %4263 = vmatmul.msk.f32.gmra.mxu3 %vm641_vm1, %v1449_v8 }
 0x3d2   : > { %v1412_v10 = vpop.f32.mrf.mxu2 }
 0x3d3   : > { %v1413_v11 = vadd.f32 %v5194_v39, %v1412_v10 }
 0x3d5   : > { %v1450_v12 = vmax.f32 %v1413_v11, 0.0 }
 0x3d7   : > { %4264 = vmatmul.msk.f32.gmra.mxu3 %vm641_vm1, %v1450_v12 }
 0x3da   : > { %v1415_v15 = vpop.f32.mrf.mxu2 }
 0x3db   : > { %v1416_v16 = vadd.f32 %v5194_v39, %v1415_v15 }
 0x3dd   : > { %v1451_v17 = vmax.f32 %v1416_v16, 0.0  ;;  %v4297_v16 = vld [vmem:[%s6363_s6 + $0x28] sm:$0xff] }
 0x3de   : > { %1811 = vmatpush.msra.mxu1 %v4297_v16 }
 0x3df   : > { %4265 = vmatmul.msk.f32.gmra.mxu3 %vm641_vm1, %v1451_v17 }
 0x3e2   : > { %v1418_v19 = vpop.f32.mrf.mxu2 }
 0x3e3   : > { %v1419_v20 = vadd.f32 %v5194_v39, %v1418_v19 }
 0x3e5   : > { %v1452_v21 = vmax.f32 %v1419_v20, 0.0 }
 0x3e7   : > { %4266 = vmatmul.msk.f32.gmra.mxu3 %vm641_vm1, %v1452_v21 }
 0x3ea   : > { %v1421_v23 = vpop.f32.mrf.mxu2 }
 0x3eb   : > { %v1422_v24 = vadd.f32 %v5194_v39, %v1421_v23 }
 0x3ed   : > { %v1453_v25 = vmax.f32 %v1422_v24, 0.0 }
 0x3ef   : > { %4267 = vmatmul.msk.f32.gmra.mxu3 %vm641_vm1, %v1453_v25 }
 0x3f2   : > { %v1424_v27 = vpop.f32.mrf.mxu2 }
 0x3f3   : > { %v1425_v28 = vadd.f32 %v5194_v39, %v1424_v27 }
 0x3f5   : > { %v1454_v29 = vmax.f32 %v1425_v28, 0.0 }
 0x3f7   : > { %4268 = vmatmul.msk.f32.gmra.mxu3 %vm641_vm1, %v1454_v29 }
 0x3fa   : > { %v1427_v32 = vpop.f32.mrf.mxu2 }
 0x3fb   : > { %v1428_v33 = vadd.f32 %v5194_v39, %v1427_v32 }
 0x3fd   : > { %v1455_v35 = vmax.f32 %v1428_v33, 0.0  ;;  %v4296_v33 = vld [vmem:[%s6363_s6 + $0x20] sm:$0xff] }
 0x3fe   : > { %1812 = vmatpush.msra.mxu1 %v4296_v33 }
 0x3ff   : > { %4269 = vmatmul.msk.f32.gmra.mxu3 %vm641_vm1, %v1455_v35 }
 0x402   : > { %v1430_v36 = vpop.f32.mrf.mxu2 }
 0x403   : > { %v1431_v37 = vadd.f32 %v5194_v39, %v1430_v36 }
 0x405   : > { %v1456_v38 = vmax.f32 %v1431_v37, 0.0 }
 0x407   : > { %4270 = vmatmul.msk.f32.gmra.mxu3 %vm641_vm1, %v1456_v38 }
 0x40a   : > { %v1433_v41 = vpop.f32.mrf.mxu2 }
 0x40b   : > { %v1434_v42 = vadd.f32 %v5194_v39, %v1433_v41 }
 0x40d   : > { %v1457_v44 = vmax.f32 %v1434_v42, 0.0 }
 0x40f   : > { %4271 = vmatmul.msk.f32.gmra.mxu3 %vm641_vm1, %v1457_v44 }
 0x412   : > { %v1436_v47 = vpop.f32.mrf.mxu2 }
 0x413   : > { %v1437_v49 = vadd.f32 %v5194_v39, %v1436_v47 }
 0x415   : > { %v1458_v50 = vmax.f32 %v1437_v49, 0.0 }
 0x417   : > { %4272 = vmatmul.msk.f32.gmra.mxu3 %vm641_vm1, %v1458_v50 }
 0x41a   : > { %v1439_v53 = vpop.f32.mrf.mxu2 }
 0x41b   : > { %v1440_v54 = vadd.f32 %v5194_v39, %v1439_v53 }
 0x41d   : > { %v1459_v55 = vmax.f32 %v1440_v54, 0.0  ;;  %v4317_v54 = vld [vmem:[%s6359_s2 + $0x10] sm:$0xff] }
 0x41e   : > { %1948 = vmatpush.msra.mxu2 %v4317_v54 }
 0x41f   : > { %4273 = vmatmul.msk.f32.gmra.mxu3 %vm641_vm1, %v1459_v55 }
 0x422   : > { %v1442_v57 = vpop.f32.mrf.mxu2 }
 0x423   : > { %v1443_v58 = vadd.f32 %v5194_v39, %v1442_v57 }
 0x425   : > { %v1460_v59 = vmax.f32 %v1443_v58, 0.0 }
 0x427   : > { %4274 = vmatmul.msk.f32.gmra.mxu3 %vm641_vm1, %v1460_v59 }
 0x432   : > { %v1536_v46 = vpop.f32.mrf.mxu3 }
 0x433   : > { %v1537_v62 = vadd.f32 %v5243_v61, %v1536_v46 }
 0x435   : > { %v1584_v63 = vmax.f32 %v1537_v62, 0.0 }
 0x437   : > { %4280 = vmatmul.msk.f32.vlgmr.msra.gmra.mxu0 %vm641_vm1, %v1584_v63 }
 0x43a   : > { %v1539_v39 = vpop.f32.mrf.mxu3 }
 0x43b   : > { %v1540_v2 = vadd.f32 %v5243_v61, %v1539_v39 }
 0x43d   : > { %v1585_v3 = vmax.f32 %v1540_v2, 0.0  ;;  %v5292_v2 = vld [vmem:[%s6362_s5 + $0x5] ss:$0 sm:$0xff] }
 0x43f   : > { %4281 = vmatmul.msk.f32.gmra.mxu0 %vm641_vm1, %v1585_v3 }
 0x442   : > { %v1542_v4 = vpop.f32.mrf.mxu3 }
 0x443   : > { %v1543_v6 = vadd.f32 %v5243_v61, %v1542_v4 }
 0x445   : > { %v1586_v7 = vmax.f32 %v1543_v6, 0.0 }
 0x447   : > { %4282 = vmatmul.msk.f32.gmra.mxu0 %vm641_vm1, %v1586_v7 }
 0x44a   : > { %v1545_v8 = vpop.f32.mrf.mxu3 }
 0x44b   : > { %v1546_v10 = vadd.f32 %v5243_v61, %v1545_v8 }
 0x44d   : > { %v1587_v11 = vmax.f32 %v1546_v10, 0.0 }
 0x44f   : > { %4283 = vmatmul.msk.f32.gmra.mxu0 %vm641_vm1, %v1587_v11 }
 0x452   : > { %v1548_v12 = vpop.f32.mrf.mxu3 }
 0x453   : > { %v1549_v14 = vadd.f32 %v5243_v61, %v1548_v12 }
 0x455   : > { %v1588_v15 = vmax.f32 %v1549_v14, 0.0 }
 0x457   : > { %4284 = vmatmul.msk.f32.gmra.mxu0 %vm641_vm1, %v1588_v15 }
 0x45a   : > { %v1551_v17 = vpop.f32.mrf.mxu3 }
 0x45b   : > { %v1552_v19 = vadd.f32 %v5243_v61, %v1551_v17 }
 0x45d   : > { %v1589_v20 = vmax.f32 %v1552_v19, 0.0 }
 0x45f   : > { %4285 = vmatmul.msk.f32.gmra.mxu0 %vm641_vm1, %v1589_v20 }
 0x462   : > { %v1554_v21 = vpop.f32.mrf.mxu3 }
 0x463   : > { %v1555_v23 = vadd.f32 %v5243_v61, %v1554_v21 }
 0x465   : > { %v1590_v24 = vmax.f32 %v1555_v23, 0.0 }
 0x467   : > { %4286 = vmatmul.msk.f32.gmra.mxu0 %vm641_vm1, %v1590_v24 }
 0x46a   : > { %v1557_v25 = vpop.f32.mrf.mxu3 }
 0x46b   : > { %v1558_v27 = vadd.f32 %v5243_v61, %v1557_v25 }
 0x46d   : > { %v1591_v28 = vmax.f32 %v1558_v27, 0.0 }
 0x46f   : > { %4287 = vmatmul.msk.f32.gmra.mxu0 %vm641_vm1, %v1591_v28 }
 0x472   : > { %v1560_v29 = vpop.f32.mrf.mxu3 }
 0x473   : > { %v1561_v31 = vadd.f32 %v5243_v61, %v1560_v29 }
 0x475   : > { %v1592_v32 = vmax.f32 %v1561_v31, 0.0 }
 0x477   : > { %4288 = vmatmul.msk.f32.gmra.mxu0 %vm641_vm1, %v1592_v32 }
 0x47a   : > { %v1563_v35 = vpop.f32.mrf.mxu3 }
 0x47b   : > { %v1564_v36 = vadd.f32 %v5243_v61, %v1563_v35 }
 0x47d   : > { %v1593_v37 = vmax.f32 %v1564_v36, 0.0 }
 0x47f   : > { %4289 = vmatmul.msk.f32.gmra.mxu0 %vm641_vm1, %v1593_v37 }
 0x482   : > { %v1566_v38 = vpop.f32.mrf.mxu3 }
 0x483   : > { %v1567_v41 = vadd.f32 %v5243_v61, %v1566_v38 }
 0x485   : > { %v1594_v42 = vmax.f32 %v1567_v41, 0.0 }
 0x487   : > { %4290 = vmatmul.msk.f32.gmra.mxu0 %vm641_vm1, %v1594_v42 }
 0x48a   : > { %v1569_v44 = vpop.f32.mrf.mxu3 }
 0x48b   : > { %v1570_v47 = vadd.f32 %v5243_v61, %v1569_v44 }
 0x48d   : > { %v1595_v49 = vmax.f32 %v1570_v47, 0.0 }
 0x48f   : > { %4291 = vmatmul.msk.f32.gmra.mxu0 %vm641_vm1, %v1595_v49 }
 0x492   : > { %v1572_v50 = vpop.f32.mrf.mxu3 }
 0x493   : > { %v1573_v51 = vadd.f32 %v5243_v61, %v1572_v50 }
 0x495   : > { %v1596_v53 = vmax.f32 %v1573_v51, 0.0 }
 0x497   : > { %4292 = vmatmul.msk.f32.gmra.mxu0 %vm641_vm1, %v1596_v53 }
 0x49a   : > { %v1575_v55 = vpop.f32.mrf.mxu3 }
 0x49b   : > { %v1576_v57 = vadd.f32 %v5243_v61, %v1575_v55 }
 0x49d   : > { %v1597_v58 = vmax.f32 %v1576_v57, 0.0 }
 0x49f   : > { %4293 = vmatmul.msk.f32.gmra.mxu0 %vm641_vm1, %v1597_v58 }
 0x4a2   : > { %v1578_v59 = vpop.f32.mrf.mxu3 }
 0x4a3   : > { %v1579_v46 = vadd.f32 %v5243_v61, %v1578_v59 }
 0x4a5   : > { %v1598_v62 = vmax.f32 %v1579_v46, 0.0  ;;  %v4338_v46 = vld [vmem:[%s6361_s4 + $0xd8] sm:$0xff] }
 0x4a6   : > { %2084 = vmatpush.msra.mxu3 %v4338_v46  ;;  %v4690_v46 = vld [vmem:[%s4787_s29 + $0x48] sm:$0xff] }
 0x4a7   : > { %4294 = vmatmul.msk.f32.gmra.mxu0 %vm641_vm1, %v1598_v62 }
 0x4aa   : > { %v1581_v63 = vpop.f32.mrf.mxu3 }
 0x4ab   : > { %v1582_v0 = vadd.f32 %v5243_v61, %v1581_v63 }
 0x4ad   : > { %v1599_v39 = vmax.f32 %v1582_v0, 0.0 }
 0x4af   : > { %4295 = vmatmul.msk.f32.gmra.mxu0 %vm641_vm1, %v1599_v39 }
 0x4b4   : > { %v1675_v3 = vpop.f32.mrf.mxu0 }
 0x4b5   : > { %v1676_v4 = vadd.f32 %v5292_v2, %v1675_v3 }
 0x4b7   : > { %v1723_v6 = vmax.f32 %v1676_v4, 0.0 }
 0x4b9   : > { %4301 = vmatmul.msk.f32.vlgmr.msra.gmra.mxu1 %vm641_vm1, %v1723_v6  ;;  %v5332_v6 = vld [vmem:[%s6364_s7 + $0x1] ss:$0 sm:$0xff] }
 0x4bc   : > { %v1678_v7 = vpop.f32.mrf.mxu0 }
 0x4bd   : > { %v1679_v8 = vadd.f32 %v5292_v2, %v1678_v7 }
 0x4bf   : > { %v1724_v10 = vmax.f32 %v1679_v8, 0.0 }
 0x4c1   : > { %4302 = vmatmul.msk.f32.gmra.mxu1 %vm641_vm1, %v1724_v10  ;;  %v4681_v10 = vld [vmem:[%s4787_s29] sm:$0xff] }
 0x4c4   : > { %v1681_v61 = vpop.f32.mrf.mxu0 }
 0x4c5   : > { %v1682_v11 = vadd.f32 %v5292_v2, %v1681_v61 }
 0x4c7   : > { %v1725_v12 = vmax.f32 %v1682_v11, 0.0 }
 0x4c9   : > { %4303 = vmatmul.msk.f32.gmra.mxu1 %vm641_vm1, %v1725_v12  ;;  %v4682_v12 = vld [vmem:[%s4787_s29 + $0x8] sm:$0xff] }
 0x4cc   : > { %v1684_v14 = vpop.f32.mrf.mxu0 }
 0x4cd   : > { %v1685_v15 = vadd.f32 %v5292_v2, %v1684_v14 }
 0x4cf   : > { %v1726_v16 = vmax.f32 %v1685_v15, 0.0  ;;  %v4337_v15 = vld [vmem:[%s6361_s4 + $0xd0] sm:$0xff] }
 0x4d0   : > { %2085 = vmatpush.msra.mxu3 %v4337_v15  ;;  %v4693_v15 = vld [vmem:[%s4787_s29 + $0x60] sm:$0xff] }
 0x4d1   : > { %4304 = vmatmul.msk.f32.gmra.mxu1 %vm641_vm1, %v1726_v16 }
 0x4d4   : > { %v1687_v17 = vpop.f32.mrf.mxu0 }
 0x4d5   : > { %v1688_v19 = vadd.f32 %v5292_v2, %v1687_v17 }
 0x4d7   : > { %v1727_v20 = vmax.f32 %v1688_v19, 0.0  ;;  %v4683_v19 = vld [vmem:[%s4787_s29 + $0x10] sm:$0xff] }
 0x4d9   : > { %4305 = vmatmul.msk.f32.gmra.mxu1 %vm641_vm1, %v1727_v20 }
 0x4dc   : > { %v1690_v21 = vpop.f32.mrf.mxu0 }
 0x4dd   : > { %v1691_v23 = vadd.f32 %v5292_v2, %v1690_v21 }
 0x4df   : > { %v1728_v24 = vmax.f32 %v1691_v23, 0.0 }
 0x4e1   : > { %4306 = vmatmul.msk.f32.gmra.mxu1 %vm641_vm1, %v1728_v24  ;;  %v4684_v24 = vld [vmem:[%s4787_s29 + $0x18] sm:$0xff] }
 0x4e4   : > { %v1693_v25 = vpop.f32.mrf.mxu0 }
 0x4e5   : > { %v1694_v27 = vadd.f32 %v5292_v2, %v1693_v25 }
 0x4e7   : > { %v1729_v28 = vmax.f32 %v1694_v27, 0.0 }
 0x4e9   : > { %4307 = vmatmul.msk.f32.gmra.mxu1 %vm641_vm1, %v1729_v28 }
 0x4ec   : > { %v1696_v29 = vpop.f32.mrf.mxu0 }
 0x4ed   : > { %v1697_v31 = vadd.f32 %v5292_v2, %v1696_v29  ;;  %v4685_v29 = vld [vmem:[%s4787_s29 + $0x20] sm:$0xff] }
 0x4ef   : > { %v1730_v32 = vmax.f32 %v1697_v31, 0.0 }
 0x4f1   : > { %4308 = vmatmul.msk.f32.gmra.mxu1 %vm641_vm1, %v1730_v32 }
 0x4f4   : > { %v1699_v33 = vpop.f32.mrf.mxu0 }
 0x4f5   : > { %v1700_v35 = vadd.f32 %v5292_v2, %v1699_v33 }
 0x4f7   : > { %v1731_v36 = vmax.f32 %v1700_v35, 0.0  ;;  %v4686_v35 = vld [vmem:[%s4787_s29 + $0x28] sm:$0xff] }
 0x4f9   : > { %4309 = vmatmul.msk.f32.gmra.mxu1 %vm641_vm1, %v1731_v36 }
 0x4fc   : > { %v1702_v37 = vpop.f32.mrf.mxu0 }
 0x4fd   : > { %v1703_v38 = vadd.f32 %v5292_v2, %v1702_v37  ;;  %v4336_v37 = vld [vmem:[%s6361_s4 + $0xc8] sm:$0xff] }
 0x4fe   : > { %2086 = vmatpush.msra.mxu3 %v4336_v37  ;;  %v4696_v37 = vld [vmem:[%s4787_s29 + $0x78] sm:$0xff] }
 0x4ff   : > { %v1732_v41 = vmax.f32 %v1703_v38, 0.0 }
 0x501   : > { %4310 = vmatmul.msk.f32.gmra.mxu1 %vm641_vm1, %v1732_v41 }
 0x504   : > { %v1705_v42 = vpop.f32.mrf.mxu0 }
 0x505   : > { %v1706_v44 = vadd.f32 %v5292_v2, %v1705_v42  ;;  %v4687_v42 = vld [vmem:[%s4787_s29 + $0x30] sm:$0xff] }
 0x507   : > { %v1733_v47 = vmax.f32 %v1706_v44, 0.0 }
 0x509   : > { %4311 = vmatmul.msk.f32.gmra.mxu1 %vm641_vm1, %v1733_v47 }
 0x50c   : > { %v1708_v49 = vpop.f32.mrf.mxu0 }
 0x50d   : > { %v1709_v50 = vadd.f32 %v5292_v2, %v1708_v49 }
 0x50f   : > { %v1734_v51 = vmax.f32 %v1709_v50, 0.0  ;;  %v4688_v50 = vld [vmem:[%s4787_s29 + $0x38] sm:$0xff] }
 0x511   : > { %4312 = vmatmul.msk.f32.gmra.mxu1 %vm641_vm1, %v1734_v51 }
 0x514   : > { %v1711_v53 = vpop.f32.mrf.mxu0 }
 0x515   : > { %v1712_v54 = vadd.f32 %v5292_v2, %v1711_v53 }
 0x517   : > { %v1735_v55 = vmax.f32 %v1712_v54, 0.0 }
 0x519   : > { %4313 = vmatmul.msk.f32.gmra.mxu1 %vm641_vm1, %v1735_v55  ;;  %v4689_v55 = vld [vmem:[%s4787_s29 + $0x40] sm:$0xff] }
 0x51c   : > { %v1714_v57 = vpop.f32.mrf.mxu0 }
 0x51d   : > { %v1715_v58 = vadd.f32 %v5292_v2, %v1714_v57 }
 0x51f   : > { %v1736_v59 = vmax.f32 %v1715_v58, 0.0 }
 0x521   : > { %4314 = vmatmul.msk.f32.gmra.mxu1 %vm641_vm1, %v1736_v59 }
 0x524   : > { %v1717_v62 = vpop.f32.mrf.mxu0 }
 0x525   : > { %v1718_v63 = vadd.f32 %v5292_v2, %v1717_v62 }
 0x527   : > { %v1737_v0 = vmax.f32 %v1718_v63, 0.0  ;;  %v4335_v63 = vld [vmem:[%s6361_s4 + $0xc0] sm:$0xff] }
 0x528   : > { %2087 = vmatpush.msra.mxu3 %v4335_v63 }
 0x529   : > { %4315 = vmatmul.msk.f32.gmra.mxu1 %vm641_vm1, %v1737_v0 }
 0x52c   : > { %v1720_v39 = vpop.f32.mrf.mxu0 }
 0x52d   : > { %v1721_v3 = vadd.f32 %v5292_v2, %v1720_v39 }
 0x52f   : > { %v1738_v4 = vmax.f32 %v1721_v3, 0.0  ;;  %v4691_v3 = vld [vmem:[%s4787_s29 + $0x50] sm:$0xff] }
 0x531   : > { %4316 = vmatmul.msk.f32.gmra.mxu1 %vm641_vm1, %v1738_v4 }
 0x536   : > { %v1814_v7 = vpop.f32.mrf.mxu1 }
 0x537   : > { %v1815_v8 = vadd.f32 %v5332_v6, %v1814_v7 }
 0x539   : > { %v5336_v61 = vadd.f32 %v4681_v10, %v1815_v8  ;;  %v4692_v10 = vld [vmem:[%s4787_s29 + $0x58] sm:$0xff] }
 0x53b   : > { %4319 = vmatmul.msk.f32.vlgmr.msra.gmra.mxu2 %vm503_vm0, %v5336_v61 }
 0x53e   : > { %v1817_v2 = vpop.f32.mrf.mxu1 }
 0x53f   : > { %v1818_v11 = vadd.f32 %v5332_v6, %v1817_v2 }
 0x541   : > { %v5342_v14 = vadd.f32 %v4682_v12, %v1818_v11 }
 0x543   : > { %4320 = vmatmul.msk.f32.gmra.mxu2 %vm503_vm0, %v5342_v14 }
 0x546   : > { %v1820_v16 = vpop.f32.mrf.mxu1 }
 0x547   : > { %v1821_v17 = vadd.f32 %v5332_v6, %v1820_v16 }
 0x549   : > { %v5351_v20 = vadd.f32 %v4683_v19, %v1821_v17 }
 0x54b   : > { %4321 = vmatmul.msk.f32.gmra.mxu2 %vm503_vm0, %v5351_v20 }
 0x54e   : > { %v1823_v21 = vpop.f32.mrf.mxu1 }
 0x54f   : > { %v1824_v23 = vadd.f32 %v5332_v6, %v1823_v21  ;;  %v4694_v21 = vld [vmem:[%s4787_s29 + $0x68] sm:$0xff] }
 0x551   : > { %v5357_v25 = vadd.f32 %v4684_v24, %v1824_v23 }
 0x553   : > { %4322 = vmatmul.msk.f32.gmra.mxu2 %vm503_vm0, %v5357_v25 }
 0x556   : > { %v1826_v27 = vpop.f32.mrf.mxu1 }
 0x557   : > { %v1827_v28 = vadd.f32 %v5332_v6, %v1826_v27 }
 0x559   : > { %v5363_v31 = vadd.f32 %v4685_v29, %v1827_v28  ;;  %v4695_v28 = vld [vmem:[%s4787_s29 + $0x70] sm:$0xff] }
 0x55b   : > { %4323 = vmatmul.msk.f32.gmra.mxu2 %vm503_vm0, %v5363_v31 }
 0x55e   : > { %v1829_v32 = vpop.f32.mrf.mxu1 }
 0x55f   : > { %v1830_v33 = vadd.f32 %v5332_v6, %v1829_v32  ;;  %v4359_v32 = vld [vmem:[%s6361_s4 + $0xf8] sm:$0xff] }
 0x560   : > { %2223 = vmatpush.msrb.mxu0 %v4359_v32 }
 0x561   : > { %v5369_v36 = vadd.f32 %v4686_v35, %v1830_v33 }
 0x563   : > { %4324 = vmatmul.msk.f32.gmra.mxu2 %vm503_vm0, %v5369_v36 }
 0x566   : > { %v1832_v38 = vpop.f32.mrf.mxu1 }
 0x567   : > { %v1833_v41 = vadd.f32 %v5332_v6, %v1832_v38 }
 0x569   : > { %v5378_v44 = vadd.f32 %v4687_v42, %v1833_v41  ;;  %v5445_v41 = vld [vmem:[%s6360_s3 + $0x2] ss:$0 sm:$0xff] }
 0x56b   : > { %4325 = vmatmul.msk.f32.gmra.mxu2 %vm503_vm0, %v5378_v44 }
 0x56e   : > { %v1835_v47 = vpop.f32.mrf.mxu1 }
 0x56f   : > { %v1836_v49 = vadd.f32 %v5332_v6, %v1835_v47 }
 0x571   : > { %v5384_v51 = vadd.f32 %v4688_v50, %v1836_v49 }
 0x573   : > { %4326 = vmatmul.msk.f32.gmra.mxu2 %vm503_vm0, %v5384_v51 }
 0x576   : > { %v1838_v53 = vpop.f32.mrf.mxu1 }
 0x577   : > { %v1839_v54 = vadd.f32 %v5332_v6, %v1838_v53 }
 0x579   : > { %v5390_v57 = vadd.f32 %v4689_v55, %v1839_v54  ;;  %v4358_v54 = vld [vmem:[%s6361_s4 + $0xf0] sm:$0xff] }
 0x57a   : > { %2224 = vmatpush.msrb.mxu0 %v4358_v54 }
 0x57b   : > { %4327 = vmatmul.msk.f32.gmra.mxu2 %vm503_vm0, %v5390_v57 }
 0x57e   : > { %v1841_v58 = vpop.f32.mrf.mxu1 }
 0x57f   : > { %v1842_v59 = vadd.f32 %v5332_v6, %v1841_v58 }
 0x581   : > { %v5396_v62 = vadd.f32 %v4690_v46, %v1842_v59 }
 0x583   : > { %4328 = vmatmul.msk.f32.gmra.mxu2 %vm503_vm0, %v5396_v62 }
 0x586   : > { %v1844_v0 = vpop.f32.mrf.mxu1 }
 0x587   : > { %v1845_v39 = vadd.f32 %v5332_v6, %v1844_v0 }
 0x589   : > { %v5405_v4 = vadd.f32 %v4691_v3, %v1845_v39 }
 0x58b   : > { %4329 = vmatmul.msk.f32.gmra.mxu2 %vm503_vm0, %v5405_v4 }
 0x58e   : > { %v1847_v7 = vpop.f32.mrf.mxu1 }
 0x58f   : > { %v1848_v8 = vadd.f32 %v5332_v6, %v1847_v7 }
 0x591   : > { %v5411_v2 = vadd.f32 %v4692_v10, %v1848_v8 }
 0x593   : > { %4330 = vmatmul.msk.f32.gmra.mxu2 %vm503_vm0, %v5411_v2 }
 0x596   : > { %v1850_v11 = vpop.f32.mrf.mxu1 }
 0x597   : > { %v1851_v12 = vadd.f32 %v5332_v6, %v1850_v11 }
 0x599   : > { %v5417_v16 = vadd.f32 %v4693_v15, %v1851_v12  ;;  %v4357_v12 = vld [vmem:[%s6361_s4 + $0xe8] sm:$0xff] }
 0x59a   : > { %2225 = vmatpush.msrb.mxu0 %v4357_v12 }
 0x59b   : > { %4331 = vmatmul.msk.f32.gmra.mxu2 %vm503_vm0, %v5417_v16 }
 0x59e   : > { %v1853_v17 = vpop.f32.mrf.mxu1 }
 0x59f   : > { %v1854_v19 = vadd.f32 %v5332_v6, %v1853_v17 }
 0x5a1   : > { %v5423_v23 = vadd.f32 %v4694_v21, %v1854_v19 }
 0x5a3   : > { %4332 = vmatmul.msk.f32.gmra.mxu2 %vm503_vm0, %v5423_v23 }
 0x5a6   : > { %v1856_v24 = vpop.f32.mrf.mxu1 }
 0x5a7   : > { %v1857_v27 = vadd.f32 %v5332_v6, %v1856_v24 }
 0x5a9   : > { %v5429_v29 = vadd.f32 %v4695_v28, %v1857_v27 }
 0x5ab   : > { %4333 = vmatmul.msk.f32.gmra.mxu2 %vm503_vm0, %v5429_v29 }
 0x5ae   : > { %v1859_v33 = vpop.f32.mrf.mxu1 }
 0x5af   : > { %v1860_v35 = vadd.f32 %v5332_v6, %v1859_v33 }
 0x5b1   : > { %v5438_v38 = vadd.f32 %v4696_v37, %v1860_v35 }
 0x5b3   : > { %4334 = vmatmul.msk.f32.gmra.mxu2 %vm503_vm0, %v5438_v38 }
 0x5be   : > { %v1950_v42 = vpop.f32.mrf.mxu2 }
 0x5bf   : > { %v1951_v47 = vadd.f32 %v5445_v41, %v1950_v42 }
 0x5c1   : > { %v1998_v49 = vmax.f32 %v1951_v47, 0.0  ;;  %v4356_v47 = vld [vmem:[%s6361_s4 + $0xe0] sm:$0xff] }
 0x5c2   : > { %2226 = vmatpush.msrb.mxu0 %v4356_v47 }
 0x5c3   : > { %4340 = vmatmul.msk.f32.vlgmr.msra.gmra.mxu3 %vm641_vm1, %v1998_v49 }
 0x5c6   : > { %v1953_v50 = vpop.f32.mrf.mxu2 }
 0x5c7   : > { %v1954_v6 = vadd.f32 %v5445_v41, %v1953_v50 }
 0x5c9   : > { %v1999_v53 = vmax.f32 %v1954_v6, 0.0 }
 0x5cb   : > { %4341 = vmatmul.msk.f32.gmra.mxu3 %vm641_vm1, %v1999_v53 }
 0x5ce   : > { %v1956_v55 = vpop.f32.mrf.mxu2 }
 0x5cf   : > { %v1957_v58 = vadd.f32 %v5445_v41, %v1956_v55 }
 0x5d1   : > { %v2000_v59 = vmax.f32 %v1957_v58, 0.0 }
 0x5d3   : > { %4342 = vmatmul.msk.f32.gmra.mxu3 %vm641_vm1, %v2000_v59 }
 0x5d6   : > { %v1959_v46 = vpop.f32.mrf.mxu2 }
 0x5d7   : > { %v1960_v63 = vadd.f32 %v5445_v41, %v1959_v46 }
 0x5d9   : > { %v2001_v0 = vmax.f32 %v1960_v63, 0.0 }
 0x5db   : > { %4343 = vmatmul.msk.f32.gmra.mxu3 %vm641_vm1, %v2001_v0 }
 0x5de   : > { %v1962_v39 = vpop.f32.mrf.mxu2 }
 0x5df   : > { %v1963_v3 = vadd.f32 %v5445_v41, %v1962_v39 }
 0x5e1   : > { %v2002_v7 = vmax.f32 %v1963_v3, 0.0  ;;  %v4380_v3 = vld [vmem:[%s6361_s4 + $0x118] sm:$0xff] }
 0x5e2   : > { %2362 = vmatpush.msrb.mxu1 %v4380_v3 }
 0x5e3   : > { %4344 = vmatmul.msk.f32.gmra.mxu3 %vm641_vm1, %v2002_v7 }
 0x5e6   : > { %v1965_v8 = vpop.f32.mrf.mxu2 }
 0x5e7   : > { %v1966_v10 = vadd.f32 %v5445_v41, %v1965_v8 }
 0x5e9   : > { %v2003_v11 = vmax.f32 %v1966_v10, 0.0 }
 0x5eb   : > { %4345 = vmatmul.msk.f32.gmra.mxu3 %vm641_vm1, %v2003_v11 }
 0x5ee   : > { %v1968_v15 = vpop.f32.mrf.mxu2 }
 0x5ef   : > { %v1969_v17 = vadd.f32 %v5445_v41, %v1968_v15 }
 0x5f1   : > { %v2004_v19 = vmax.f32 %v1969_v17, 0.0  ;;  %v5494_v17 = vld [vmem:[%s6362_s5 + $0x6] ss:$0 sm:$0xff] }
 0x5f3   : > { %4346 = vmatmul.msk.f32.gmra.mxu3 %vm641_vm1, %v2004_v19 }
 0x5f6   : > { %v1971_v21 = vpop.f32.mrf.mxu2 }
 0x5f7   : > { %v1972_v24 = vadd.f32 %v5445_v41, %v1971_v21 }
 0x5f9   : > { %v2005_v27 = vmax.f32 %v1972_v24, 0.0 }
 0x5fb   : > { %4347 = vmatmul.msk.f32.gmra.mxu3 %vm641_vm1, %v2005_v27  ;;  %v4379_v27 = vld [vmem:[%s6361_s4 + $0x110] sm:$0xff] }
 0x5fc   : > { %2363 = vmatpush.msrb.mxu1 %v4379_v27 }
 0x5fe   : > { %v1974_v28 = vpop.f32.mrf.mxu2 }
 0x5ff   : > { %v1975_v32 = vadd.f32 %v5445_v41, %v1974_v28 }
 0x601   : > { %v2006_v33 = vmax.f32 %v1975_v32, 0.0 }
 0x603   : > { %4348 = vmatmul.msk.f32.gmra.mxu3 %vm641_vm1, %v2006_v33 }
 0x606   : > { %v1977_v35 = vpop.f32.mrf.mxu2 }
 0x607   : > { %v1978_v37 = vadd.f32 %v5445_v41, %v1977_v35 }
 0x609   : > { %v2007_v42 = vmax.f32 %v1978_v37, 0.0 }
 0x60b   : > { %4349 = vmatmul.msk.f32.gmra.mxu3 %vm641_vm1, %v2007_v42 }
 0x60e   : > { %v1980_v49 = vpop.f32.mrf.mxu2 }
 0x60f   : > { %v1981_v50 = vadd.f32 %v5445_v41, %v1980_v49 }
 0x611   : > { %v2008_v6 = vmax.f32 %v1981_v50, 0.0 }
 0x613   : > { %4350 = vmatmul.msk.f32.gmra.mxu3 %vm641_vm1, %v2008_v6 }
 0x616   : > { %v1983_v53 = vpop.f32.mrf.mxu2 }
 0x617   : > { %v1984_v54 = vadd.f32 %v5445_v41, %v1983_v53 }
 0x619   : > { %v2009_v55 = vmax.f32 %v1984_v54, 0.0  ;;  %v4378_v54 = vld [vmem:[%s6361_s4 + $0x108] sm:$0xff] }
 0x61a   : > { %2364 = vmatpush.msrb.mxu1 %v4378_v54 }
 0x61b   : > { %4351 = vmatmul.msk.f32.gmra.mxu3 %vm641_vm1, %v2009_v55 }
 0x61e   : > { %v1986_v58 = vpop.f32.mrf.mxu2 }
 0x61f   : > { %v1987_v59 = vadd.f32 %v5445_v41, %v1986_v58 }
 0x621   : > { %v2010_v46 = vmax.f32 %v1987_v59, 0.0 }
 0x623   : > { %4352 = vmatmul.msk.f32.gmra.mxu3 %vm641_vm1, %v2010_v46 }
 0x626   : > { %v1989_v63 = vpop.f32.mrf.mxu2 }
 0x627   : > { %v1990_v0 = vadd.f32 %v5445_v41, %v1989_v63 }
 0x629   : > { %v2011_v39 = vmax.f32 %v1990_v0, 0.0 }
 0x62b   : > { %4353 = vmatmul.msk.f32.gmra.mxu3 %vm641_vm1, %v2011_v39 }
 0x62e   : > { %v1992_v7 = vpop.f32.mrf.mxu2 }
 0x62f   : > { %v1993_v8 = vadd.f32 %v5445_v41, %v1992_v7 }
 0x631   : > { %v2012_v10 = vmax.f32 %v1993_v8, 0.0 }
 0x633   : > { %4354 = vmatmul.msk.f32.gmra.mxu3 %vm641_vm1, %v2012_v10 }
 0x636   : > { %v1995_v11 = vpop.f32.mrf.mxu2 }
 0x637   : > { %v1996_v12 = vadd.f32 %v5445_v41, %v1995_v11 }
 0x639   : > { %v2013_v15 = vmax.f32 %v1996_v12, 0.0  ;;  %v4377_v12 = vld [vmem:[%s6361_s4 + $0x100] sm:$0xff] }
 0x63a   : > { %2365 = vmatpush.msrb.mxu1 %v4377_v12 }
 0x63b   : > { %4355 = vmatmul.msk.f32.gmra.mxu3 %vm641_vm1, %v2013_v15 }
 0x646   : > { %v2089_v19 = vpop.f32.mrf.mxu3 }
 0x647   : > { %v2090_v21 = vadd.f32 %v5494_v17, %v2089_v19 }
 0x649   : > { %v2137_v24 = vmax.f32 %v2090_v21, 0.0 }
 0x64b   : > { %4361 = vmatmul.msk.f32.vlgmr.msrb.gmra.mxu0 %vm641_vm1, %v2137_v24 }
 0x64e   : > { %v2092_v41 = vpop.f32.mrf.mxu3 }
 0x64f   : > { %v2093_v28 = vadd.f32 %v5494_v17, %v2092_v41 }
 0x651   : > { %v2138_v32 = vmax.f32 %v2093_v28, 0.0 }
 0x653   : > { %4362 = vmatmul.msk.f32.gmra.mxu0 %vm641_vm1, %v2138_v32 }
 0x656   : > { %v2095_v33 = vpop.f32.mrf.mxu3 }
 0x657   : > { %v2096_v35 = vadd.f32 %v5494_v17, %v2095_v33 }
 0x659   : > { %v2139_v37 = vmax.f32 %v2096_v35, 0.0 }
 0x65b   : > { %4363 = vmatmul.msk.f32.gmra.mxu0 %vm641_vm1, %v2139_v37 }
 0x65e   : > { %v2098_v42 = vpop.f32.mrf.mxu3 }
 0x65f   : > { %v2099_v47 = vadd.f32 %v5494_v17, %v2098_v42 }
 0x661   : > { %v2140_v49 = vmax.f32 %v2099_v47, 0.0  ;;  %v4401_v47 = vld [vmem:[%s6363_s6 + $0x58] sm:$0xff] }
 0x662   : > { %2501 = vmatpush.msrb.mxu2 %v4401_v47 }
 0x663   : > { %4364 = vmatmul.msk.f32.gmra.mxu0 %vm641_vm1, %v2140_v49 }
 0x666   : > { %v2101_v50 = vpop.f32.mrf.mxu3 }
 0x667   : > { %v2102_v6 = vadd.f32 %v5494_v17, %v2101_v50 }
 0x669   : > { %v2141_v53 = vmax.f32 %v2102_v6, 0.0 }
 0x66b   : > { %4365 = vmatmul.msk.f32.gmra.mxu0 %vm641_vm1, %v2141_v53 }
 0x66e   : > { %v2104_v55 = vpop.f32.mrf.mxu3 }
 0x66f   : > { %v2105_v58 = vadd.f32 %v5494_v17, %v2104_v55 }
 0x671   : > { %v2142_v59 = vmax.f32 %v2105_v58, 0.0 }
 0x673   : > { %4366 = vmatmul.msk.f32.gmra.mxu0 %vm641_vm1, %v2142_v59 }
 0x676   : > { %v2107_v46 = vpop.f32.mrf.mxu3 }
 0x677   : > { %v2108_v63 = vadd.f32 %v5494_v17, %v2107_v46 }
 0x679   : > { %v2143_v0 = vmax.f32 %v2108_v63, 0.0  ;;  %v5543_v63 = vld [vmem:[%s6362_s5 + $0x7] ss:$0 sm:$0xff] }
 0x67b   : > { %4367 = vmatmul.msk.f32.gmra.mxu0 %vm641_vm1, %v2143_v0 }
 0x67e   : > { %v2110_v39 = vpop.f32.mrf.mxu3 }
 0x67f   : > { %v2111_v3 = vadd.f32 %v5494_v17, %v2110_v39 }
 0x681   : > { %v2144_v7 = vmax.f32 %v2111_v3, 0.0 }
 0x683   : > { %4368 = vmatmul.msk.f32.gmra.mxu0 %vm641_vm1, %v2144_v7  ;;  %v4400_v7 = vld [vmem:[%s6363_s6 + $0x50] sm:$0xff] }
 0x684   : > { %2502 = vmatpush.msrb.mxu2 %v4400_v7 }
 0x686   : > { %v2113_v8 = vpop.f32.mrf.mxu3 }
 0x687   : > { %v2114_v10 = vadd.f32 %v5494_v17, %v2113_v8 }
 0x689   : > { %v2145_v11 = vmax.f32 %v2114_v10, 0.0 }
 0x68b   : > { %4369 = vmatmul.msk.f32.gmra.mxu0 %vm641_vm1, %v2145_v11 }
 0x68e   : > { %v2116_v15 = vpop.f32.mrf.mxu3 }
 0x68f   : > { %v2117_v19 = vadd.f32 %v5494_v17, %v2116_v15 }
 0x691   : > { %v2146_v21 = vmax.f32 %v2117_v19, 0.0 }
 0x693   : > { %4370 = vmatmul.msk.f32.gmra.mxu0 %vm641_vm1, %v2146_v21 }
 0x696   : > { %v2119_v24 = vpop.f32.mrf.mxu3 }
 0x697   : > { %v2120_v27 = vadd.f32 %v5494_v17, %v2119_v24 }
 0x699   : > { %v2147_v41 = vmax.f32 %v2120_v27, 0.0 }
 0x69b   : > { %4371 = vmatmul.msk.f32.gmra.mxu0 %vm641_vm1, %v2147_v41 }
 0x69e   : > { %v2122_v28 = vpop.f32.mrf.mxu3 }
 0x69f   : > { %v2123_v32 = vadd.f32 %v5494_v17, %v2122_v28 }
 0x6a1   : > { %v2148_v33 = vmax.f32 %v2123_v32, 0.0  ;;  %v4399_v32 = vld [vmem:[%s6363_s6 + $0x48] sm:$0xff] }
 0x6a2   : > { %2503 = vmatpush.msrb.mxu2 %v4399_v32 }
 0x6a3   : > { %4372 = vmatmul.msk.f32.gmra.mxu0 %vm641_vm1, %v2148_v33 }
 0x6a6   : > { %v2125_v35 = vpop.f32.mrf.mxu3 }
 0x6a7   : > { %v2126_v37 = vadd.f32 %v5494_v17, %v2125_v35 }
 0x6a9   : > { %v2149_v42 = vmax.f32 %v2126_v37, 0.0 }
 0x6ab   : > { %4373 = vmatmul.msk.f32.gmra.mxu0 %vm641_vm1, %v2149_v42 }
 0x6ae   : > { %v2128_v49 = vpop.f32.mrf.mxu3 }
 0x6af   : > { %v2129_v50 = vadd.f32 %v5494_v17, %v2128_v49 }
 0x6b1   : > { %v2150_v6 = vmax.f32 %v2129_v50, 0.0 }
 0x6b3   : > { %4374 = vmatmul.msk.f32.gmra.mxu0 %vm641_vm1, %v2150_v6 }
 0x6b6   : > { %v2131_v53 = vpop.f32.mrf.mxu3 }
 0x6b7   : > { %v2132_v54 = vadd.f32 %v5494_v17, %v2131_v53 }
 0x6b9   : > { %v2151_v55 = vmax.f32 %v2132_v54, 0.0 }
 0x6bb   : > { %4375 = vmatmul.msk.f32.gmra.mxu0 %vm641_vm1, %v2151_v55 }
 0x6be   : > { %v2134_v58 = vpop.f32.mrf.mxu3 }
 0x6bf   : > { %v2135_v59 = vadd.f32 %v5494_v17, %v2134_v58 }
 0x6c1   : > { %v2152_v46 = vmax.f32 %v2135_v59, 0.0  ;;  %v4398_v59 = vld [vmem:[%s6363_s6 + $0x40] sm:$0xff] }
 0x6c2   : > { %2504 = vmatpush.msrb.mxu2 %v4398_v59 }
 0x6c3   : > { %4376 = vmatmul.msk.f32.gmra.mxu0 %vm641_vm1, %v2152_v46 }
 0x6c8   : > { %v2228_v0 = vpop.f32.mrf.mxu0 }
 0x6c9   : > { %v2229_v39 = vadd.f32 %v5543_v63, %v2228_v0 }
 0x6cb   : > { %v2276_v3 = vmax.f32 %v2229_v39, 0.0 }
 0x6cd   : > { %4382 = vmatmul.msk.f32.vlgmr.msrb.gmra.mxu1 %vm641_vm1, %v2276_v3 }
 0x6d0   : > { %v2231_v17 = vpop.f32.mrf.mxu0 }
 0x6d1   : > { %v2232_v8 = vadd.f32 %v5543_v63, %v2231_v17 }
 0x6d3   : > { %v2277_v10 = vmax.f32 %v2232_v8, 0.0 }
 0x6d5   : > { %4383 = vmatmul.msk.f32.gmra.mxu1 %vm641_vm1, %v2277_v10 }
 0x6d8   : > { %v2234_v11 = vpop.f32.mrf.mxu0 }
 0x6d9   : > { %v2235_v12 = vadd.f32 %v5543_v63, %v2234_v11 }
 0x6db   : > { %v2278_v15 = vmax.f32 %v2235_v12, 0.0 }
 0x6dd   : > { %4384 = vmatmul.msk.f32.gmra.mxu1 %vm641_vm1, %v2278_v15 }
 0x6e0   : > { %v2237_v19 = vpop.f32.mrf.mxu0 }
 0x6e1   : > { %v2238_v21 = vadd.f32 %v5543_v63, %v2237_v19 }
 0x6e3   : > { %v2279_v24 = vmax.f32 %v2238_v21, 0.0 }
 0x6e5   : > { %4385 = vmatmul.msk.f32.gmra.mxu1 %vm641_vm1, %v2279_v24 }
 0x6e8   : > { %v2240_v27 = vpop.f32.mrf.mxu0 }
 0x6e9   : > { %v2241_v41 = vadd.f32 %v5543_v63, %v2240_v27 }
 0x6eb   : > { %v2280_v28 = vmax.f32 %v2241_v41, 0.0  ;;  %v4419_v41 = vld [vmem:[%s6359_s2 + $0x18] sm:$0xff] }
 0x6ec   : > { %2640 = vmatpush.msrb.mxu3 %v4419_v41 }
 0x6ed   : > { %4386 = vmatmul.msk.f32.gmra.mxu1 %vm641_vm1, %v2280_v28 }
 0x6f0   : > { %v2243_v33 = vpop.f32.mrf.mxu0 }
 0x6f1   : > { %v2244_v35 = vadd.f32 %v5543_v63, %v2243_v33 }
 0x6f3   : > { %v2281_v37 = vmax.f32 %v2244_v35, 0.0 }
 0x6f5   : > { %4387 = vmatmul.msk.f32.gmra.mxu1 %vm641_vm1, %v2281_v37 }
 0x6f8   : > { %v2246_v42 = vpop.f32.mrf.mxu0 }
 0x6f9   : > { %v2247_v47 = vadd.f32 %v5543_v63, %v2246_v42 }
 0x6fb   : > { %v2282_v49 = vmax.f32 %v2247_v47, 0.0  ;;  %v5592_v47 = vld [vmem:[%s6362_s5 + $0x8] ss:$0 sm:$0xff] }
 0x6fd   : > { %4388 = vmatmul.msk.f32.gmra.mxu1 %vm641_vm1, %v2282_v49 }
 0x700   : > { %v2249_v50 = vpop.f32.mrf.mxu0 }
 0x701   : > { %v2250_v6 = vadd.f32 %v5543_v63, %v2249_v50 }
 0x703   : > { %v2283_v53 = vmax.f32 %v2250_v6, 0.0 }
 0x705   : > { %4389 = vmatmul.msk.f32.gmra.mxu1 %vm641_vm1, %v2283_v53 }
 0x708   : > { %v2252_v54 = vpop.f32.mrf.mxu0 }
 0x709   : > { %v2253_v55 = vadd.f32 %v5543_v63, %v2252_v54 }
 0x70b   : > { %v2284_v58 = vmax.f32 %v2253_v55, 0.0 }
 0x70d   : > { %4390 = vmatmul.msk.f32.gmra.mxu1 %vm641_vm1, %v2284_v58 }
 0x710   : > { %v2255_v46 = vpop.f32.mrf.mxu0 }
 0x711   : > { %v2256_v0 = vadd.f32 %v5543_v63, %v2255_v46 }
 0x713   : > { %v2285_v39 = vmax.f32 %v2256_v0, 0.0 }
 0x715   : > { %4391 = vmatmul.msk.f32.gmra.mxu1 %vm641_vm1, %v2285_v39 }
 0x718   : > { %v2258_v3 = vpop.f32.mrf.mxu0 }
 0x719   : > { %v2259_v7 = vadd.f32 %v5543_v63, %v2258_v3 }
 0x71b   : > { %v2286_v17 = vmax.f32 %v2259_v7, 0.0 }
 0x71d   : > { %4392 = vmatmul.msk.f32.gmra.mxu1 %vm641_vm1, %v2286_v17 }
 0x720   : > { %v2261_v8 = vpop.f32.mrf.mxu0 }
 0x721   : > { %v2262_v10 = vadd.f32 %v5543_v63, %v2261_v8 }
 0x723   : > { %v2287_v11 = vmax.f32 %v2262_v10, 0.0 }
 0x725   : > { %4393 = vmatmul.msk.f32.gmra.mxu1 %vm641_vm1, %v2287_v11 }
 0x728   : > { %v2264_v12 = vpop.f32.mrf.mxu0 }
 0x729   : > { %v2265_v15 = vadd.f32 %v5543_v63, %v2264_v12 }
 0x72b   : > { %v2288_v19 = vmax.f32 %v2265_v15, 0.0 }
 0x72d   : > { %4394 = vmatmul.msk.f32.gmra.mxu1 %vm641_vm1, %v2288_v19 }
 0x730   : > { %v2267_v21 = vpop.f32.mrf.mxu0 }
 0x731   : > { %v2268_v24 = vadd.f32 %v5543_v63, %v2267_v21 }
 0x733   : > { %v2289_v27 = vmax.f32 %v2268_v24, 0.0 }
 0x735   : > { %4395 = vmatmul.msk.f32.gmra.mxu1 %vm641_vm1, %v2289_v27 }
 0x738   : > { %v2270_v28 = vpop.f32.mrf.mxu0 }
 0x739   : > { %v2271_v32 = vadd.f32 %v5543_v63, %v2270_v28 }
 0x73b   : > { %v2290_v33 = vmax.f32 %v2271_v32, 0.0 }
 0x73d   : > { %4396 = vmatmul.msk.f32.gmra.mxu1 %vm641_vm1, %v2290_v33 }
 0x740   : > { %v2273_v35 = vpop.f32.mrf.mxu0 }
 0x741   : > { %v2274_v37 = vadd.f32 %v5543_v63, %v2273_v35 }
 0x743   : > { %v2291_v42 = vmax.f32 %v2274_v37, 0.0 }
 0x745   : > { %4397 = vmatmul.msk.f32.gmra.mxu1 %vm641_vm1, %v2291_v42 }
 0x74a   : > { %v2367_v49 = vpop.f32.mrf.mxu1 }
 0x74b   : > { %v2368_v50 = vadd.f32 %v5592_v47, %v2367_v49 }
 0x74d   : > { %v2415_v6 = vmax.f32 %v2368_v50, 0.0 }
 0x74f   : > { %4403 = vmatmul.msk.f32.vlgmr.msrb.gmra.mxu2 %vm641_vm1, %v2415_v6 }
 0x752   : > { %v2370_v53 = vpop.f32.mrf.mxu1 }
 0x753   : > { %v2371_v54 = vadd.f32 %v5592_v47, %v2370_v53 }
 0x755   : > { %v2416_v55 = vmax.f32 %v2371_v54, 0.0 }
 0x757   : > { %4404 = vmatmul.msk.f32.gmra.mxu2 %vm641_vm1, %v2416_v55 }
 0x75a   : > { %v2373_v63 = vpop.f32.mrf.mxu1 }
 0x75b   : > { %v2374_v58 = vadd.f32 %v5592_v47, %v2373_v63 }
 0x75d   : > { %v2417_v59 = vmax.f32 %v2374_v58, 0.0 }
 0x75f   : > { %4405 = vmatmul.msk.f32.gmra.mxu2 %vm641_vm1, %v2417_v59 }
 0x762   : > { %v2376_v46 = vpop.f32.mrf.mxu1 }
 0x763   : > { %v2377_v0 = vadd.f32 %v5592_v47, %v2376_v46 }
 0x765   : > { %v2418_v39 = vmax.f32 %v2377_v0, 0.0 }
 0x767   : > { %4406 = vmatmul.msk.f32.gmra.mxu2 %vm641_vm1, %v2418_v39 }
 0x76a   : > { %v2379_v3 = vpop.f32.mrf.mxu1 }
 0x76b   : > { %v2380_v7 = vadd.f32 %v5592_v47, %v2379_v3 }
 0x76d   : > { %v2419_v17 = vmax.f32 %v2380_v7, 0.0 }
 0x76f   : > { %4407 = vmatmul.msk.f32.gmra.mxu2 %vm641_vm1, %v2419_v17  ;;  %v4440_v17 = vld [vmem:[%s6361_s4 + $0x138] sm:$0xff] }
 0x770   : > { %2776 = vmatpush.msra.mxu0 %v4440_v17 }
 0x772   : > { %v2382_v8 = vpop.f32.mrf.mxu1 }
 0x773   : > { %v2383_v10 = vadd.f32 %v5592_v47, %v2382_v8 }
 0x775   : > { %v2420_v11 = vmax.f32 %v2383_v10, 0.0 }
 0x777   : > { %4408 = vmatmul.msk.f32.gmra.mxu2 %vm641_vm1, %v2420_v11 }
 0x77a   : > { %v2385_v12 = vpop.f32.mrf.mxu1 }
 0x77b   : > { %v2386_v15 = vadd.f32 %v5592_v47, %v2385_v12  ;;  %v5632_v12 = vld [vmem:[%s6364_s7 + $0x2] ss:$0 sm:$0xff] }
 0x77d   : > { %v2421_v19 = vmax.f32 %v2386_v15, 0.0 }
 0x77f   : > { %4409 = vmatmul.msk.f32.gmra.mxu2 %vm641_vm1, %v2421_v19 }
 0x782   : > { %v2388_v21 = vpop.f32.mrf.mxu1 }
 0x783   : > { %v2389_v24 = vadd.f32 %v5592_v47, %v2388_v21  ;;  %v5638_v21 = vld [vmem:[%s6366_s9] ss:$0 sm:$0xff] }
 0x785   : > { %v2422_v27 = vmax.f32 %v2389_v24, 0.0 }
 0x787   : > { %4410 = vmatmul.msk.f32.gmra.mxu2 %vm641_vm1, %v2422_v27 }
 0x78a   : > { %v2391_v41 = vpop.f32.mrf.mxu1 }
 0x78b   : > { %v2392_v28 = vadd.f32 %v5592_v47, %v2391_v41 }
 0x78d   : > { %v2423_v32 = vmax.f32 %v2392_v28, 0.0 }
 0x78f   : > { %4411 = vmatmul.msk.f32.gmra.mxu2 %vm641_vm1, %v2423_v32 }
 0x792   : > { %v2394_v33 = vpop.f32.mrf.mxu1 }
 0x793   : > { %v2395_v35 = vadd.f32 %v5592_v47, %v2394_v33 }
 0x795   : > { %v2424_v37 = vmax.f32 %v2395_v35, 0.0 }
 0x797   : > { %4412 = vmatmul.msk.f32.gmra.mxu2 %vm641_vm1, %v2424_v37  ;;  %v4439_v37 = vld [vmem:[%s6361_s4 + $0x130] sm:$0xff] }
 0x798   : > { %2777 = vmatpush.msra.mxu0 %v4439_v37 }
 0x79a   : > { %v2397_v42 = vpop.f32.mrf.mxu1 }
 0x79b   : > { %v2398_v49 = vadd.f32 %v5592_v47, %v2397_v42 }
 0x79d   : > { %v2425_v50 = vmax.f32 %v2398_v49, 0.0 }
 0x79f   : > { %4413 = vmatmul.msk.f32.gmra.mxu2 %vm641_vm1, %v2425_v50 }
 0x7a2   : > { %v2400_v6 = vpop.f32.mrf.mxu1 }
 0x7a3   : > { %v2401_v53 = vadd.f32 %v5592_v47, %v2400_v6 }
 0x7a5   : > { %v2426_v54 = vmax.f32 %v2401_v53, 0.0 }
 0x7a7   : > { %4414 = vmatmul.msk.f32.gmra.mxu2 %vm641_vm1, %v2426_v54 }
 0x7aa   : > { %v2403_v55 = vpop.f32.mrf.mxu1 }
 0x7ab   : > { %v2404_v63 = vadd.f32 %v5592_v47, %v2403_v55 }
 0x7ad   : > { %v2427_v58 = vmax.f32 %v2404_v63, 0.0 }
 0x7af   : > { %4415 = vmatmul.msk.f32.gmra.mxu2 %vm641_vm1, %v2427_v58 }
 0x7b2   : > { %v2406_v59 = vpop.f32.mrf.mxu1 }
 0x7b3   : > { %v2407_v46 = vadd.f32 %v5592_v47, %v2406_v59 }
 0x7b5   : > { %v2428_v0 = vmax.f32 %v2407_v46, 0.0 }
 0x7b7   : > { %4416 = vmatmul.msk.f32.gmra.mxu2 %vm641_vm1, %v2428_v0 }
 0x7ba   : > { %v2409_v39 = vpop.f32.mrf.mxu1 }
 0x7bb   : > { %v2410_v3 = vadd.f32 %v5592_v47, %v2409_v39 }
 0x7bd   : > { %v2429_v7 = vmax.f32 %v2410_v3, 0.0 }
 0x7bf   : > { %4417 = vmatmul.msk.f32.gmra.mxu2 %vm641_vm1, %v2429_v7 }
 0x7c2   : > { %v2412_v8 = vpop.f32.mrf.mxu1 }
 0x7c3   : > { %v2413_v10 = vadd.f32 %v5592_v47, %v2412_v8 }
 0x7c5   : > { %v2430_v11 = vmax.f32 %v2413_v10, 0.0 }
 0x7c7   : > { %4418 = vmatmul.msk.f32.gmra.mxu2 %vm641_vm1, %v2430_v11 }
 0x7d2   : > { %v2506_v15 = vpop.f32.mrf.mxu2 }
 0x7d3   : > { %v2507_v19 = vadd.f32 %v5632_v12, %v2506_v15 }
 0x7d5   : > { %v2554_v24 = vadd.f32 %v2507_v19, %v5036_v43 }
 0x7d7   : > { %v3286_v47 = vmul.f32 %v5638_v21, %v2554_v24  ;;  %4421 = vmatmul.msk.f32.vlgmr.msrb.gmra.mxu3 %vm503_vm0, %v2554_v24 }
 0x7d9   : > { %3942 = vst.msk [vmem:[%s5645_s15] sm:$0xff] %vm503_vm0, %v3286_v47  ;;  %v3606_v27 = vand.u32 2147483647, %v3286_v47 }
 0x7da   : > { %v2509_v41 = vpop.f32.mrf.mxu2 }
 0x7db   : > { %v2510_v28 = vadd.f32 %v5632_v12, %v2509_v41  ;;  %v3622_v32 = vsub.f32 0.0, %v3606_v27 }
 0x7dd   : > { %v2555_v43 = vadd.f32 %v2510_v28, %v5045_v48  ;;  %v3638_v33 = vmul.f32 1.442695, %v3622_v32 }
 0x7df   : > { %v5654_v35 = vmul.f32 %v5638_v21, %v2555_v43  ;;  %4422 = vmatmul.msk.f32.gmra.mxu3 %vm503_vm0, %v2555_v43  ;;  %4553 = vpow2.f32 %v3638_v33 }
 0x7e1   : > { %3943 = vst.msk [vmem:[%s5645_s15 + $0x8] sm:$0xff] %vm503_vm0, %v5654_v35  ;;  %v3607_v42 = vand.u32 2147483647, %v5654_v35 }
 0x7e2   : > { %v2512_v49 = vpop.f32.mrf.mxu2 }
 0x7e3   : > { %v2513_v48 = vadd.f32 %v5632_v12, %v2512_v49  ;;  %v3623_v50 = vsub.f32 0.0, %v3607_v42 }
 0x7e5   : > { %v4554_v6 = vpop.eup %4553  ;;  %v2556_v53 = vadd.f32 %v2513_v48, %v5051_v52  ;;  %v3640_v54 = vmul.f32 1.442695, %v3623_v50 }
 0x7e6   : > { %v3670_v55 = vadd.f32 1.0, %v4554_v6  ;;  %v3673_v63 = vmul.f32 -0.5, %v4554_v6  ;;  %v3676_v3 = vand.u32 2147483647, %v4554_v6 }
 0x7e7   : > { %v5669_v58 = vmul.f32 %v5638_v21, %v2556_v53  ;;  %4423 = vmatmul.msk.f32.gmra.mxu3 %vm503_vm0, %v2556_v53  ;;  %4555 = vpow2.f32 %v3640_v54 }
 0x7e8   : > { %4557 = vlog2.f32 %v3670_v55  ;;  %v3674_v0 = vadd.f32 1.0, %v3673_v63  ;;  %vm3677_vm2 = vcmp.lt.f32.partialorder %v3676_v3, 0.0004427343 }
 0x7e9   : > { %3944 = vst.msk [vmem:[%s5645_s15 + $0x10] sm:$0xff] %vm503_vm0, %v5669_v58  ;;  %v3608_v59 = vand.u32 2147483647, %v5669_v58 }
 0x7ea   : > { %v2515_v46 = vpop.f32.mrf.mxu2  ;;  %v3675_v11 = vmul.f32 %v4554_v6, %v3674_v0 }
 0x7eb   : > { %v2516_v39 = vadd.f32 %v5632_v12, %v2515_v46  ;;  %v3624_v52 = vsub.f32 0.0, %v3608_v59 }
 0x7ed   : > { %v4556_v7 = vpop.eup %4555  ;;  %v2557_v17 = vadd.f32 %v2516_v39, %v5057_v56  ;;  %v3642_v8 = vmul.f32 1.442695, %v3624_v52 }
 0x7ee   : > { %v4558_v10 = vpop.eup %4557  ;;  %v3679_v15 = vadd.f32 1.0, %v4556_v7  ;;  %v3682_v47 = vmul.f32 -0.5, %v4556_v7  ;;  %v3685_v48 = vand.u32 2147483647, %v4556_v7 }
 0x7ef   : > { %v5681_v19 = vmul.f32 %v5638_v21, %v2557_v17  ;;  %4424 = vmatmul.msk.f32.gmra.mxu3 %vm503_vm0, %v2557_v17  ;;  %v3672_v24 = vmul.f32 0.6931472, %v4558_v10  ;;  %4559 = vpow2.f32 %v3642_v8 }
 0x7f0   : > { %4561 = vlog2.f32 %v3679_v15  ;;  %v3683_v33 = vadd.f32 1.0, %v3682_v47  ;;  %vm3686_vm3 = vcmp.lt.f32.partialorder %v3685_v48, 0.0004427343 }
 0x7f1   : > { %3945 = vst.msk [vmem:[%s5645_s15 + $0x18] sm:$0xff] %vm503_vm0, %v5681_v19  ;;  %v3678_v41 = vsel %vm3677_vm2, %v3675_v11, %v3672_v24  ;;  %v3609_v56 = vand.u32 2147483647, %v5681_v19 }
 0x7f2   : > { %v2518_v28 = vpop.f32.mrf.mxu2  ;;  %v3814_v32 = vmul.f32 2.0, %v3678_v41  ;;  %v3684_v52 = vmul.f32 %v4556_v7, %v3683_v33 }
 0x7f3   : > { %v2519_v43 = vadd.f32 %v5632_v12, %v2518_v28  ;;  %v3625_v37 = vsub.f32 0.0, %v3609_v56 }
 0x7f4   : > { %v3830_v49 = vadd.f32 %v3814_v32, %v3606_v27 }
 0x7f5   : > { %v4560_v50 = vpop.eup %4559  ;;  %v2558_v6 = vadd.f32 %v2519_v43, %v5063_v60  ;;  %v3644_v53 = vmul.f32 1.442695, %v3625_v37 }
 0x7f6   : > { %v4562_v54 = vpop.eup %4561  ;;  %v3846_v55 = vsub.f32 0.0, %v3830_v49  ;;  %v3688_v63 = vadd.f32 1.0, %v4560_v50  ;;  %v3691_v46 = vmul.f32 -0.5, %v4560_v50  ;;  %v3694_v24 = vand.u32 2147483647, %v4560_v50 }
 0x7f7   : > { %v5693_v0 = vmul.f32 %v5638_v21, %v2558_v6  ;;  %4425 = vmatmul.msk.f32.gmra.mxu3 %vm503_vm0, %v2558_v6  ;;  %v3681_v39 = vmul.f32 0.6931472, %v4562_v54  ;;  %4563 = vpow2.f32 %v3644_v53 }
 0x7f8   : > { %v3862_v27 = vsel %vm503_vm0, %v3846_v55, 0.0  ;;  %4565 = vlog2.f32 %v3688_v63  ;;  %v3692_v10 = vadd.f32 1.0, %v3691_v46  ;;  %vm3695_vm4 = vcmp.lt.f32.partialorder %v3694_v24, 0.0004427343 }
 0x7f9   : > { %3946 = vst.msk [vmem:[%s5645_s15 + $0x20] sm:$0xff] %vm503_vm0, %v5693_v0  ;;  %3863 = vadd.xlane.f32.xlu1 %v3862_v27  ;;  %v3687_v60 = vsel %vm3686_vm3, %v3684_v52, %v3681_v39  ;;  %v3610_v3 = vand.u32 2147483647, %v5693_v0 }
 0x7fa   : > { %v2521_v17 = vpop.f32.mrf.mxu2  ;;  %v3815_v8 = vmul.f32 2.0, %v3687_v60  ;;  %v3693_v33 = vmul.f32 %v4560_v50, %v3692_v10 }
 0x7fb   : > { %v2522_v11 = vadd.f32 %v5632_v12, %v2521_v17  ;;  %v3626_v7 = vsub.f32 0.0, %v3610_v3 }
 0x7fc   : > { %v3831_v15 = vadd.f32 %v3815_v8, %v3607_v42  ;;  %v4438_v42 = vld [vmem:[%s6361_s4 + $0x128] sm:$0xff] }
 0x7fd   : > { %v4564_v47 = vpop.eup %4563  ;;  %v2559_v41 = vadd.f32 %v2522_v11, %v5072_v1  ;;  %v3646_v28 = vmul.f32 1.442695, %v3626_v7  ;;  %2778 = vmatpush.msra.mxu0 %v4438_v42 }
 0x7fe   : > { %v4566_v32 = vpop.eup %4565  ;;  %v3847_v43 = vsub.f32 0.0, %v3831_v15  ;;  %v3697_v37 = vadd.f32 1.0, %v4564_v47  ;;  %v3700_v6 = vmul.f32 -0.5, %v4564_v47  ;;  %v3703_v52 = vand.u32 2147483647, %v4564_v47 }
 0x7ff   : > { %v5708_v49 = vmul.f32 %v5638_v21, %v2559_v41  ;;  %4426 = vmatmul.msk.f32.gmra.mxu3 %vm503_vm0, %v2559_v41  ;;  %v3690_v48 = vmul.f32 0.6931472, %v4566_v32  ;;  %4567 = vpow2.f32 %v3646_v28 }
 0x800   : > { %v3865_v35 = vsel %vm503_vm0, %v3847_v43, 0.0  ;;  %4569 = vlog2.f32 %v3697_v37  ;;  %v3701_v63 = vadd.f32 1.0, %v3700_v6  ;;  %vm3704_vm5 = vcmp.lt.f32.partialorder %v3703_v52, 0.0004427343 }
 0x801   : > { %3947 = vst.msk [vmem:[%s5645_s15 + $0x28] sm:$0xff] %vm503_vm0, %v5708_v49  ;;  %3866 = vadd.xlane.f32.xlu2 %v3865_v35  ;;  %v3696_v1 = vsel %vm3695_vm4, %v3693_v33, %v3690_v48  ;;  %v3611_v50 = vand.u32 2147483647, %v5708_v49 }
 0x802   : > { %v2524_v53 = vpop.f32.mrf.mxu2  ;;  %v3816_v54 = vmul.f32 2.0, %v3696_v1  ;;  %v3702_v41 = vmul.f32 %v4564_v47, %v3701_v63 }
 0x803   : > { %v2525_v55 = vadd.f32 %v5632_v12, %v2524_v53  ;;  %v3627_v46 = vsub.f32 0.0, %v3611_v50 }
 0x804   : > { %v3832_v39 = vadd.f32 %v3816_v54, %v3608_v59 }
 0x805   : > { %v4568_v27 = vpop.eup %4567  ;;  %v2560_v60 = vadd.f32 %v2525_v55, %v5078_v5  ;;  %v3648_v17 = vmul.f32 1.442695, %v3627_v46 }
 0x806   : > { %v4570_v8 = vpop.eup %4569  ;;  %v3848_v10 = vsub.f32 0.0, %v3832_v39  ;;  %v3706_v11 = vadd.f32 1.0, %v4568_v27  ;;  %v3709_v7 = vmul.f32 -0.5, %v4568_v27  ;;  %v3712_v48 = vand.u32 2147483647, %v4568_v27 }
 0x807   : > { %v5726_v15 = vmul.f32 %v5638_v21, %v2560_v60  ;;  %4427 = vmatmul.msk.f32.gmra.mxu3 %vm503_vm0, %v2560_v60  ;;  %v3699_v24 = vmul.f32 0.6931472, %v4570_v8  ;;  %4571 = vpow2.f32 %v3648_v17 }
 0x808   : > { %v3868_v58 = vsel %vm503_vm0, %v3848_v10, 0.0  ;;  %4573 = vlog2.f32 %v3706_v11  ;;  %v3710_v43 = vadd.f32 1.0, %v3709_v7  ;;  %vm3713_vm6 = vcmp.lt.f32.partialorder %v3712_v48, 0.0004427343 }
 0x809   : > { %3948 = vst.msk [vmem:[%s5645_s15 + $0x30] sm:$0xff] %vm503_vm0, %v5726_v15  ;;  %3869 = vadd.xlane.f32.xlu0 %v3868_v58  ;;  %v3705_v5 = vsel %vm3704_vm5, %v3702_v41, %v3699_v24  ;;  %v3612_v59 = vand.u32 2147483647, %v5726_v15 }
 0x80a   : > { %v2527_v28 = vpop.f32.mrf.mxu2  ;;  %v3817_v32 = vmul.f32 2.0, %v3705_v5  ;;  %v3711_v54 = vmul.f32 %v4568_v27, %v3710_v43 }
 0x80b   : > { %v2528_v33 = vadd.f32 %v5632_v12, %v2527_v28  ;;  %v3628_v47 = vsub.f32 0.0, %v3612_v59 }
 0x80c   : > { %v3833_v37 = vadd.f32 %v3817_v32, %v3609_v56 }
 0x80d   : > { %v4572_v6 = vpop.eup %4571  ;;  %v2561_v35 = vadd.f32 %v2528_v33, %v5084_v9  ;;  %v3650_v1 = vmul.f32 1.442695, %v3628_v47 }
 0x80e   : > { %v4574_v42 = vpop.eup %4573  ;;  %v3849_v53 = vsub.f32 0.0, %v3833_v37  ;;  %v3715_v55 = vadd.f32 1.0, %v4572_v6  ;;  %v3718_v39 = vmul.f32 -0.5, %v4572_v6  ;;  %v3721_v11 = vand.u32 2147483647, %v4572_v6 }
 0x80f   : > { %v5741_v63 = vmul.f32 %v5638_v21, %v2561_v35  ;;  %4428 = vmatmul.msk.f32.gmra.mxu3 %vm503_vm0, %v2561_v35  ;;  %v3708_v46 = vmul.f32 0.6931472, %v4574_v42  ;;  %4575 = vpow2.f32 %v3650_v1 }
 0x810   : > { %v3871_v19 = vsel %vm503_vm0, %v3849_v53, 0.0  ;;  %4577 = vlog2.f32 %v3715_v55  ;;  %v3719_v17 = vadd.f32 1.0, %v3718_v39  ;;  %vm3722_vm7 = vcmp.lt.f32.partialorder %v3721_v11, 0.0004427343 }
 0x811   : > { %3949 = vst.msk [vmem:[%s5645_s15 + $0x38] sm:$0xff] %vm503_vm0, %v5741_v63  ;;  %3872 = vadd.xlane.f32.xlu1 %v3871_v19  ;;  %v3714_v9 = vsel %vm3713_vm6, %v3711_v54, %v3708_v46  ;;  %v3613_v56 = vand.u32 2147483647, %v5741_v63 }
 0x812   : > { %v2530_v52 = vpop.f32.mrf.mxu2  ;;  %v3818_v27 = vmul.f32 2.0, %v3714_v9  ;;  %v3720_v47 = vmul.f32 %v4572_v6, %v3719_v17 }
 0x813   : > { %v2531_v60 = vadd.f32 %v5632_v12, %v2530_v52  ;;  %v3629_v8 = vsub.f32 0.0, %v3613_v56 }
 0x814   : > { %v3834_v10 = vadd.f32 %v3818_v27, %v3610_v3 }
 0x815   : > { %v4576_v7 = vpop.eup %4575  ;;  %v2562_v24 = vadd.f32 %v2531_v60, %v5090_v13  ;;  %v3652_v41 = vmul.f32 1.442695, %v3629_v8 }
 0x816   : > { %v4578_v58 = vpop.eup %4577  ;;  %v3850_v5 = vsub.f32 0.0, %v3834_v10  ;;  %v3724_v28 = vadd.f32 1.0, %v4576_v7  ;;  %v3727_v32 = vmul.f32 -0.5, %v4576_v7  ;;  %v3730_v53 = vand.u32 2147483647, %v4576_v7 }
 0x817   : > { %v5756_v43 = vmul.f32 %v5638_v21, %v2562_v24  ;;  %4429 = vmatmul.msk.f32.gmra.mxu3 %vm503_vm0, %v2562_v24  ;;  %v3717_v33 = vmul.f32 0.6931472, %v4578_v58  ;;  %4579 = vpow2.f32 %v3652_v41 }
 0x818   : > { %v3874_v0 = vsel %vm503_vm0, %v3850_v5, 0.0  ;;  %4581 = vlog2.f32 %v3724_v28  ;;  %v3728_v35 = vadd.f32 1.0, %v3727_v32  ;;  %vm3731_vm8 = vcmp.lt.f32.partialorder %v3730_v53, 0.0004427343 }
 0x819   : > { %3950 = vst.msk [vmem:[%s5645_s15 + $0x40] sm:$0xff] %vm503_vm0, %v5756_v43  ;;  %3875 = vadd.xlane.f32.xlu2 %v3874_v0  ;;  %v3723_v13 = vsel %vm3722_vm7, %v3720_v47, %v3717_v33  ;;  %v3614_v3 = vand.u32 2147483647, %v5756_v43 }
 0x81a   : > { %v2533_v37 = vpop.f32.mrf.mxu2  ;;  %v3819_v48 = vmul.f32 2.0, %v3723_v13  ;;  %v3729_v9 = vmul.f32 %v4576_v7, %v3728_v35 }
 0x81b   : > { %v2534_v1 = vadd.f32 %v5632_v12, %v2533_v37  ;;  %v3630_v6 = vsub.f32 0.0, %v3614_v3 }
 0x81c   : > { %v3835_v42 = vadd.f32 %v3819_v48, %v3611_v50  ;;  %v4437_v50 = vld [vmem:[%s6361_s4 + $0x120] sm:$0xff] }
 0x81d   : > { %v4580_v54 = vpop.eup %4579  ;;  %v2563_v55 = vadd.f32 %v2534_v1, %v5099_v18  ;;  %v3654_v46 = vmul.f32 1.442695, %v3630_v6  ;;  %2779 = vmatpush.msra.mxu0 %v4437_v50 }
 0x81e   : > { %v4582_v39 = vpop.eup %4581  ;;  %v3851_v19 = vsub.f32 0.0, %v3835_v42  ;;  %v3733_v52 = vadd.f32 1.0, %v4580_v54  ;;  %v3736_v17 = vmul.f32 -0.5, %v4580_v54  ;;  %v3739_v5 = vand.u32 2147483647, %v4580_v54 }
 0x81f   : > { %v5771_v27 = vmul.f32 %v5638_v21, %v2563_v55  ;;  %4430 = vmatmul.msk.f32.gmra.mxu3 %vm503_vm0, %v2563_v55  ;;  %v3726_v60 = vmul.f32 0.6931472, %v4582_v39  ;;  %4583 = vpow2.f32 %v3654_v46 }
 0x820   : > { %v3877_v49 = vsel %vm503_vm0, %v3851_v19, 0.0  ;;  %4585 = vlog2.f32 %v3733_v52  ;;  %v3737_v24 = vadd.f32 1.0, %v3736_v17  ;;  %vm3740_vm9 = vcmp.lt.f32.partialorder %v3739_v5, 0.0004427343 }
 0x821   : > { %3951 = vst.msk [vmem:[%s5645_s15 + $0x48] sm:$0xff] %vm503_vm0, %v5771_v27  ;;  %3878 = vadd.xlane.f32.xlu0 %v3877_v49  ;;  %v3732_v18 = vsel %vm3731_vm8, %v3729_v9, %v3726_v60  ;;  %v3615_v8 = vand.u32 2147483647, %v5771_v27  ;;  %v4461_v27 = vld [vmem:[%s6361_s4 + $0x158] sm:$0xff] }
 0x822   : > { %v2536_v10 = vpop.f32.mrf.mxu2  ;;  %v3820_v11 = vmul.f32 2.0, %v3732_v18  ;;  %v3738_v1 = vmul.f32 %v4580_v54, %v3737_v24  ;;  %2915 = vmatpush.msra.mxu1 %v4461_v27 }
 0x823   : > { %v2537_v7 = vadd.f32 %v5632_v12, %v2536_v10  ;;  %v3631_v41 = vsub.f32 0.0, %v3615_v8 }
 0x824   : > { %v3836_v58 = vadd.f32 %v3820_v11, %v3612_v59 }
 0x825   : > { %v4584_v28 = vpop.eup %4583  ;;  %v2564_v32 = vadd.f32 %v2537_v7, %v5105_v22  ;;  %v3656_v33 = vmul.f32 1.442695, %v3631_v41 }
 0x826   : > { %v4586_v47 = vpop.eup %4585  ;;  %v3852_v0 = vsub.f32 0.0, %v3836_v58  ;;  %v3742_v13 = vadd.f32 1.0, %v4584_v28  ;;  %v3745_v37 = vmul.f32 -0.5, %v4584_v28  ;;  %v3748_v39 = vand.u32 2147483647, %v4584_v28 }
 0x827   : > { %v5789_v48 = vmul.f32 %v5638_v21, %v2564_v32  ;;  %4431 = vmatmul.msk.f32.gmra.mxu3 %vm503_vm0, %v2564_v32  ;;  %v3735_v35 = vmul.f32 0.6931472, %v4586_v47  ;;  %4587 = vpow2.f32 %v3656_v33 }
 0x828   : > { %v3880_v15 = vsel %vm503_vm0, %v3852_v0, 0.0  ;;  %4589 = vlog2.f32 %v3742_v13  ;;  %v3746_v53 = vadd.f32 1.0, %v3745_v37  ;;  %vm3749_vm10 = vcmp.lt.f32.partialorder %v3748_v39, 0.0004427343 }
 0x829   : > { %3952 = vst.msk [vmem:[%s5645_s15 + $0x50] sm:$0xff] %vm503_vm0, %v5789_v48  ;;  %3881 = vadd.xlane.f32.xlu1 %v3880_v15  ;;  %v3741_v22 = vsel %vm3740_vm9, %v3738_v1, %v3735_v35  ;;  %v3616_v59 = vand.u32 2147483647, %v5789_v48 }
 0x82a   : > { %v2539_v6 = vpop.f32.mrf.mxu2  ;;  %v3821_v42 = vmul.f32 2.0, %v3741_v22  ;;  %v3747_v49 = vmul.f32 %v4584_v28, %v3746_v53 }
 0x82b   : > { %v2540_v55 = vadd.f32 %v5632_v12, %v2539_v6  ;;  %v3632_v54 = vsub.f32 0.0, %v3616_v59 }
 0x82c   : > { %v3837_v46 = vadd.f32 %v3821_v42, %v3613_v56 }
 0x82d   : > { %v4588_v19 = vpop.eup %4587  ;;  %v2565_v9 = vadd.f32 %v2540_v55, %v5111_v26  ;;  %v3658_v52 = vmul.f32 1.442695, %v3632_v54 }
 0x82e   : > { %v4590_v60 = vpop.eup %4589  ;;  %v3853_v17 = vsub.f32 0.0, %v3837_v46  ;;  %v3751_v18 = vadd.f32 1.0, %v4588_v19  ;;  %v3754_v11 = vmul.f32 -0.5, %v4588_v19  ;;  %v3757_v32 = vand.u32 2147483647, %v4588_v19 }
 0x82f   : > { %v5804_v50 = vmul.f32 %v5638_v21, %v2565_v9  ;;  %4432 = vmatmul.msk.f32.gmra.mxu3 %vm503_vm0, %v2565_v9  ;;  %v3744_v10 = vmul.f32 0.6931472, %v4590_v60  ;;  %4591 = vpow2.f32 %v3658_v52 }
 0x830   : > { %v3883_v63 = vsel %vm503_vm0, %v3853_v17, 0.0  ;;  %4593 = vlog2.f32 %v3751_v18  ;;  %v3755_v58 = vadd.f32 1.0, %v3754_v11  ;;  %vm3758_vm11 = vcmp.lt.f32.partialorder %v3757_v32, 0.0004427343 }
 0x831   : > { %3953 = vst.msk [vmem:[%s5645_s15 + $0x58] sm:$0xff] %vm503_vm0, %v5804_v50  ;;  %3884 = vadd.xlane.f32.xlu2 %v3883_v63  ;;  %v3750_v26 = vsel %vm3749_vm10, %v3747_v49, %v3744_v10  ;;  %v3617_v56 = vand.u32 2147483647, %v5804_v50 }
 0x832   : > { %v2542_v7 = vpop.f32.mrf.mxu2  ;;  %v3822_v24 = vmul.f32 2.0, %v3750_v26  ;;  %v3756_v6 = vmul.f32 %v4588_v19, %v3755_v58 }
 0x833   : > { %v2543_v41 = vadd.f32 %v5632_v12, %v2542_v7  ;;  %v3633_v5 = vsub.f32 0.0, %v3617_v56 }
 0x834   : > { %v3838_v28 = vadd.f32 %v3822_v24, %v3614_v3 }
 0x835   : > { %v4592_v33 = vpop.eup %4591  ;;  %v2566_v47 = vadd.f32 %v2543_v41, %v5117_v30  ;;  %v3660_v0 = vmul.f32 1.442695, %v3633_v5 }
 0x836   : > { %v4594_v13 = vpop.eup %4593  ;;  %v3854_v37 = vsub.f32 0.0, %v3838_v28  ;;  %v3760_v35 = vadd.f32 1.0, %v4592_v33  ;;  %v3763_v1 = vmul.f32 -0.5, %v4592_v33  ;;  %v3766_v19 = vand.u32 2147483647, %v4592_v33 }
 0x837   : > { %v5819_v15 = vmul.f32 %v5638_v21, %v2566_v47  ;;  %4433 = vmatmul.msk.f32.gmra.mxu3 %vm503_vm0, %v2566_v47  ;;  %v3753_v22 = vmul.f32 0.6931472, %v4594_v13  ;;  %4595 = vpow2.f32 %v3660_v0 }
 0x838   : > { %v3886_v43 = vsel %vm503_vm0, %v3854_v37, 0.0  ;;  %4597 = vlog2.f32 %v3760_v35  ;;  %v3764_v55 = vadd.f32 1.0, %v3763_v1  ;;  %vm3767_vm12 = vcmp.lt.f32.partialorder %v3766_v19, 0.0004427343 }
 0x839   : > { %3954 = vst.msk [vmem:[%s5645_s15 + $0x60] sm:$0xff] %vm503_vm0, %v5819_v15  ;;  %3887 = vadd.xlane.f32.xlu0 %v3886_v43  ;;  %v3759_v30 = vsel %vm3758_vm11, %v3756_v6, %v3753_v22  ;;  %v3618_v3 = vand.u32 2147483647, %v5819_v15  ;;  %v4460_v15 = vld [vmem:[%s6361_s4 + $0x150] sm:$0xff] }
 0x83a   : > { %v2545_v42 = vpop.f32.mrf.mxu2  ;;  %v3823_v53 = vmul.f32 2.0, %v3759_v30  ;;  %v3765_v18 = vmul.f32 %v4592_v33, %v3764_v55  ;;  %2916 = vmatpush.msra.mxu1 %v4460_v15 }
 0x83b   : > { %v2546_v54 = vadd.f32 %v5632_v12, %v2545_v42  ;;  %v3634_v46 = vsub.f32 0.0, %v3618_v3 }
 0x83c   : > { %v3839_v39 = vadd.f32 %v3823_v53, %v3615_v8 }
 0x83d   : > { %v4596_v9 = vpop.eup %4595  ;;  %v2567_v52 = vadd.f32 %v2546_v54, %v5123_v34  ;;  %v3662_v60 = vmul.f32 1.442695, %v3634_v46 }
 0x83e   : > { %v4598_v17 = vpop.eup %4597  ;;  %v3855_v49 = vsub.f32 0.0, %v3839_v39  ;;  %v3769_v10 = vadd.f32 1.0, %v4596_v9  ;;  %v3772_v26 = vmul.f32 -0.5, %v4596_v9  ;;  %v3775_v28 = vand.u32 2147483647, %v4596_v9 }
 0x83f   : > { %v5834_v11 = vmul.f32 %v5638_v21, %v2567_v52  ;;  %4434 = vmatmul.msk.f32.gmra.mxu3 %vm503_vm0, %v2567_v52  ;;  %v3762_v63 = vmul.f32 0.6931472, %v4598_v17  ;;  %4599 = vpow2.f32 %v3662_v60 }
 0x840   : > { %v3889_v34 = vsel %vm503_vm0, %v3855_v49, 0.0  ;;  %4601 = vlog2.f32 %v3769_v10  ;;  %v3773_v58 = vadd.f32 1.0, %v3772_v26  ;;  %vm3776_vm13 = vcmp.lt.f32.partialorder %v3775_v28, 0.0004427343  ;;  %v4459_v28 = vld [vmem:[%s6361_s4 + $0x148] sm:$0xff] }
 0x841   : > { %3955 = vst.msk [vmem:[%s5645_s15 + $0x68] sm:$0xff] %vm503_vm0, %v5834_v11  ;;  %3890 = vadd.xlane.f32.xlu1 %v3889_v34  ;;  %v3768_v8 = vsel %vm3767_vm12, %v3765_v18, %v3762_v63  ;;  %2917 = vmatpush.msra.mxu1 %v4459_v28 }
 0x842   : > { %v2548_v7 = vpop.f32.mrf.mxu2  ;;  %v3824_v24 = vmul.f32 2.0, %v3768_v8  ;;  %v3774_v1 = vmul.f32 %v4596_v9, %v3773_v58 }
 0x843   : > { %v2549_v41 = vadd.f32 %v5632_v12, %v2548_v7 }
 0x844   : > { %v3840_v5 = vadd.f32 %v3824_v24, %v3616_v59 }
 0x845   : > { %v4600_v32 = vpop.eup %4599  ;;  %v2568_v33 = vadd.f32 %v2549_v41, %v5132_v40 }
 0x846   : > { %v4602_v47 = vpop.eup %4601  ;;  %v3856_v0 = vsub.f32 0.0, %v3840_v5  ;;  %v3778_v13 = vadd.f32 1.0, %v4600_v32  ;;  %v3781_v22 = vmul.f32 -0.5, %v4600_v32  ;;  %v3784_v53 = vand.u32 2147483647, %v4600_v32 }
 0x847   : > { %v5849_v37 = vmul.f32 %v5638_v21, %v2568_v33  ;;  %4435 = vmatmul.msk.f32.gmra.mxu3 %vm503_vm0, %v2568_v33  ;;  %v3771_v35 = vmul.f32 0.6931472, %v4602_v47 }
 0x848   : > { %v3892_v6 = vsel %vm503_vm0, %v3856_v0, 0.0  ;;  %4603 = vlog2.f32 %v3778_v13  ;;  %v3782_v30 = vadd.f32 1.0, %v3781_v22  ;;  %vm3785_vm14 = vcmp.lt.f32.partialorder %v3784_v53, 0.0004427343 }
 0x849   : > { %3956 = vst.msk [vmem:[%s5645_s15 + $0x70] sm:$0xff] %vm503_vm0, %v5849_v37  ;;  %3893 = vadd.xlane.f32.xlu2 %v3892_v6  ;;  %v3777_v40 = vsel %vm3776_vm13, %v3774_v1, %v3771_v35 }
 0x84a   : > { %v2551_v48 = vpop.f32.mrf.mxu2  ;;  %v3825_v59 = vmul.f32 2.0, %v3777_v40  ;;  %v3783_v9 = vmul.f32 %v4600_v32, %v3782_v30 }
 0x84b   : > { %v2552_v43 = vadd.f32 %v5632_v12, %v2551_v48 }
 0x84c   : > { %v3841_v42 = vadd.f32 %v3825_v59, %v3617_v56 }
 0x84d   : > { %v2569_v55 = vadd.f32 %v2552_v43, %v5138_v45  ;;  %v4458_v43 = vld [vmem:[%s6361_s4 + $0x140] sm:$0xff] }
 0x84e   : > { %v4604_v54 = vpop.eup %4603  ;;  %v3857_v46 = vsub.f32 0.0, %v3841_v42  ;;  %2918 = vmatpush.msra.mxu1 %v4458_v43 }
 0x84f   : > { %v5861_v39 = vmul.f32 %v5638_v21, %v2569_v55  ;;  %4436 = vmatmul.msk.f32.gmra.mxu3 %vm503_vm0, %v2569_v55  ;;  %v3780_v19 = vmul.f32 0.6931472, %v4604_v54  ;;  %v5873_v21 = vld [vmem:[%s6360_s3 + $0x3] ss:$0 sm:$0xff] }
 0x850   : > { %v3895_v52 = vsel %vm503_vm0, %v3857_v46, 0.0 }
 0x851   : > { %3957 = vst.msk [vmem:[%s5645_s15 + $0x78] sm:$0xff] %vm503_vm0, %v5861_v39  ;;  %3896 = vadd.xlane.f32.xlu0 %v3895_v52  ;;  %v3786_v12 = vsel %vm3785_vm14, %v3783_v9, %v3780_v19  ;;  %s6323_s15 = scalar_lea.vmem %s6369_s12, %s4781_s26 }
 0x852   : > { %v3826_v50 = vmul.f32 2.0, %v3786_v12 }
 0x854   : > { %v3842_v45 = vadd.f32 %v3826_v50, %v3618_v3 }
 0x856   : > { %v3858_v56 = vsub.f32 0.0, %v3842_v45 }
 0x858   : > { %v3898_v60 = vsel %vm503_vm0, %v3858_v56, 0.0  ;;  %v4482_v56 = vld [vmem:[%s6361_s4 + $0x178] sm:$0xff] }
 0x859   : > { %3899 = vadd.xlane.f32.xlu1 %v3898_v60  ;;  %3054 = vmatpush.msra.mxu2 %v4482_v56 }
 0x85a   : > { %v2642_v17 = vpop.f32.mrf.mxu3 }
 0x85b   : > { %v2643_v49 = vadd.f32 %v5873_v21, %v2642_v17 }
 0x85d   : > { %v2690_v18 = vmax.f32 %v2643_v49, 0.0 }
 0x85f   : > { %4442 = vmatmul.msk.f32.vlgmr.msra.gmra.mxu0 %vm641_vm1, %v2690_v18 }
 0x862   : > { %v2645_v3 = vpop.f32.mrf.mxu3 }
 0x863   : > { %v2646_v10 = vadd.f32 %v5873_v21, %v2645_v3 }
 0x865   : > { %v2691_v63 = vmax.f32 %v2646_v10, 0.0 }
 0x867   : > { %4443 = vmatmul.msk.f32.gmra.mxu0 %vm641_vm1, %v2691_v63 }
 0x86a   : > { %v2648_v26 = vpop.f32.mrf.mxu3 }
 0x86b   : > { %v2649_v27 = vadd.f32 %v5873_v21, %v2648_v26 }
 0x86d   : > { %v2692_v34 = vmax.f32 %v2649_v27, 0.0  ;;  %v5923_v27 = vld [vmem:[%s6362_s5 + $0x9] ss:$0 sm:$0xff] }
 0x86f   : > { %4444 = vmatmul.msk.f32.gmra.mxu0 %vm641_vm1, %v2692_v34 }
 0x872   : > { %v2651_v8 = vpop.f32.mrf.mxu3 }
 0x873   : > { %v2652_v7 = vadd.f32 %v5873_v21, %v2651_v8 }
 0x875   : > { %v2693_v24 = vmax.f32 %v2652_v7, 0.0 }
 0x877   : > { %4445 = vmatmul.msk.f32.gmra.mxu0 %vm641_vm1, %v2693_v24  ;;  %v4481_v24 = vld [vmem:[%s6361_s4 + $0x170] sm:$0xff] }
 0x878   : > { %3055 = vmatpush.msra.mxu2 %v4481_v24 }
 0x87a   : > { %v2654_v41 = vpop.f32.mrf.mxu3 }
 0x87b   : > { %v2655_v58 = vadd.f32 %v5873_v21, %v2654_v41 }
 0x87d   : > { %v2694_v5 = vmax.f32 %v2655_v58, 0.0 }
 0x87f   : > { %4446 = vmatmul.msk.f32.gmra.mxu0 %vm641_vm1, %v2694_v5 }
 0x882   : > { %v2657_v32 = vpop.f32.mrf.mxu3 }
 0x883   : > { %v2658_v33 = vadd.f32 %v5873_v21, %v2657_v32 }
 0x885   : > { %v2695_v47 = vmax.f32 %v2658_v33, 0.0 }
 0x887   : > { %4447 = vmatmul.msk.f32.gmra.mxu0 %vm641_vm1, %v2695_v47 }
 0x88a   : > { %v2660_v0 = vpop.f32.mrf.mxu3 }
 0x88b   : > { %v2661_v13 = vadd.f32 %v5873_v21, %v2660_v0 }
 0x88d   : > { %v2696_v35 = vmax.f32 %v2661_v13, 0.0 }
 0x88f   : > { %4448 = vmatmul.msk.f32.gmra.mxu0 %vm641_vm1, %v2696_v35 }
 0x892   : > { %v2663_v1 = vpop.f32.mrf.mxu3 }
 0x893   : > { %v2664_v22 = vadd.f32 %v5873_v21, %v2663_v1 }
 0x895   : > { %v2697_v6 = vmax.f32 %v2664_v22, 0.0  ;;  %v4480_v22 = vld [vmem:[%s6361_s4 + $0x168] sm:$0xff] }
 0x896   : > { %3056 = vmatpush.msra.mxu2 %v4480_v22 }
 0x897   : > { %4449 = vmatmul.msk.f32.gmra.mxu0 %vm641_vm1, %v2697_v6 }
 0x89a   : > { %v2666_v40 = vpop.f32.mrf.mxu3 }
 0x89b   : > { %v2667_v48 = vadd.f32 %v5873_v21, %v2666_v40 }
 0x89d   : > { %v2698_v59 = vmax.f32 %v2667_v48, 0.0 }
 0x89f   : > { %4450 = vmatmul.msk.f32.gmra.mxu0 %vm641_vm1, %v2698_v59 }
 0x8a2   : > { %v2669_v30 = vpop.f32.mrf.mxu3 }
 0x8a3   : > { %v2670_v42 = vadd.f32 %v5873_v21, %v2669_v30 }
 0x8a5   : > { %v2699_v53 = vmax.f32 %v2670_v42, 0.0 }
 0x8a7   : > { %4451 = vmatmul.msk.f32.gmra.mxu0 %vm641_vm1, %v2699_v53 }
 0x8aa   : > { %v2672_v55 = vpop.f32.mrf.mxu3 }
 0x8ab   : > { %v2673_v54 = vadd.f32 %v5873_v21, %v2672_v55 }
 0x8ad   : > { %v2700_v46 = vmax.f32 %v2673_v54, 0.0 }
 0x8af   : > { %4452 = vmatmul.msk.f32.gmra.mxu0 %vm641_vm1, %v2700_v46 }
 0x8b2   : > { %v2675_v19 = vpop.f32.mrf.mxu3 }
 0x8b3   : > { %v2676_v9 = vadd.f32 %v5873_v21, %v2675_v19 }
 0x8b5   : > { %v2701_v52 = vmax.f32 %v2676_v9, 0.0  ;;  %v4479_v9 = vld [vmem:[%s6361_s4 + $0x160] sm:$0xff] }
 0x8b6   : > { %3057 = vmatpush.msra.mxu2 %v4479_v9 }
 0x8b7   : > { %4453 = vmatmul.msk.f32.gmra.mxu0 %vm641_vm1, %v2701_v52 }
 0x8ba   : > { %v2678_v12 = vpop.f32.mrf.mxu3 }
 0x8bb   : > { %v2679_v50 = vadd.f32 %v5873_v21, %v2678_v12 }
 0x8bd   : > { %v2702_v45 = vmax.f32 %v2679_v50, 0.0 }
 0x8bf   : > { %4454 = vmatmul.msk.f32.gmra.mxu0 %vm641_vm1, %v2702_v45 }
 0x8c2   : > { %v2681_v60 = vpop.f32.mrf.mxu3 }
 0x8c3   : > { %v2682_v17 = vadd.f32 %v5873_v21, %v2681_v60 }
 0x8c5   : > { %v2703_v49 = vmax.f32 %v2682_v17, 0.0 }
 0x8c7   : > { %4455 = vmatmul.msk.f32.gmra.mxu0 %vm641_vm1, %v2703_v49 }
 0x8ca   : > { %v2684_v18 = vpop.f32.mrf.mxu3 }
 0x8cb   : > { %v2685_v15 = vadd.f32 %v5873_v21, %v2684_v18 }
 0x8cd   : > { %v2704_v3 = vmax.f32 %v2685_v15, 0.0 }
 0x8cf   : > { %4456 = vmatmul.msk.f32.gmra.mxu0 %vm641_vm1, %v2704_v3 }
 0x8d2   : > { %v2687_v10 = vpop.f32.mrf.mxu3 }
 0x8d3   : > { %v2688_v63 = vadd.f32 %v5873_v21, %v2687_v10 }
 0x8d5   : > { %v2705_v26 = vmax.f32 %v2688_v63, 0.0 }
 0x8d7   : > { %4457 = vmatmul.msk.f32.gmra.mxu0 %vm641_vm1, %v2705_v26 }
 0x8dc   : > { %v2781_v34 = vpop.f32.mrf.mxu0 }
 0x8dd   : > { %v2782_v8 = vadd.f32 %v5923_v27, %v2781_v34 }
 0x8df   : > { %v2829_v7 = vmax.f32 %v2782_v8, 0.0  ;;  %v4503_v8 = vld [vmem:[%s6363_s6 + $0x78] sm:$0xff] }
 0x8e0   : > { %3193 = vmatpush.msra.mxu3 %v4503_v8 }
 0x8e1   : > { %4463 = vmatmul.msk.f32.vlgmr.msra.gmra.mxu1 %vm641_vm1, %v2829_v7 }
 0x8e4   : > { %v2784_v21 = vpop.f32.mrf.mxu0 }
 0x8e5   : > { %v2785_v41 = vadd.f32 %v5923_v27, %v2784_v21 }
 0x8e7   : > { %v2830_v58 = vmax.f32 %v2785_v41, 0.0 }
 0x8e9   : > { %4464 = vmatmul.msk.f32.gmra.mxu1 %vm641_vm1, %v2830_v58 }
 0x8ec   : > { %v2787_v5 = vpop.f32.mrf.mxu0 }
 0x8ed   : > { %v2788_v28 = vadd.f32 %v5923_v27, %v2787_v5 }
 0x8ef   : > { %v2831_v32 = vmax.f32 %v2788_v28, 0.0  ;;  %v5972_v28 = vld [vmem:[%s6362_s5 + $0xa] ss:$0 sm:$0xff] }
 0x8f1   : > { %4465 = vmatmul.msk.f32.gmra.mxu1 %vm641_vm1, %v2831_v32 }
 0x8f4   : > { %v2790_v33 = vpop.f32.mrf.mxu0 }
 0x8f5   : > { %v2791_v47 = vadd.f32 %v5923_v27, %v2790_v33 }
 0x8f7   : > { %v2832_v0 = vmax.f32 %v2791_v47, 0.0 }
 0x8f9   : > { %4466 = vmatmul.msk.f32.gmra.mxu1 %vm641_vm1, %v2832_v0 }
 0x8fc   : > { %v2793_v13 = vpop.f32.mrf.mxu0 }
 0x8fd   : > { %v2794_v35 = vadd.f32 %v5923_v27, %v2793_v13 }
 0x8ff   : > { %v2833_v1 = vmax.f32 %v2794_v35, 0.0 }
 0x901   : > { %4467 = vmatmul.msk.f32.gmra.mxu1 %vm641_vm1, %v2833_v1 }
 0x904   : > { %v2796_v6 = vpop.f32.mrf.mxu0 }
 0x905   : > { %v2797_v40 = vadd.f32 %v5923_v27, %v2796_v6 }
 0x907   : > { %v2834_v48 = vmax.f32 %v2797_v40, 0.0 }
 0x909   : > { %4468 = vmatmul.msk.f32.gmra.mxu1 %vm641_vm1, %v2834_v48 }
 0x90c   : > { %v2799_v59 = vpop.f32.mrf.mxu0 }
 0x90d   : > { %v2800_v43 = vadd.f32 %v5923_v27, %v2799_v59 }
 0x90f   : > { %v2835_v30 = vmax.f32 %v2800_v43, 0.0 }
 0x911   : > { %4469 = vmatmul.msk.f32.gmra.mxu1 %vm641_vm1, %v2835_v30 }
 0x914   : > { %v2802_v42 = vpop.f32.mrf.mxu0 }
 0x915   : > { %v2803_v53 = vadd.f32 %v5923_v27, %v2802_v42 }
 0x917   : > { %v2836_v55 = vmax.f32 %v2803_v53, 0.0 }
 0x919   : > { %4470 = vmatmul.msk.f32.gmra.mxu1 %vm641_vm1, %v2836_v55 }
 0x91c   : > { %v2805_v54 = vpop.f32.mrf.mxu0 }
 0x91d   : > { %v2806_v46 = vadd.f32 %v5923_v27, %v2805_v54 }
 0x91f   : > { %v2837_v19 = vmax.f32 %v2806_v46, 0.0  ;;  %v4501_v46 = vld [vmem:[%s6363_s6 + $0x68] sm:$0xff] }
 0x921   : > { %4471 = vmatmul.msk.f32.gmra.mxu1 %vm641_vm1, %v2837_v19 }
 0x924   : > { %v2808_v52 = vpop.f32.mrf.mxu0 }
 0x925   : > { %v2809_v12 = vadd.f32 %v5923_v27, %v2808_v52 }
 0x927   : > { %v2838_v50 = vmax.f32 %v2809_v12, 0.0 }
 0x929   : > { %4472 = vmatmul.msk.f32.gmra.mxu1 %vm641_vm1, %v2838_v50 }
 0x92c   : > { %v2811_v45 = vpop.f32.mrf.mxu0 }
 0x92d   : > { %v2812_v56 = vadd.f32 %v5923_v27, %v2811_v45 }
 0x92f   : > { %v2839_v60 = vmax.f32 %v2812_v56, 0.0 }
 0x931   : > { %4473 = vmatmul.msk.f32.gmra.mxu1 %vm641_vm1, %v2839_v60 }
 0x934   : > { %v2814_v17 = vpop.f32.mrf.mxu0 }
 0x935   : > { %v2815_v49 = vadd.f32 %v5923_v27, %v2814_v17 }
 0x937   : > { %v2840_v18 = vmax.f32 %v2815_v49, 0.0 }
 0x939   : > { %4474 = vmatmul.msk.f32.gmra.mxu1 %vm641_vm1, %v2840_v18 }
 0x93c   : > { %v2817_v15 = vpop.f32.mrf.mxu0 }
 0x93d   : > { %v2818_v3 = vadd.f32 %v5923_v27, %v2817_v15 }
 0x93f   : > { %v2841_v10 = vmax.f32 %v2818_v3, 0.0  ;;  %v4500_v3 = vld [vmem:[%s6363_s6 + $0x60] sm:$0xff] }
 0x941   : > { %4475 = vmatmul.msk.f32.gmra.mxu1 %vm641_vm1, %v2841_v10 }
 0x944   : > { %v2820_v63 = vpop.f32.mrf.mxu0 }
 0x945   : > { %v2821_v26 = vadd.f32 %v5923_v27, %v2820_v63 }
 0x947   : > { %v2842_v34 = vmax.f32 %v2821_v26, 0.0 }
 0x949   : > { %4476 = vmatmul.msk.f32.gmra.mxu1 %vm641_vm1, %v2842_v34 }
 0x94c   : > { %v2823_v7 = vpop.f32.mrf.mxu0 }
 0x94d   : > { %v2824_v24 = vadd.f32 %v5923_v27, %v2823_v7 }
 0x94f   : > { %v2843_v21 = vmax.f32 %v2824_v24, 0.0 }
 0x951   : > { %4477 = vmatmul.msk.f32.gmra.mxu1 %vm641_vm1, %v2843_v21 }
 0x954   : > { %v2826_v41 = vpop.f32.mrf.mxu0 }
 0x955   : > { %v2827_v58 = vadd.f32 %v5923_v27, %v2826_v41  ;;  %v4502_v27 = vld [vmem:[%s6363_s6 + $0x70] sm:$0xff] }
 0x956   : > { %3194 = vmatpush.msra.mxu3 %v4502_v27 }
 0x957   : > { %v2844_v5 = vmax.f32 %v2827_v58, 0.0 }
 0x958   : > { %3195 = vmatpush.msra.mxu3 %v4501_v46 }
 0x959   : > { %4478 = vmatmul.msk.f32.gmra.mxu1 %vm641_vm1, %v2844_v5 }
 0x95a   : > { %3196 = vmatpush.msra.mxu3 %v4500_v3 }
 0x95e   : > { %v2920_v32 = vpop.f32.mrf.mxu1 }
 0x95f   : > { %v2921_v33 = vadd.f32 %v5972_v28, %v2920_v32 }
 0x961   : > { %v2968_v47 = vmax.f32 %v2921_v33, 0.0 }
 0x963   : > { %4484 = vmatmul.msk.f32.vlgmr.msra.gmra.mxu2 %vm641_vm1, %v2968_v47 }
 0x966   : > { %v2923_v0 = vpop.f32.mrf.mxu1 }
 0x967   : > { %v2924_v13 = vadd.f32 %v5972_v28, %v2923_v0 }
 0x969   : > { %v2969_v35 = vmax.f32 %v2924_v13, 0.0 }
 0x96b   : > { %4485 = vmatmul.msk.f32.gmra.mxu2 %vm641_vm1, %v2969_v35 }
 0x96e   : > { %v2926_v1 = vpop.f32.mrf.mxu1 }
 0x96f   : > { %v2927_v22 = vadd.f32 %v5972_v28, %v2926_v1  ;;  %v4550_v1 = vld [vmem:[%s6362_s5 + $0xb] ss:$0 sm:$0xff] }
 0x971   : > { %v2970_v6 = vmax.f32 %v2927_v22, 0.0 }
 0x973   : > { %4486 = vmatmul.msk.f32.gmra.mxu2 %vm641_vm1, %v2970_v6 }
 0x976   : > { %v2929_v40 = vpop.f32.mrf.mxu1 }
 0x977   : > { %v2930_v48 = vadd.f32 %v5972_v28, %v2929_v40 }
 0x979   : > { %v2971_v59 = vmax.f32 %v2930_v48, 0.0 }
 0x97b   : > { %4487 = vmatmul.msk.f32.gmra.mxu2 %vm641_vm1, %v2971_v59 }
 0x97e   : > { %v2932_v43 = vpop.f32.mrf.mxu1 }
 0x97f   : > { %v2933_v30 = vadd.f32 %v5972_v28, %v2932_v43 }
 0x981   : > { %v2972_v42 = vmax.f32 %v2933_v30, 0.0 }
 0x983   : > { %4488 = vmatmul.msk.f32.gmra.mxu2 %vm641_vm1, %v2972_v42 }
 0x986   : > { %v2935_v53 = vpop.f32.mrf.mxu1 }
 0x987   : > { %v2936_v55 = vadd.f32 %v5972_v28, %v2935_v53 }
 0x989   : > { %v2973_v54 = vmax.f32 %v2936_v55, 0.0 }
 0x98b   : > { %4489 = vmatmul.msk.f32.gmra.mxu2 %vm641_vm1, %v2973_v54 }
 0x98e   : > { %v2938_v19 = vpop.f32.mrf.mxu1 }
 0x98f   : > { %v2939_v9 = vadd.f32 %v5972_v28, %v2938_v19 }
 0x991   : > { %v2974_v52 = vmax.f32 %v2939_v9, 0.0 }
 0x993   : > { %4490 = vmatmul.msk.f32.gmra.mxu2 %vm641_vm1, %v2974_v52 }
 0x996   : > { %v2941_v12 = vpop.f32.mrf.mxu1 }
 0x997   : > { %v2942_v50 = vadd.f32 %v5972_v28, %v2941_v12 }
 0x999   : > { %v2975_v45 = vmax.f32 %v2942_v50, 0.0 }
 0x99b   : > { %4491 = vmatmul.msk.f32.gmra.mxu2 %vm641_vm1, %v2975_v45 }
 0x99e   : > { %v2944_v56 = vpop.f32.mrf.mxu1 }
 0x99f   : > { %v2945_v60 = vadd.f32 %v5972_v28, %v2944_v56 }
 0x9a1   : > { %v2976_v17 = vmax.f32 %v2945_v60, 0.0 }
 0x9a3   : > { %4492 = vmatmul.msk.f32.gmra.mxu2 %vm641_vm1, %v2976_v17 }
 0x9a6   : > { %v2947_v49 = vpop.f32.mrf.mxu1 }
 0x9a7   : > { %v2948_v18 = vadd.f32 %v5972_v28, %v2947_v49 }
 0x9a9   : > { %v2977_v15 = vmax.f32 %v2948_v18, 0.0 }
 0x9ab   : > { %4493 = vmatmul.msk.f32.gmra.mxu2 %vm641_vm1, %v2977_v15 }
 0x9ae   : > { %v2950_v10 = vpop.f32.mrf.mxu1 }
 0x9af   : > { %v2951_v63 = vadd.f32 %v5972_v28, %v2950_v10 }
 0x9b1   : > { %v2978_v26 = vmax.f32 %v2951_v63, 0.0 }
 0x9b3   : > { %4494 = vmatmul.msk.f32.gmra.mxu2 %vm641_vm1, %v2978_v26 }
 0x9b6   : > { %v2953_v34 = vpop.f32.mrf.mxu1 }
 0x9b7   : > { %v2954_v8 = vadd.f32 %v5972_v28, %v2953_v34 }
 0x9b9   : > { %v2979_v7 = vmax.f32 %v2954_v8, 0.0 }
 0x9bb   : > { %4495 = vmatmul.msk.f32.gmra.mxu2 %vm641_vm1, %v2979_v7 }
 0x9be   : > { %v2956_v24 = vpop.f32.mrf.mxu1 }
 0x9bf   : > { %v2957_v21 = vadd.f32 %v5972_v28, %v2956_v24 }
 0x9c1   : > { %v2980_v41 = vmax.f32 %v2957_v21, 0.0 }
 0x9c3   : > { %4496 = vmatmul.msk.f32.gmra.mxu2 %vm641_vm1, %v2980_v41 }
 0x9c6   : > { %v2959_v58 = vpop.f32.mrf.mxu1 }
 0x9c7   : > { %v2960_v5 = vadd.f32 %v5972_v28, %v2959_v58 }
 0x9c9   : > { %v2981_v32 = vmax.f32 %v2960_v5, 0.0 }
 0x9cb   : > { %4497 = vmatmul.msk.f32.gmra.mxu2 %vm641_vm1, %v2981_v32 }
 0x9ce   : > { %v2962_v33 = vpop.f32.mrf.mxu1 }
 0x9cf   : > { %v2963_v47 = vadd.f32 %v5972_v28, %v2962_v33 }
 0x9d1   : > { %v2982_v0 = vmax.f32 %v2963_v47, 0.0 }
 0x9d3   : > { %4498 = vmatmul.msk.f32.gmra.mxu2 %vm641_vm1, %v2982_v0 }
 0x9d6   : > { %v2965_v13 = vpop.f32.mrf.mxu1 }
 0x9d7   : > { %v2966_v35 = vadd.f32 %v5972_v28, %v2965_v13 }
 0x9d9   : > { %v2983_v27 = vmax.f32 %v2966_v35, 0.0 }
 0x9db   : > { %4499 = vmatmul.msk.f32.gmra.mxu2 %vm641_vm1, %v2983_v27 }
 0x9e6   : > { %v3059_v22 = vpop.f32.mrf.mxu2 }
 0x9e7   : > { %v3060_v6 = vadd.f32 %v4550_v1, %v3059_v22 }
 0x9e9   : > { %v3107_v40 = vmax.f32 %v3060_v6, 0.0 }
 0x9eb   : > { %4505 = vmatmul.msk.f32.vlgmr.msra.gmra.mxu3 %vm641_vm1, %v3107_v40 }
 0x9ee   : > { %v3062_v48 = vpop.f32.mrf.mxu2 }
 0x9ef   : > { %v3063_v59 = vadd.f32 %v4550_v1, %v3062_v48 }
 0x9f1   : > { %v3108_v43 = vmax.f32 %v3063_v59, 0.0  ;;  %v6037_v59 = vld [vmem:[%s6364_s7 + $0x3] ss:$0 sm:$0xff] }
 0x9f3   : > { %4506 = vmatmul.msk.f32.gmra.mxu3 %vm641_vm1, %v3108_v43 }
 0x9f6   : > { %v3065_v30 = vpop.f32.mrf.mxu2 }
 0x9f7   : > { %v3066_v42 = vadd.f32 %v4550_v1, %v3065_v30 }
 0x9f9   : > { %v3109_v28 = vmax.f32 %v3066_v42, 0.0  ;;  %v6043_v42 = vld [vmem:[%s6365_s8] ss:$0 sm:$0xff] }
 0x9fb   : > { %4507 = vmatmul.msk.f32.gmra.mxu3 %vm641_vm1, %v3109_v28 }
 0x9fe   : > { %v3068_v53 = vpop.f32.mrf.mxu2 }
 0x9ff   : > { %v3069_v55 = vadd.f32 %v4550_v1, %v3068_v53 }
 0xa01   : > { %v3110_v54 = vmax.f32 %v3069_v55, 0.0 }
 0xa03   : > { %4508 = vmatmul.msk.f32.gmra.mxu3 %vm641_vm1, %v3110_v54 }
 0xa06   : > { %v3071_v46 = vpop.f32.mrf.mxu2 }
 0xa07   : > { %v3072_v19 = vadd.f32 %v4550_v1, %v3071_v46 }
 0xa09   : > { %v3111_v9 = vmax.f32 %v3072_v19, 0.0 }
 0xa0b   : > { %4509 = vmatmul.msk.f32.gmra.mxu3 %vm641_vm1, %v3111_v9 }
 0xa0e   : > { %v3074_v52 = vpop.f32.mrf.mxu2 }
 0xa0f   : > { %v3075_v12 = vadd.f32 %v4550_v1, %v3074_v52 }
 0xa11   : > { %v3112_v50 = vmax.f32 %v3075_v12, 0.0 }
 0xa13   : > { %4510 = vmatmul.msk.f32.gmra.mxu3 %vm641_vm1, %v3112_v50 }
 0xa16   : > { %v3077_v45 = vpop.f32.mrf.mxu2 }
 0xa17   : > { %v3078_v56 = vadd.f32 %v4550_v1, %v3077_v45 }
 0xa19   : > { %v3113_v60 = vmax.f32 %v3078_v56, 0.0 }
 0xa1b   : > { %4511 = vmatmul.msk.f32.gmra.mxu3 %vm641_vm1, %v3113_v60 }
 0xa1e   : > { %v3080_v17 = vpop.f32.mrf.mxu2 }
 0xa1f   : > { %v3081_v49 = vadd.f32 %v4550_v1, %v3080_v17 }
 0xa21   : > { %v3114_v18 = vmax.f32 %v3081_v49, 0.0 }
 0xa23   : > { %4512 = vmatmul.msk.f32.gmra.mxu3 %vm641_vm1, %v3114_v18 }
 0xa26   : > { %v3083_v15 = vpop.f32.mrf.mxu2 }
 0xa27   : > { %v3084_v3 = vadd.f32 %v4550_v1, %v3083_v15 }
 0xa29   : > { %v3115_v10 = vmax.f32 %v3084_v3, 0.0 }
 0xa2b   : > { %4513 = vmatmul.msk.f32.gmra.mxu3 %vm641_vm1, %v3115_v10 }
 0xa2e   : > { %v3086_v63 = vpop.f32.mrf.mxu2 }
 0xa2f   : > { %v3087_v26 = vadd.f32 %v4550_v1, %v3086_v63 }
 0xa31   : > { %v3116_v34 = vmax.f32 %v3087_v26, 0.0 }
 0xa33   : > { %4514 = vmatmul.msk.f32.gmra.mxu3 %vm641_vm1, %v3116_v34 }
 0xa36   : > { %v3089_v8 = vpop.f32.mrf.mxu2 }
 0xa37   : > { %v3090_v7 = vadd.f32 %v4550_v1, %v3089_v8 }
 0xa39   : > { %v3117_v24 = vmax.f32 %v3090_v7, 0.0 }
 0xa3b   : > { %4515 = vmatmul.msk.f32.gmra.mxu3 %vm641_vm1, %v3117_v24 }
 0xa3e   : > { %v3092_v21 = vpop.f32.mrf.mxu2 }
 0xa3f   : > { %v3093_v41 = vadd.f32 %v4550_v1, %v3092_v21 }
 0xa41   : > { %v3118_v58 = vmax.f32 %v3093_v41, 0.0 }
 0xa43   : > { %4516 = vmatmul.msk.f32.gmra.mxu3 %vm641_vm1, %v3118_v58 }
 0xa46   : > { %v3095_v5 = vpop.f32.mrf.mxu2 }
 0xa47   : > { %v3096_v32 = vadd.f32 %v4550_v1, %v3095_v5 }
 0xa49   : > { %v3119_v33 = vmax.f32 %v3096_v32, 0.0 }
 0xa4b   : > { %4517 = vmatmul.msk.f32.gmra.mxu3 %vm641_vm1, %v3119_v33 }
 0xa4e   : > { %v3098_v47 = vpop.f32.mrf.mxu2 }
 0xa4f   : > { %v3099_v0 = vadd.f32 %v4550_v1, %v3098_v47 }
 0xa51   : > { %v3120_v13 = vmax.f32 %v3099_v0, 0.0 }
 0xa53   : > { %4518 = vmatmul.msk.f32.gmra.mxu3 %vm641_vm1, %v3120_v13 }
 0xa56   : > { %v3101_v35 = vpop.f32.mrf.mxu2 }
 0xa57   : > { %v3102_v27 = vadd.f32 %v4550_v1, %v3101_v35 }
 0xa59   : > { %v3121_v22 = vmax.f32 %v3102_v27, 0.0 }
 0xa5b   : > { %4519 = vmatmul.msk.f32.gmra.mxu3 %vm641_vm1, %v3121_v22 }
 0xa5e   : > { %v3104_v6 = vpop.f32.mrf.mxu2 }
 0xa5f   : > { %v3105_v40 = vadd.f32 %v4550_v1, %v3104_v6 }
 0xa61   : > { %v3122_v48 = vmax.f32 %v3105_v40, 0.0 }
 0xa63   : > { %4520 = vmatmul.msk.f32.gmra.mxu3 %vm641_vm1, %v3122_v48 }
 0xa6e   : > { %v3198_v43 = vpop.f32.mrf.mxu3 }
 0xa6f   : > { %v3199_v30 = vadd.f32 %v6037_v59, %v3198_v43 }
 0xa71   : > { %v3246_v28 = vadd.f32 %v3199_v30, %v5336_v61 }
 0xa73   : > { %v3266_v1 = vmul.f32 %v6043_v42, %v3246_v28 }
 0xa75   : > { %3926 = vst.msk [vmem:[%s6050_s30] sm:$0xff] %vm503_vm0, %v3266_v1  ;;  %v3302_v53 = vand.u32 2147483647, %v3266_v1 }
 0xa76   : > { %v3201_v55 = vpop.f32.mrf.mxu3 }
 0xa77   : > { %v3202_v54 = vadd.f32 %v6037_v59, %v3201_v55  ;;  %v3318_v46 = vsub.f32 0.0, %v3302_v53 }
 0xa79   : > { %v3247_v19 = vadd.f32 %v3202_v54, %v5342_v14  ;;  %v3334_v9 = vmul.f32 1.442695, %v3318_v46 }
 0xa7b   : > { %v6058_v61 = vmul.f32 %v6043_v42, %v3247_v19  ;;  %4605 = vpow2.f32 %v3334_v9 }
 0xa7d   : > { %3927 = vst.msk [vmem:[%s6050_s30 + $0x8] sm:$0xff] %vm503_vm0, %v6058_v61  ;;  %v3303_v52 = vand.u32 2147483647, %v6058_v61 }
 0xa7e   : > { %v3204_v12 = vpop.f32.mrf.mxu3 }
 0xa7f   : > { %v3205_v50 = vadd.f32 %v6037_v59, %v3204_v12  ;;  %v3319_v45 = vsub.f32 0.0, %v3303_v52 }
 0xa81   : > { %v4606_v56 = vpop.eup %4605  ;;  %v3248_v14 = vadd.f32 %v3205_v50, %v5351_v20  ;;  %v3336_v60 = vmul.f32 1.442695, %v3319_v45 }
 0xa82   : > { %v3366_v17 = vadd.f32 1.0, %v4606_v56  ;;  %v3369_v49 = vmul.f32 -0.5, %v4606_v56  ;;  %v3372_v26 = vand.u32 2147483647, %v4606_v56 }
 0xa83   : > { %v6069_v18 = vmul.f32 %v6043_v42, %v3248_v14  ;;  %4607 = vpow2.f32 %v3336_v60 }
 0xa84   : > { %4609 = vlog2.f32 %v3366_v17  ;;  %v3370_v10 = vadd.f32 1.0, %v3369_v49  ;;  %vm3373_vm15 = vcmp.lt.f32.partialorder %v3372_v26, 0.0004427343 }
 0xa85   : > { %3928 = vst.msk [vmem:[%s6050_s30 + $0x10] sm:$0xff] %vm503_vm0, %v6069_v18  ;;  %v3304_v15 = vand.u32 2147483647, %v6069_v18 }
 0xa86   : > { %v3207_v3 = vpop.f32.mrf.mxu3  ;;  %v3371_v21 = vmul.f32 %v4606_v56, %v3370_v10 }
 0xa87   : > { %v3208_v63 = vadd.f32 %v6037_v59, %v3207_v3  ;;  %v3320_v20 = vsub.f32 0.0, %v3304_v15 }
 0xa89   : > { %v4608_v34 = vpop.eup %4607  ;;  %v3249_v8 = vadd.f32 %v3208_v63, %v5357_v25  ;;  %v3338_v7 = vmul.f32 1.442695, %v3320_v20 }
 0xa8a   : > { %v4610_v24 = vpop.eup %4609  ;;  %v3375_v41 = vadd.f32 1.0, %v4608_v34  ;;  %v3378_v32 = vmul.f32 -0.5, %v4608_v34  ;;  %v3381_v6 = vand.u32 2147483647, %v4608_v34 }
 0xa8b   : > { %v6080_v58 = vmul.f32 %v6043_v42, %v3249_v8  ;;  %v3368_v5 = vmul.f32 0.6931472, %v4610_v24  ;;  %4611 = vpow2.f32 %v3338_v7 }
 0xa8c   : > { %4613 = vlog2.f32 %v3375_v41  ;;  %v3379_v35 = vadd.f32 1.0, %v3378_v32  ;;  %vm3382_vm1 = vcmp.lt.f32.partialorder %v3381_v6, 0.0004427343 }
 0xa8d   : > { %3929 = vst.msk [vmem:[%s6050_s30 + $0x18] sm:$0xff] %vm503_vm0, %v6080_v58  ;;  %v3374_v33 = vsel %vm3373_vm15, %v3371_v21, %v3368_v5  ;;  %v3305_v47 = vand.u32 2147483647, %v6080_v58 }
 0xa8e   : > { %v3210_v0 = vpop.f32.mrf.mxu3  ;;  %v3510_v25 = vmul.f32 2.0, %v3374_v33  ;;  %v3380_v19 = vmul.f32 %v4608_v34, %v3379_v35 }
 0xa8f   : > { %v3211_v13 = vadd.f32 %v6037_v59, %v3210_v0  ;;  %v3321_v27 = vsub.f32 0.0, %v3305_v47 }
 0xa90   : > { %v3526_v22 = vadd.f32 %v3510_v25, %v3302_v53 }
 0xa91   : > { %v4612_v40 = vpop.eup %4611  ;;  %v3250_v48 = vadd.f32 %v3211_v13, %v5363_v31  ;;  %v3340_v43 = vmul.f32 1.442695, %v3321_v27 }
 0xa92   : > { %v4614_v30 = vpop.eup %4613  ;;  %v3542_v28 = vsub.f32 0.0, %v3526_v22  ;;  %v3384_v1 = vadd.f32 1.0, %v4612_v40  ;;  %v3387_v55 = vmul.f32 -0.5, %v4612_v40  ;;  %v3390_v17 = vand.u32 2147483647, %v4612_v40 }
 0xa93   : > { %v6091_v54 = vmul.f32 %v6043_v42, %v3250_v48  ;;  %v3377_v46 = vmul.f32 0.6931472, %v4614_v30  ;;  %4615 = vpow2.f32 %v3340_v43 }
 0xa94   : > { %v3558_v9 = vsel %vm503_vm0, %v3542_v28, 0.0  ;;  %4617 = vlog2.f32 %v3384_v1  ;;  %v3388_v45 = vadd.f32 1.0, %v3387_v55  ;;  %vm3391_vm2 = vcmp.lt.f32.partialorder %v3390_v17, 0.0004427343 }
 0xa95   : > { %3930 = vst.msk [vmem:[%s6050_s30 + $0x20] sm:$0xff] %vm503_vm0, %v6091_v54  ;;  %3559 = vadd.xlane.f32.xlu0 %v3558_v9  ;;  %v3383_v31 = vsel %vm3382_vm1, %v3380_v19, %v3377_v46  ;;  %v3306_v53 = vand.u32 2147483647, %v6091_v54 }
 0xa96   : > { %v3213_v12 = vpop.f32.mrf.mxu3  ;;  %v3511_v50 = vmul.f32 2.0, %v3383_v31  ;;  %v3389_v26 = vmul.f32 %v4612_v40, %v3388_v45 }
 0xa97   : > { %v3214_v56 = vadd.f32 %v6037_v59, %v3213_v12  ;;  %v3322_v14 = vsub.f32 0.0, %v3306_v53 }
 0xa98   : > { %v3527_v60 = vadd.f32 %v3511_v50, %v3303_v52 }
 0xa99   : > { %v4616_v49 = vpop.eup %4615  ;;  %v3251_v3 = vadd.f32 %v3214_v56, %v5369_v36  ;;  %v3342_v10 = vmul.f32 1.442695, %v3322_v14 }
 0xa9a   : > { %v4618_v63 = vpop.eup %4617  ;;  %v3543_v20 = vsub.f32 0.0, %v3527_v60  ;;  %v3393_v34 = vadd.f32 1.0, %v4616_v49  ;;  %v3396_v24 = vmul.f32 -0.5, %v4616_v49  ;;  %v3399_v25 = vand.u32 2147483647, %v4616_v49 }
 0xa9b   : > { %v6105_v8 = vmul.f32 %v6043_v42, %v3251_v3  ;;  %v3386_v7 = vmul.f32 0.6931472, %v4618_v63  ;;  %4619 = vpow2.f32 %v3342_v10 }
 0xa9c   : > { %v3561_v21 = vsel %vm503_vm0, %v3543_v20, 0.0  ;;  %4621 = vlog2.f32 %v3393_v34  ;;  %v3397_v32 = vadd.f32 1.0, %v3396_v24  ;;  %vm3400_vm3 = vcmp.lt.f32.partialorder %v3399_v25, 0.0004427343 }
 0xa9d   : > { %3931 = vst.msk [vmem:[%s6050_s30 + $0x28] sm:$0xff] %vm503_vm0, %v6105_v8  ;;  %3562 = vadd.xlane.f32.xlu0 %v3561_v21  ;;  %v3392_v36 = vsel %vm3391_vm2, %v3389_v26, %v3386_v7  ;;  %v3307_v61 = vand.u32 2147483647, %v6105_v8 }
 0xa9e   : > { %v3216_v52 = vpop.f32.mrf.mxu3  ;;  %v3512_v41 = vmul.f32 2.0, %v3392_v36  ;;  %v3398_v28 = vmul.f32 %v4616_v49, %v3397_v32 }
 0xa9f   : > { %v3217_v5 = vadd.f32 %v6037_v59, %v3216_v52  ;;  %v3323_v33 = vsub.f32 0.0, %v3307_v61 }
 0xaa0   : > { %v3528_v0 = vadd.f32 %v3512_v41, %v3304_v15 }
 0xaa1   : > { %v4620_v13 = vpop.eup %4619  ;;  %v3252_v35 = vadd.f32 %v3217_v5, %v5378_v44  ;;  %v3344_v27 = vmul.f32 1.442695, %v3323_v33 }
 0xaa2   : > { %v4622_v22 = vpop.eup %4621  ;;  %v3544_v6 = vsub.f32 0.0, %v3528_v0  ;;  %v3402_v40 = vadd.f32 1.0, %v4620_v13  ;;  %v3405_v48 = vmul.f32 -0.5, %v4620_v13  ;;  %v3408_v12 = vand.u32 2147483647, %v4620_v13 }
 0xaa3   : > { %v6119_v43 = vmul.f32 %v6043_v42, %v3252_v35  ;;  %v3395_v30 = vmul.f32 0.6931472, %v4622_v22  ;;  %4623 = vpow2.f32 %v3344_v27 }
 0xaa4   : > { %v3564_v1 = vsel %vm503_vm0, %v3544_v6, 0.0  ;;  %4625 = vlog2.f32 %v3402_v40  ;;  %v3406_v46 = vadd.f32 1.0, %v3405_v48  ;;  %vm3409_vm4 = vcmp.lt.f32.partialorder %v3408_v12, 0.0004427343 }
 0xaa5   : > { %3932 = vst.msk [vmem:[%s6050_s30 + $0x30] sm:$0xff] %vm503_vm0, %v6119_v43  ;;  %3565 = vadd.xlane.f32.xlu1 %v3564_v1  ;;  %v3401_v44 = vsel %vm3400_vm3, %v3398_v28, %v3395_v30  ;;  %v3308_v18 = vand.u32 2147483647, %v6119_v43 }
 0xaa6   : > { %v3219_v15 = vpop.f32.mrf.mxu3  ;;  %v3513_v55 = vmul.f32 2.0, %v3401_v44  ;;  %v3407_v17 = vmul.f32 %v4620_v13, %v3406_v46 }
 0xaa7   : > { %v3220_v19 = vadd.f32 %v6037_v59, %v3219_v15  ;;  %v3324_v9 = vsub.f32 0.0, %v3308_v18 }
 0xaa8   : > { %v3529_v31 = vadd.f32 %v3513_v55, %v3305_v47 }
 0xaa9   : > { %v4624_v50 = vpop.eup %4623  ;;  %v3253_v45 = vadd.f32 %v3220_v19, %v5384_v51  ;;  %v3346_v56 = vmul.f32 1.442695, %v3324_v9 }
 0xaaa   : > { %v4626_v14 = vpop.eup %4625  ;;  %v3545_v60 = vsub.f32 0.0, %v3529_v31  ;;  %v3411_v49 = vadd.f32 1.0, %v4624_v50  ;;  %v3414_v63 = vmul.f32 -0.5, %v4624_v50  ;;  %v3417_v36 = vand.u32 2147483647, %v4624_v50 }
 0xaab   : > { %v6133_v3 = vmul.f32 %v6043_v42, %v3253_v45  ;;  %v3404_v10 = vmul.f32 0.6931472, %v4626_v14  ;;  %4627 = vpow2.f32 %v3346_v56 }
 0xaac   : > { %v3567_v20 = vsel %vm503_vm0, %v3545_v60, 0.0  ;;  %4629 = vlog2.f32 %v3411_v49  ;;  %v3415_v7 = vadd.f32 1.0, %v3414_v63  ;;  %vm3418_vm5 = vcmp.lt.f32.partialorder %v3417_v36, 0.0004427343 }
 0xaad   : > { %3933 = vst.msk [vmem:[%s6050_s30 + $0x38] sm:$0xff] %vm503_vm0, %v6133_v3  ;;  %3568 = vadd.xlane.f32.xlu1 %v3567_v20  ;;  %v3410_v51 = vsel %vm3409_vm4, %v3407_v17, %v3404_v10  ;;  %v3309_v58 = vand.u32 2147483647, %v6133_v3 }
 0xaae   : > { %v3222_v47 = vpop.f32.mrf.mxu3  ;;  %v3514_v26 = vmul.f32 2.0, %v3410_v51  ;;  %v3416_v27 = vmul.f32 %v4624_v50, %v3415_v7 }
 0xaaf   : > { %v3223_v34 = vadd.f32 %v6037_v59, %v3222_v47  ;;  %v3325_v24 = vsub.f32 0.0, %v3309_v58 }
 0xab0   : > { %v3530_v21 = vadd.f32 %v3514_v26, %v3306_v53 }
 0xab1   : > { %v4628_v52 = vpop.eup %4627  ;;  %v3254_v41 = vadd.f32 %v3223_v34, %v5390_v57  ;;  %v3348_v5 = vmul.f32 1.442695, %v3325_v24 }
 0xab2   : > { %v4630_v32 = vpop.eup %4629  ;;  %v3546_v33 = vsub.f32 0.0, %v3530_v21  ;;  %v3420_v0 = vadd.f32 1.0, %v4628_v52  ;;  %v3423_v25 = vmul.f32 -0.5, %v4628_v52  ;;  %v3426_v1 = vand.u32 2147483647, %v4628_v52 }
 0xab3   : > { %v6147_v13 = vmul.f32 %v6043_v42, %v3254_v41  ;;  %v3413_v35 = vmul.f32 0.6931472, %v4630_v32  ;;  %4631 = vpow2.f32 %v3348_v5 }
 0xab4   : > { %v3570_v22 = vsel %vm503_vm0, %v3546_v33, 0.0  ;;  %4633 = vlog2.f32 %v3420_v0  ;;  %v3424_v40 = vadd.f32 1.0, %v3423_v25  ;;  %vm3427_vm6 = vcmp.lt.f32.partialorder %v3426_v1, 0.0004427343 }
 0xab5   : > { %3934 = vst.msk [vmem:[%s6050_s30 + $0x40] sm:$0xff] %vm503_vm0, %v6147_v13  ;;  %3571 = vadd.xlane.f32.xlu2 %v3570_v22  ;;  %v3419_v57 = vsel %vm3418_vm5, %v3416_v27, %v3413_v35  ;;  %v3310_v54 = vand.u32 2147483647, %v6147_v13 }
 0xab6   : > { %v3225_v53 = vpop.f32.mrf.mxu3  ;;  %v3515_v6 = vmul.f32 2.0, %v3419_v57  ;;  %v3425_v9 = vmul.f32 %v4628_v52, %v3424_v40 }
 0xab7   : > { %v3226_v48 = vadd.f32 %v6037_v59, %v3225_v53  ;;  %v3326_v30 = vsub.f32 0.0, %v3310_v54 }
 0xab8   : > { %v3531_v28 = vadd.f32 %v3515_v6, %v3307_v61 }
 0xab9   : > { %v4632_v44 = vpop.eup %4631  ;;  %v3255_v15 = vadd.f32 %v3226_v48, %v5396_v62  ;;  %v3350_v55 = vmul.f32 1.442695, %v3326_v30 }
 0xaba   : > { %v4634_v46 = vpop.eup %4633  ;;  %v3547_v19 = vsub.f32 0.0, %v3531_v28  ;;  %v3429_v31 = vadd.f32 1.0, %v4632_v44  ;;  %v3432_v45 = vmul.f32 -0.5, %v4632_v44  ;;  %v3435_v63 = vand.u32 2147483647, %v4632_v44 }
 0xabb   : > { %v6161_v12 = vmul.f32 %v6043_v42, %v3255_v15  ;;  %v3422_v50 = vmul.f32 0.6931472, %v4634_v46  ;;  %4635 = vpow2.f32 %v3350_v55  ;;  %v3621_v55 = vand.u32 2147483647, %v5861_v39 }
 0xabc   : > { %v3573_v56 = vsel %vm503_vm0, %v3547_v19, 0.0  ;;  %4637 = vlog2.f32 %v3429_v31  ;;  %v3433_v17 = vadd.f32 1.0, %v3432_v45  ;;  %vm3436_vm7 = vcmp.lt.f32.partialorder %v3435_v63, 0.0004427343 }
 0xabd   : > { %3935 = vst.msk [vmem:[%s6050_s30 + $0x48] sm:$0xff] %vm503_vm0, %v6161_v12  ;;  %3574 = vadd.xlane.f32.xlu2 %v3573_v56  ;;  %v3428_v62 = vsel %vm3427_vm6, %v3425_v9, %v3422_v50  ;;  %v3311_v8 = vand.u32 2147483647, %v6161_v12 }
 0xabe   : > { %v3228_v61 = vpop.f32.mrf.mxu3  ;;  %v3516_v14 = vmul.f32 2.0, %v3428_v62  ;;  %v3434_v52 = vmul.f32 %v4632_v44, %v3433_v17 }
 0xabf   : > { %v3229_v60 = vadd.f32 %v6037_v59, %v3228_v61  ;;  %v3327_v49 = vsub.f32 0.0, %v3311_v8 }
 0xac0   : > { %v3532_v10 = vadd.f32 %v3516_v14, %v3308_v18 }
 0xac1   : > { %v4636_v20 = vpop.eup %4635  ;;  %v3256_v51 = vadd.f32 %v3229_v60, %v5405_v4  ;;  %v3352_v47 = vmul.f32 1.442695, %v3327_v49  ;;  %v3637_v49 = vsub.f32 0.0, %v3621_v55 }
 0xac2   : > { %v4638_v26 = vpop.eup %4637  ;;  %v3548_v34 = vsub.f32 0.0, %v3532_v10  ;;  %v3438_v7 = vadd.f32 1.0, %v4636_v20  ;;  %v3441_v24 = vmul.f32 -0.5, %v4636_v20  ;;  %v3444_v35 = vand.u32 2147483647, %v4636_v20 }
 0xac3   : > { %v6175_v21 = vmul.f32 %v6043_v42, %v3256_v51  ;;  %v3431_v36 = vmul.f32 0.6931472, %v4638_v26  ;;  %4639 = vpow2.f32 %v3352_v47  ;;  %v3619_v51 = vand.u32 2147483647, %v5834_v11 }
 0xac4   : > { %v3576_v41 = vsel %vm503_vm0, %v3548_v34, 0.0  ;;  %4641 = vlog2.f32 %v3438_v7  ;;  %v3442_v32 = vadd.f32 1.0, %v3441_v24  ;;  %vm3445_vm8 = vcmp.lt.f32.partialorder %v3444_v35, 0.0004427343 }
 0xac5   : > { %3936 = vst.msk [vmem:[%s6050_s30 + $0x50] sm:$0xff] %vm503_vm0, %v6175_v21  ;;  %3577 = vadd.xlane.f32.xlu0 %v3576_v41  ;;  %v3437_v4 = vsel %vm3436_vm7, %v3434_v52, %v3431_v36  ;;  %v3312_v43 = vand.u32 2147483647, %v6175_v21  ;;  %v3668_v7 = vmul.f32 1.442695, %v3637_v49 }
 0xac6   : > { %v3231_v18 = vpop.f32.mrf.mxu3  ;;  %v3517_v5 = vmul.f32 2.0, %v3437_v4  ;;  %v3443_v40 = vmul.f32 %v4636_v20, %v3442_v32  ;;  %v3635_v32 = vsub.f32 0.0, %v3619_v51 }
 0xac7   : > { %v3232_v33 = vadd.f32 %v6037_v59, %v3231_v18  ;;  %v3328_v0 = vsub.f32 0.0, %v3312_v43 }
 0xac8   : > { %v3533_v25 = vadd.f32 %v3517_v5, %v3309_v58 }
 0xac9   : > { %v4640_v27 = vpop.eup %4639  ;;  %v3257_v22 = vadd.f32 %v3232_v33, %v5411_v2  ;;  %v3354_v57 = vmul.f32 1.442695, %v3328_v0 }
 0xaca   : > { %v4642_v53 = vpop.eup %4641  ;;  %v3549_v6 = vsub.f32 0.0, %v3533_v25  ;;  %v3447_v48 = vadd.f32 1.0, %v4640_v27  ;;  %v3450_v1 = vmul.f32 -0.5, %v4640_v27  ;;  %v3453_v50 = vand.u32 2147483647, %v4640_v27 }
 0xacb   : > { %v6189_v30 = vmul.f32 %v6043_v42, %v3257_v22  ;;  %v3440_v28 = vmul.f32 0.6931472, %v4642_v53  ;;  %4643 = vpow2.f32 %v3354_v57  ;;  %v3620_v53 = vand.u32 2147483647, %v5849_v37 }
 0xacc   : > { %v3579_v44 = vsel %vm503_vm0, %v3549_v6, 0.0  ;;  %4645 = vlog2.f32 %v3447_v48  ;;  %v3451_v19 = vadd.f32 1.0, %v3450_v1  ;;  %vm3454_vm9 = vcmp.lt.f32.partialorder %v3453_v50, 0.0004427343 }
 0xacd   : > { %3937 = vst.msk [vmem:[%s6050_s30 + $0x58] sm:$0xff] %vm503_vm0, %v6189_v30  ;;  %3580 = vadd.xlane.f32.xlu1 %v3579_v44  ;;  %v3446_v2 = vsel %vm3445_vm8, %v3443_v40, %v3440_v28  ;;  %v3313_v3 = vand.u32 2147483647, %v6189_v30  ;;  %v3664_v48 = vmul.f32 1.442695, %v3635_v32 }
 0xace   : > { %v3234_v58 = vpop.f32.mrf.mxu3  ;;  %v3518_v15 = vmul.f32 2.0, %v3446_v2  ;;  %v3452_v20 = vmul.f32 %v4640_v27, %v3451_v19 }
 0xacf   : > { %v3235_v46 = vadd.f32 %v6037_v59, %v3234_v58  ;;  %v3329_v9 = vsub.f32 0.0, %v3313_v3 }
 0xad0   : > { %v3534_v31 = vadd.f32 %v3518_v15, %v3310_v54 }
 0xad1   : > { %v4644_v45 = vpop.eup %4643  ;;  %v3258_v56 = vadd.f32 %v3235_v46, %v5417_v16  ;;  %v3356_v62 = vmul.f32 1.442695, %v3329_v9 }
 0xad2   : > { %v4646_v61 = vpop.eup %4645  ;;  %v3550_v14 = vsub.f32 0.0, %v3534_v31  ;;  %v3456_v60 = vadd.f32 1.0, %v4644_v45  ;;  %v3459_v17 = vmul.f32 -0.5, %v4644_v45  ;;  %v3462_v41 = vand.u32 2147483647, %v4644_v45 }
 0xad3   : > { %v6206_v10 = vmul.f32 %v6043_v42, %v3258_v56  ;;  %v3449_v63 = vmul.f32 0.6931472, %v4646_v61  ;;  %4647 = vpow2.f32 %v3356_v62  ;;  %v3636_v31 = vsub.f32 0.0, %v3620_v53 }
 0xad4   : > { %v3582_v13 = vsel %vm503_vm0, %v3550_v14, 0.0  ;;  %4649 = vlog2.f32 %v3456_v60  ;;  %v3460_v34 = vadd.f32 1.0, %v3459_v17  ;;  %vm3463_vm10 = vcmp.lt.f32.partialorder %v3462_v41, 0.0004427343 }
 0xad5   : > { %3938 = vst.msk [vmem:[%s6050_s30 + $0x60] sm:$0xff] %vm503_vm0, %v6206_v10  ;;  %3583 = vadd.xlane.f32.xlu2 %v3582_v13  ;;  %v3455_v16 = vsel %vm3454_vm9, %v3452_v20, %v3449_v63  ;;  %v3314_v54 = vand.u32 2147483647, %v6206_v10  ;;  %4651 = vpow2.f32 %v3668_v7  ;;  %v3666_v49 = vmul.f32 1.442695, %v3636_v31 }
 0xad6   : > { %v3237_v47 = vpop.f32.mrf.mxu3  ;;  %v3519_v26 = vmul.f32 2.0, %v3455_v16  ;;  %v3461_v25 = vmul.f32 %v4644_v45, %v3460_v34  ;;  %v6255_v34 = vpop.xlane.xlu0 %3869 }
 0xad7   : > { %v3238_v24 = vadd.f32 %v6037_v59, %v3237_v47  ;;  %v3330_v36 = vsub.f32 0.0, %v3314_v54 }
 0xad8   : > { %v3535_v52 = vadd.f32 %v3519_v26, %v3311_v8 }
 0xad9   : > { %v4648_v4 = vpop.eup %4647  ;;  %v3259_v18 = vadd.f32 %v3238_v24, %v5423_v23  ;;  %v3358_v5 = vmul.f32 1.442695, %v3330_v36 }
 0xada   : > { %v4650_v33 = vpop.eup %4649  ;;  %v3551_v0 = vsub.f32 0.0, %v3535_v52  ;;  %v3465_v35 = vadd.f32 1.0, %v4648_v4  ;;  %v3468_v12 = vmul.f32 -0.5, %v4648_v4  ;;  %v3471_v15 = vand.u32 2147483647, %v4648_v4 }
 0xadb   : > { %v6223_v27 = vmul.f32 %v6043_v42, %v3259_v18  ;;  %v3458_v22 = vmul.f32 0.6931472, %v4650_v33  ;;  %4653 = vpow2.f32 %v3358_v5  ;;  %v6234_v2 = vpop.eup %4651 }
 0xadc   : > { %v3585_v8 = vsel %vm503_vm0, %v3551_v0, 0.0  ;;  %4655 = vlog2.f32 %v3465_v35  ;;  %v3469_v1 = vadd.f32 1.0, %v3468_v12  ;;  %vm3472_vm11 = vcmp.lt.f32.partialorder %v3471_v15, 0.0004427343 }
 0xadd   : > { %3939 = vst.msk [vmem:[%s6050_s30 + $0x68] sm:$0xff] %vm503_vm0, %v6223_v27  ;;  %3586 = vadd.xlane.f32.xlu0 %v3585_v8  ;;  %v3464_v23 = vsel %vm3463_vm10, %v3461_v25, %v3458_v22  ;;  %v3315_v57 = vand.u32 2147483647, %v6223_v27  ;;  %4657 = vpow2.f32 %v3664_v48  ;;  %v3808_v32 = vmul.f32 -0.5, %v6234_v2 }
 0xade   : > { %v3240_v6 = vpop.f32.mrf.mxu3  ;;  %v3520_v40 = vmul.f32 2.0, %v3464_v23  ;;  %v3470_v21 = vmul.f32 %v4648_v4, %v3469_v1  ;;  %v6276_v48 = vpop.xlane.xlu0 %3878 }
 0xadf   : > { %v3241_v28 = vadd.f32 %v6037_v59, %v3240_v6  ;;  %v3331_v44 = vsub.f32 0.0, %v3315_v57 }
 0xae0   : > { %v3536_v58 = vadd.f32 %v3520_v40, %v3312_v43  ;;  %v6274_v40 = vpop.xlane.xlu1 %3863 }
 0xae1   : > { %v4654_v46 = vpop.eup %4653  ;;  %v3260_v19 = vadd.f32 %v3241_v28, %v5429_v29  ;;  %v3360_v9 = vmul.f32 1.442695, %v3331_v44  ;;  %v3805_v29 = vadd.f32 1.0, %v6234_v2  ;;  %v3811_v44 = vand.u32 2147483647, %v6234_v2 }
 0xae2   : > { %v4656_v50 = vpop.eup %4655  ;;  %v3552_v45 = vsub.f32 0.0, %v3536_v58  ;;  %v3474_v56 = vadd.f32 1.0, %v4654_v46  ;;  %v3477_v62 = vmul.f32 -0.5, %v4654_v46  ;;  %v3480_v24 = vand.u32 2147483647, %v4654_v46 }
 0xae3   : > { %v6242_v61 = vmul.f32 %v6043_v42, %v3260_v19  ;;  %v3467_v14 = vmul.f32 0.6931472, %v4656_v50  ;;  %4659 = vpow2.f32 %v3360_v9  ;;  %v6253_v26 = vpop.eup %4657  ;;  %vm3812_vm14 = vcmp.lt.f32.partialorder %v3811_v44, 0.0004427343 }
 0xae4   : > { %v3588_v43 = vsel %vm503_vm0, %v3552_v45, 0.0  ;;  %4661 = vlog2.f32 %v3474_v56  ;;  %v3478_v13 = vadd.f32 1.0, %v3477_v62  ;;  %vm3481_vm12 = vcmp.lt.f32.partialorder %v3480_v24, 0.0004427343 }
 0xae5   : > { %3940 = vst.msk [vmem:[%s6050_s30 + $0x70] sm:$0xff] %vm503_vm0, %v6242_v61  ;;  %3589 = vadd.xlane.f32.xlu1 %v3588_v43  ;;  %v3473_v60 = vsel %vm3472_vm11, %v3470_v21, %v3467_v14  ;;  %v3316_v17 = vand.u32 2147483647, %v6242_v61  ;;  %4663 = vlog2.f32 %v3805_v29 }
 0xae6   : > { %v3243_v63 = vpop.f32.mrf.mxu3  ;;  %v3521_v20 = vmul.f32 2.0, %v3473_v60  ;;  %4665 = vpow2.f32 %v3666_v49  ;;  %v3479_v18 = vmul.f32 %v4654_v46, %v3478_v13  ;;  %v3790_v46 = vmul.f32 -0.5, %v6253_v26  ;;  %v6288_v13 = vpop.xlane.xlu0 %3887 }
 0xae7   : > { %v3244_v16 = vadd.f32 %v6037_v59, %v3243_v63  ;;  %v3332_v47 = vsub.f32 0.0, %v3316_v17  ;;  %v3793_v63 = vand.u32 2147483647, %v6253_v26 }
 0xae8   : > { %v3537_v7 = vadd.f32 %v3521_v20, %v3313_v3  ;;  %v3791_v49 = vadd.f32 1.0, %v3790_v46  ;;  %v6286_v20 = vpop.xlane.xlu1 %3872 }
 0xae9   : > { %v4660_v36 = vpop.eup %4659  ;;  %v3261_v52 = vadd.f32 %v3244_v16, %v5438_v38  ;;  %v3362_v41 = vmul.f32 1.442695, %v3332_v47  ;;  %v3787_v38 = vadd.f32 1.0, %v6253_v26  ;;  %vm6293_vm15 = vcmp.lt.f32.partialorder %v3793_v63, 0.0004427343 }
 0xaea   : > { %v4662_v4 = vpop.eup %4661  ;;  %v3553_v59 = vsub.f32 0.0, %v3537_v7  ;;  %v3483_v5 = vadd.f32 1.0, %v4660_v36  ;;  %v3486_v30 = vmul.f32 -0.5, %v4660_v36  ;;  %v3489_v1 = vand.u32 2147483647, %v4660_v36 }
 0xaeb   : > { %v6262_v33 = vmul.f32 %v6043_v42, %v3261_v52  ;;  %v3476_v0 = vmul.f32 0.6931472, %v4662_v4  ;;  %4667 = vpow2.f32 %v3362_v41  ;;  %v4664_v22 = vpop.eup %4663  ;;  %v3809_v42 = vadd.f32 1.0, %v3808_v32 }
 0xaec   : > { %v3591_v3 = vsel %vm503_vm0, %v3553_v59, 0.0  ;;  %4669 = vlog2.f32 %v3483_v5  ;;  %v6270_v8 = vpop.eup %4665  ;;  %v3487_v23 = vadd.f32 1.0, %v3486_v30  ;;  %v3807_v15 = vmul.f32 0.6931472, %v4664_v22 }
 0xaed   : > { %3941 = vst.msk [vmem:[%s6050_s30 + $0x78] sm:$0xff] %vm503_vm0, %v6262_v33  ;;  %3592 = vadd.xlane.f32.xlu2 %v3591_v3  ;;  %v3482_v25 = vsel %vm3481_vm12, %v3479_v18, %v3476_v0  ;;  %v3317_v35 = vand.u32 2147483647, %v6262_v33  ;;  %4671 = vlog2.f32 %v3787_v38  ;;  %v3810_v45 = vmul.f32 %v6234_v2, %v3809_v42 }
 0xaee   : > { %v3522_v12 = vmul.f32 2.0, %v3482_v25  ;;  %v3796_v56 = vadd.f32 1.0, %v6270_v8  ;;  %v3488_v14 = vmul.f32 %v4660_v36, %v3487_v23  ;;  %vm3490_vm13 = vcmp.lt.f32.partialorder %v3489_v1, 0.0004427343 }
 0xaef   : > { %v3333_v6 = vsub.f32 0.0, %v3317_v35  ;;  %v3813_v43 = vsel %vm3812_vm14, %v3810_v45, %v3807_v15  ;;  %v3792_v4 = vmul.f32 %v6253_v26, %v3791_v49  ;;  %v3799_v27 = vmul.f32 -0.5, %v6270_v8 }
 0xaf0   : > { %v3538_v28 = vadd.f32 %v3522_v12, %v3314_v54  ;;  %v3829_v7 = vmul.f32 2.0, %v3813_v43  ;;  %v3802_v42 = vand.u32 2147483647, %v6270_v8  ;;  %v3882_v23 = vpop.xlane.xlu1 %3881 }
 0xaf1   : > { %v4668_v58 = vpop.eup %4667  ;;  %v3364_v19 = vmul.f32 1.442695, %v3333_v6  ;;  %v3800_v12 = vadd.f32 1.0, %v3799_v27  ;;  %v6304_v6 = vpop.xlane.xlu0 %3896 }
 0xaf2   : > { %v4670_v9 = vpop.eup %4669  ;;  %v3554_v31 = vsub.f32 0.0, %v3538_v28  ;;  %v3492_v50 = vadd.f32 1.0, %v4668_v58  ;;  %v3495_v10 = vmul.f32 -0.5, %v4668_v58  ;;  %v3498_v47 = vand.u32 2147483647, %v4668_v58 }
 0xaf3   : > { %v3485_v62 = vmul.f32 0.6931472, %v4670_v9  ;;  %4673 = vpow2.f32 %v3364_v19  ;;  %v4672_v29 = vpop.eup %4671  ;;  %v3845_v30 = vadd.f32 %v3829_v7, %v3621_v55  ;;  %v3801_v9 = vmul.f32 %v6270_v8, %v3800_v12  ;;  %v3867_v8 = vpop.xlane.xlu2 %3866 }
 0xaf4   : > { %v3594_v54 = vsel %vm503_vm0, %v3554_v31, 0.0  ;;  %4675 = vlog2.f32 %v3492_v50  ;;  %v3496_v2 = vadd.f32 1.0, %v3495_v10  ;;  %v3789_v36 = vmul.f32 0.6931472, %v4672_v29 }
 0xaf5   : > { %3595 = vadd.xlane.f32.xlu0 %v3594_v54  ;;  %v3491_v21 = vsel %vm3490_vm13, %v3488_v14, %v3485_v62  ;;  %4677 = vlog2.f32 %v3796_v56  ;;  %vm3499_vm1 = vcmp.lt.f32.partialorder %v3498_v47, 0.0004427343  ;;  %v3861_v39 = vsub.f32 0.0, %v3845_v30 }
 0xaf6   : > { %v3523_v60 = vmul.f32 2.0, %v3491_v21  ;;  %v3497_v32 = vmul.f32 %v4668_v58, %v3496_v2  ;;  %v3795_v26 = vsel %vm6293_vm15, %v3792_v4, %v3789_v36  ;;  %vm6309_vm2 = vcmp.lt.f32.partialorder %v3802_v42, 0.0004427343 }
 0xaf7   : > { %v3827_v55 = vmul.f32 2.0, %v3795_v26  ;;  %v3907_v61 = vsel %vm503_vm0, %v3861_v39, 0.0 }
 0xaf8   : > { %v3539_v16 = vadd.f32 %v3523_v60, %v3315_v57  ;;  %v3891_v14 = vpop.xlane.xlu1 %3890 }
 0xaf9   : > { %v4674_v24 = vpop.eup %4673 }
 0xafa   : > { %v4676_v52 = vpop.eup %4675  ;;  %v3555_v41 = vsub.f32 0.0, %v3539_v16  ;;  %v3501_v18 = vadd.f32 1.0, %v4674_v24  ;;  %v3504_v0 = vmul.f32 -0.5, %v4674_v24  ;;  %v3507_v1 = vand.u32 2147483647, %v4674_v24 }
 0xafb   : > { %v3494_v5 = vmul.f32 0.6931472, %v4676_v52  ;;  %v4678_v38 = vpop.eup %4677  ;;  %v3876_v63 = vpop.xlane.xlu2 %3875 }
 0xafc   : > { %v3597_v57 = vsel %vm503_vm0, %v3555_v41, 0.0  ;;  %4679 = vlog2.f32 %v3501_v18  ;;  %v3505_v22 = vadd.f32 1.0, %v3504_v0  ;;  %v3798_v44 = vmul.f32 0.6931472, %v4678_v38 }
 0xafd   : > { %3598 = vadd.xlane.f32.xlu1 %v3597_v57  ;;  %v3500_v3 = vsel %vm3499_vm1, %v3497_v32, %v3494_v5  ;;  %vm3508_vm3 = vcmp.lt.f32.partialorder %v3507_v1, 0.0004427343 }
 0xafe   : > { %v3524_v25 = vmul.f32 2.0, %v3500_v3  ;;  %v3506_v19 = vmul.f32 %v4674_v24, %v3505_v22  ;;  %v3804_v56 = vsel %vm6309_vm2, %v3801_v9, %v3798_v44 }
 0xb00   : > { %v3540_v28 = vadd.f32 %v3524_v25, %v3316_v17  ;;  %v3843_v17 = vadd.f32 %v3827_v55, %v3619_v51  ;;  %v3828_v51 = vmul.f32 2.0, %v3804_v56  ;;  %v3900_v33 = vpop.xlane.xlu1 %3899 }
 0xb02   : > { %v4680_v58 = vpop.eup %4679  ;;  %v3556_v15 = vsub.f32 0.0, %v3540_v28  ;;  %v3859_v54 = vsub.f32 0.0, %v3843_v17  ;;  %v3844_v49 = vadd.f32 %v3828_v51, %v3620_v53 }
 0xb03   : > { %v3503_v46 = vmul.f32 0.6931472, %v4680_v58  ;;  %v3885_v47 = vpop.xlane.xlu2 %3884 }
 0xb04   : > { %v3600_v50 = vsel %vm503_vm0, %v3556_v15, 0.0  ;;  %v3901_v29 = vsel %vm503_vm0, %v3859_v54, 0.0 }
 0xb05   : > { %3601 = vadd.xlane.f32.xlu2 %v3600_v50  ;;  %3908 = vadd.xlane.f32.xlu1 %v3907_v61  ;;  %v3509_v45 = vsel %vm3508_vm3, %v3506_v19, %v3503_v46 }
 0xb06   : > { %v3525_v62 = vmul.f32 2.0, %v3509_v45 }
 0xb08   : > { %v3560_v10 = vpop.xlane.xlu0 %3559  ;;  %v3541_v11 = vadd.f32 %v3525_v62, %v3317_v35  ;;  %v3860_v35 = vsub.f32 0.0, %v3844_v49 }
 0xb09   : > { %v3910_v21 = vadd.f32 %v6274_v40, %v3560_v10 }
 0xb0a   : > { %v3557_v43 = vsub.f32 0.0, %v3541_v11  ;;  %v3904_v40 = vsel %vm503_vm0, %v3860_v35, 0.0 }
 0xb0b   : > { %3958 = vst [vmem:[%s6323_s15] sm:$0xff] %v3910_v21  ;;  %v3894_v53 = vpop.xlane.xlu2 %3893 }
 0xb0c   : > { %v3603_v60 = vsel %vm503_vm0, %v3557_v43, 0.0 }
 0xb0d   : > { %3902 = vadd.xlane.f32.xlu2 %v3901_v29  ;;  %3604 = vadd.xlane.f32.xlu0 %v3603_v60 }
 0xb10   : > { %v3563_v2 = vpop.xlane.xlu0 %3562 }
 0xb11   : > { %v3911_v16 = vadd.f32 %v3867_v8, %v3563_v2 }
 0xb13   : > { %3959 = vst [vmem:[%s6323_s15 + $0x8] sm:$0xff] %v3911_v16 }
 0xb15   : > { %3905 = vadd.xlane.f32.xlu0 %v3904_v40 }
 0xb18   : > { %v3566_v7 = vpop.xlane.xlu1 %3565 }
 0xb19   : > { %v3912_v37 = vadd.f32 %v6255_v34, %v3566_v7 }
 0xb1b   : > { %3960 = vst [vmem:[%s6323_s15 + $0x10] sm:$0xff] %v3912_v37 }
 0xb20   : > { %v3569_v24 = vpop.xlane.xlu1 %3568 }
 0xb21   : > { %v3913_v36 = vadd.f32 %v6286_v20, %v3569_v24 }
 0xb23   : > { %3961 = vst [vmem:[%s6323_s15 + $0x18] sm:$0xff] %v3913_v36 }
 0xb28   : > { %v3572_v52 = vpop.xlane.xlu2 %3571 }
 0xb29   : > { %v3914_v41 = vadd.f32 %v3876_v63, %v3572_v52 }
 0xb2b   : > { %3962 = vst [vmem:[%s6323_s15 + $0x20] sm:$0xff] %v3914_v41 }
 0xb30   : > { %v3575_v4 = vpop.xlane.xlu2 %3574 }
 0xb31   : > { %v3915_v59 = vadd.f32 %v6276_v48, %v3575_v4 }
 0xb33   : > { %3963 = vst [vmem:[%s6323_s15 + $0x28] sm:$0xff] %v3915_v59 }
 0xb38   : > { %v3578_v18 = vpop.xlane.xlu0 %3577 }
 0xb39   : > { %v3916_v5 = vadd.f32 %v3882_v23, %v3578_v18 }
 0xb3b   : > { %3964 = vst [vmem:[%s6323_s15 + $0x30] sm:$0xff] %v3916_v5 }
 0xb40   : > { %v3581_v34 = vpop.xlane.xlu1 %3580 }
 0xb41   : > { %v3917_v32 = vadd.f32 %v3885_v47, %v3581_v34 }
 0xb43   : > { %3965 = vst [vmem:[%s6323_s15 + $0x38] sm:$0xff] %v3917_v32 }
 0xb48   : > { %v3584_v20 = vpop.xlane.xlu2 %3583 }
 0xb49   : > { %v3918_v0 = vadd.f32 %v6288_v13, %v3584_v20 }
 0xb4b   : > { %3966 = vst [vmem:[%s6323_s15 + $0x40] sm:$0xff] %v3918_v0 }
 0xb50   : > { %v3587_v27 = vpop.xlane.xlu0 %3586 }
 0xb51   : > { %v3919_v57 = vadd.f32 %v3891_v14, %v3587_v27 }
 0xb53   : > { %3967 = vst [vmem:[%s6323_s15 + $0x48] sm:$0xff] %v3919_v57 }
 0xb58   : > { %v3590_v30 = vpop.xlane.xlu1 %3589 }
 0xb59   : > { %v3920_v48 = vadd.f32 %v3894_v53, %v3590_v30 }
 0xb5b   : > { %3968 = vst [vmem:[%s6323_s15 + $0x50] sm:$0xff] %v3920_v48 }
 0xb60   : > { %v3593_v3 = vpop.xlane.xlu2 %3592 }
 0xb61   : > { %v3921_v26 = vadd.f32 %v6304_v6, %v3593_v3 }
 0xb63   : > { %3969 = vst [vmem:[%s6323_s15 + $0x58] sm:$0xff] %v3921_v26 }
 0xb68   : > { %v3596_v38 = vpop.xlane.xlu0 %3595 }
 0xb69   : > { %v3922_v25 = vadd.f32 %v3900_v33, %v3596_v38 }
 0xb6b   : > { %3970 = vst [vmem:[%s6323_s15 + $0x60] sm:$0xff] %v3922_v25 }
 0xb70   : > { %v3599_v22 = vpop.xlane.xlu1 %3598 }
 0xb78   : > { %v3602_v12 = vpop.xlane.xlu2 %3601  ;;  %v3909_v13 = vpop.xlane.xlu1 %3908 }
 0xb80   : > { %v3903_v42 = vpop.xlane.xlu2 %3902  ;;  %v3605_v23 = vpop.xlane.xlu0 %3604 }
 0xb81   : > { %v3923_v28 = vadd.f32 %v3903_v42, %v3599_v22  ;;  %v3925_v39 = vadd.f32 %v3909_v13, %v3605_v23 }
 0xb83   : > { %3971 = vst [vmem:[%s6323_s15 + $0x68] sm:$0xff] %v3923_v28 }
 0xb84   : > { %3973 = vst [vmem:[%s6323_s15 + $0x78] sm:$0xff] %v3925_v39 }
 0xb88   : > { %v3906_v55 = vpop.xlane.xlu0 %3905 }
 0xb89   : > { %v3924_v1 = vadd.f32 %v3906_v55, %v3602_v12 }
 0xb8b   : > { %3972 = vst [vmem:[%s6323_s15 + $0x70] sm:$0xff] %v3924_v1 }
 0xb8c PF: > { %s23_s21 = sadd.s32 1, %s4703_s21  }
 0xb8d   : > { %p20_p4 = scmp.ge.s32.totalorder %s23_s21, 6  }
 0xb8f   :  { %22 = sbr.rel (!%p20_p4) target bundleno = 1 (0x1), region = 151 }

</bundles_post_ra>
